<compile_context>
chip_gen: v6e
topology: v6e:2x2x1
jax: 0.10.0
libtpu: 0.0.40
codegen_flags: <defaults>
</compile_context>

<pallas_src>
import math
from functools import partial

import jax
import jax.numpy as jnp
from jax.experimental import pallas as pl
from jax.experimental.pallas import tpu as pltpu

NEG_SLOPE = -0.26


def _round_up(x, m):
    return (x + m - 1) // m * m


def _make_kernel(N, Ho, Wo_pad, KH, KW, Cin_p):
    """Fused transposed-conv (gather/im2col form) + bias + leaky-ReLU kernel."""
    M = N * Ho * Wo_pad

    def kernel(*refs):
        # refs = (slab_0 .. slab_{KW-1}, w, b, out, lhs_scratch)
        # slab_dw: (N, Hp, Wo_pad, Cin_p) bf16, pre-shifted so that
        #          slab_dw[n, ho+dh, wo, :] == x_halo[n, ho+dh, wo+dw, :]
        # w_ref  : (KH*KW*Cin_p, Cout_p) bf16, tap-major, spatially flipped
        # b_ref  : (1, Cout_p) f32
        # o_ref  : (M, Cout_p) f32   (flat, sublane/lane dense)
        # lhs_ref: (M, KH*KW*Cin_p) bf16 VMEM scratch
        xp_refs = refs[:KW]
        w_ref, b_ref, o_ref, lhs_ref = refs[KW:]

        # Build the im2col LHS with KH*KW aligned whole-tile copies (slices are
        # on non-tiled dims only; the (…,16,Cin_p)->(M,Cin_p) reshape is
        # layout-preserving for bf16 tiling).
        for dh in range(KH):
            for dw in range(KW):
                t = dh * KW + dw
                win = xp_refs[dw][:, dh:dh + Ho, :, :]        # (N, Ho, Wo_pad, Cin_p)
                lhs_ref[:, t * Cin_p:(t + 1) * Cin_p] = win.reshape(M, Cin_p)

        # One MXU matmul (f32 accumulation) + fused epilogue + single store.
        y = jnp.dot(lhs_ref[...], w_ref[...], preferred_element_type=jnp.float32)
        y = y + b_ref[...]
        o_ref[...] = jnp.where(y > 0, y, y * NEG_SLOPE)

    return kernel


def pack_params(weight, bias):
    """Pre-pack ConvTranspose2d params ONCE (outside the per-call jitted path).

    weight: (Cin, Cout, KH, KW) f32, bias: (Cout,) f32
    Returns (w_packed (KH*KW*Cin_p, Cout_p) bf16, b_packed (1, Cout_p) f32).
    """
    Cin, Cout, KH, KW = weight.shape
    cin_p = _round_up(Cin, 128)
    cout_p = _round_up(Cout, 128)
    # Gather-form taps use the spatially flipped kernel.
    w_flip = jnp.flip(weight, axis=(2, 3))
    w_taps = jnp.transpose(w_flip, (2, 3, 0, 1)).reshape(KH * KW, Cin, Cout)
    w_taps = jnp.pad(w_taps, ((0, 0), (0, cin_p - Cin), (0, cout_p - Cout)))
    w_packed = w_taps.reshape(KH * KW * cin_p, cout_p).astype(jnp.bfloat16)
    b_packed = jnp.pad(bias, (0, cout_p - Cout)).astype(jnp.float32).reshape(1, cout_p)
    return w_packed, b_packed


@partial(jax.jit, static_argnames=("kh", "kw", "cout"))
def conv_transpose2d_fused(x, w_packed, b_packed, *, kh, kw, cout):
    """x: (N, Cin, H, W) f32 -> (N, cout, H+kh-1, W+kw-1) f32 (NCHW)."""
    N, Cin, H, W = x.shape
    cout_p = w_packed.shape[1]
    cin_p = w_packed.shape[0] // (kh * kw)
    Ho, Wo = H + kh - 1, W + kw - 1
    Wo_pad = _round_up(max(Wo, 16), 16)      # bf16 sublane-tile (16) dense slab width
    M = N * Ho * Wo_pad

    # NHWC, lane-padded channels, bf16 operands (MXU accumulates in f32).
    x_nhwc = jnp.transpose(x, (0, 2, 3, 1)).astype(jnp.bfloat16)
    x_nhwc = jnp.pad(x_nhwc, ((0, 0), (0, 0), (0, 0), (0, cin_p - Cin)))

    # One pre-shifted halo slab per kw tap, so the kernel never shifts sublanes:
    #   slab_dw[n, hp, wo, c] = x[n, hp-(kh-1), wo+dw-(kw-1), c]  (zero outside)
    slabs = []
    for dw in range(kw):
        left = (kw - 1) - dw
        slabs.append(jnp.pad(
            x_nhwc,
            ((0, 0), (kh - 1, kh - 1), (left, Wo_pad - W - left), (0, 0))))

    out_flat = pl.pallas_call(
        _make_kernel(N, Ho, Wo_pad, kh, kw, cin_p),
        out_shape=jax.ShapeDtypeStruct((M, cout_p), jnp.float32),
        scratch_shapes=[pltpu.VMEM((M, kh * kw * cin_p), jnp.bfloat16)],
    )(*slabs, w_packed, b_packed)

    out = out_flat.reshape(N, Ho, Wo_pad, cout_p)[:, :, :Wo, :cout]
    # TODO(synk): TPU consumers should keep the NHWC/flat slab; the NCHW
    # transpose below exists only to match the PyTorch module's output layout.
    return jnp.transpose(out, (0, 3, 1, 2))


def _reference(x, weight, bias):
    # Transposed conv (stride 1, pad 0) == regular conv of x padded by k-1
    # with the spatially-flipped kernel, (in, out) axes swapped. Pure f32.
    KH, KW = weight.shape[2], weight.shape[3]
    w_oihw = jnp.transpose(jnp.flip(weight, axis=(2, 3)), (1, 0, 2, 3))
    y = jax.lax.conv_general_dilated(
        x, w_oihw, window_strides=(1, 1),
        padding=((KH - 1, KH - 1), (KW - 1, KW - 1)),
        dimension_numbers=("NCHW", "OIHW", "NCHW"))
    y = y + bias[None, :, None, None]
    return jnp.where(y > 0, y, y * NEG_SLOPE)


if __name__ == "__main__":
    key = jax.random.PRNGKey(0)
    k_x, k_w, k_b = jax.random.split(key, 3)

    N, Cin, Cout, H, W, KH, KW = 2, 242, 317, 8, 8, 2, 2

    # Deterministic parameter init (PyTorch-style uniform bound).
    fan_in = Cout * KH * KW  # ConvTranspose2d fan-in convention
    bound = 1.0 / math.sqrt(fan_in)
    weight = jax.random.uniform(
        k_w, (Cin, Cout, KH, KW), jnp.float32, minval=-bound, maxval=bound)
    bias = jax.random.uniform(
        k_b, (Cout,), jnp.float32, minval=-bound, maxval=bound)

    x = jax.random.normal(k_x, (N, Cin, H, W), dtype=jnp.float32)

    # Weights packed once, outside the per-call jitted forward.
    w_packed, b_packed = pack_params(weight, bias)
    w_packed, b_packed = jax.block_until_ready((w_packed, b_packed))

    y = conv_transpose2d_fused(x, w_packed, b_packed, kh=KH, kw=KW, cout=Cout)
    y = jax.block_until_ready(y)

    assert y.shape == (N, Cout, H + KH - 1, W + KW - 1), y.shape

    y_ref = _reference(x, weight, bias)
    # Tolerance relaxed vs. pure f32 because operands are bf16 (f32 MXU
    # accumulation); observed error is O(1e-3).
    assert jnp.allclose(y, y_ref, rtol=2e-2, atol=2e-2), (
        float(jnp.max(jnp.abs(y - y_ref))))

    print("KERNEL_OK")
</pallas_src>

<mosaic_0001>
module attributes {stable_mosaic.version = 11 : i64} {
  func.func @kernel(%arg0: memref<2x10x16x256xbf16, #tpu.memory_space<vmem>>, %arg1: memref<2x10x16x256xbf16, #tpu.memory_space<vmem>>, %arg2: memref<1024x384xbf16, #tpu.memory_space<vmem>>, %arg3: memref<1x384xf32, #tpu.memory_space<vmem>>, %arg4: memref<288x384xf32, #tpu.memory_space<vmem>>, %arg5: memref<288x1024xbf16, #tpu.memory_space<vmem>>) attributes {dimension_semantics = [], scalar_prefetch = 0 : i64, scratch_operands = 1 : i64, tpu.core_type = #tpu.core_type<tc>} {
    %c0 = arith.constant 0 : index
    %c0_0 = arith.constant 0 : index
    %c0_1 = arith.constant 0 : index
    %c0_2 = arith.constant 0 : index
    %0 = vector.load %arg0[%c0, %c0_0, %c0_1, %c0_2] : memref<2x10x16x256xbf16, #tpu.memory_space<vmem>>, vector<2x9x16x256xbf16>
    %1 = vector.shape_cast %0 : vector<2x9x16x256xbf16> to vector<288x256xbf16>
    %c0_3 = arith.constant 0 : index
    %c0_4 = arith.constant 0 : index
    %2 = vector.load %arg5[%c0_3, %c0_4] : memref<288x1024xbf16, #tpu.memory_space<vmem>>, vector<288x256xbf16>
    tpu.vector_store %arg5[%c0_3, %c0_4], %1 {strides = array<i32>} : memref<288x1024xbf16, #tpu.memory_space<vmem>>, vector<288x256xbf16>,
    %c0_5 = arith.constant 0 : index
    %c0_6 = arith.constant 0 : index
    %c0_7 = arith.constant 0 : index
    %c0_8 = arith.constant 0 : index
    %3 = vector.load %arg1[%c0_5, %c0_6, %c0_7, %c0_8] : memref<2x10x16x256xbf16, #tpu.memory_space<vmem>>, vector<2x9x16x256xbf16>
    %4 = vector.shape_cast %3 : vector<2x9x16x256xbf16> to vector<288x256xbf16>
    %c0_9 = arith.constant 0 : index
    %c256 = arith.constant 256 : index
    %5 = vector.load %arg5[%c0_9, %c256] : memref<288x1024xbf16, #tpu.memory_space<vmem>>, vector<288x256xbf16>
    tpu.vector_store %arg5[%c0_9, %c256], %4 {strides = array<i32>} : memref<288x1024xbf16, #tpu.memory_space<vmem>>, vector<288x256xbf16>,
    %c0_10 = arith.constant 0 : index
    %c1 = arith.constant 1 : index
    %c0_11 = arith.constant 0 : index
    %c0_12 = arith.constant 0 : index
    %6 = vector.load %arg0[%c0_10, %c1, %c0_11, %c0_12] : memref<2x10x16x256xbf16, #tpu.memory_space<vmem>>, vector<2x9x16x256xbf16>
    %7 = vector.shape_cast %6 : vector<2x9x16x256xbf16> to vector<288x256xbf16>
    %c0_13 = arith.constant 0 : index
    %c512 = arith.constant 512 : index
    %8 = vector.load %arg5[%c0_13, %c512] : memref<288x1024xbf16, #tpu.memory_space<vmem>>, vector<288x256xbf16>
    tpu.vector_store %arg5[%c0_13, %c512], %7 {strides = array<i32>} : memref<288x1024xbf16, #tpu.memory_space<vmem>>, vector<288x256xbf16>,
    %c0_14 = arith.constant 0 : index
    %c1_15 = arith.constant 1 : index
    %c0_16 = arith.constant 0 : index
    %c0_17 = arith.constant 0 : index
    %9 = vector.load %arg1[%c0_14, %c1_15, %c0_16, %c0_17] : memref<2x10x16x256xbf16, #tpu.memory_space<vmem>>, vector<2x9x16x256xbf16>
    %10 = vector.shape_cast %9 : vector<2x9x16x256xbf16> to vector<288x256xbf16>
    %c0_18 = arith.constant 0 : index
    %c768 = arith.constant 768 : index
    %11 = vector.load %arg5[%c0_18, %c768] : memref<288x1024xbf16, #tpu.memory_space<vmem>>, vector<288x256xbf16>
    tpu.vector_store %arg5[%c0_18, %c768], %10 {strides = array<i32>} : memref<288x1024xbf16, #tpu.memory_space<vmem>>, vector<288x256xbf16>,
    %c0_19 = arith.constant 0 : index
    %c0_20 = arith.constant 0 : index
    %12 = vector.load %arg5[%c0_19, %c0_20] : memref<288x1024xbf16, #tpu.memory_space<vmem>>, vector<288x1024xbf16>
    %c0_21 = arith.constant 0 : index
    %c0_22 = arith.constant 0 : index
    %13 = vector.load %arg2[%c0_21, %c0_22] : memref<1024x384xbf16, #tpu.memory_space<vmem>>, vector<1024x384xbf16>
    %cst = arith.constant dense<0.000000e+00> : vector<288x384xf32>
    %14 = tpu.matmul %12, %13, %cst {dimension_numbers = #tpu.dot_dimension_numbers<[1], [0], [0], [1], [0, 0, 1, 1], [], []>} : vector<288x1024xbf16>, vector<1024x384xbf16>, vector<288x384xf32> -> vector<288x384xf32>
    %c0_23 = arith.constant 0 : index
    %c0_24 = arith.constant 0 : index
    %15 = vector.load %arg3[%c0_23, %c0_24] : memref<1x384xf32, #tpu.memory_space<vmem>>, vector<1x384xf32>
    %16 = vector.broadcast %15 : vector<1x384xf32> to vector<288x384xf32>
    %17 = arith.addf %14, %16 : vector<288x384xf32>
    %cst_25 = arith.constant 0.000000e+00 : f32
    %18 = vector.broadcast %cst_25 : f32 to vector<288x384xf32>
    %19 = arith.cmpf ogt, %17, %18 : vector<288x384xf32>
    %cst_26 = arith.constant -2.600000e-01 : f32
    %20 = vector.broadcast %cst_26 : f32 to vector<288x384xf32>
    %21 = arith.mulf %17, %20 : vector<288x384xf32>
    %22 = arith.select %19, %17, %21 : vector<288x384xi1>, vector<288x384xf32>
    %c0_27 = arith.constant 0 : index
    %c0_28 = arith.constant 0 : index
    %23 = vector.load %arg4[%c0_27, %c0_28] : memref<288x384xf32, #tpu.memory_space<vmem>>, vector<288x384xf32>
    tpu.vector_store %arg4[%c0_27, %c0_28], %22 {strides = array<i32>} : memref<288x384xf32, #tpu.memory_space<vmem>>, vector<288x384xf32>,
    return
  }
}

</mosaic_0001>

<bundles_post_ra>
// kernel: conv_transpose2d_fused.1
= control target key start
LH: loop header
LB: loop body
LE: loop exit
PB: predicated region body
PF: predicated region fallthrough
CT: control target
= control target key end

     0   :  { %9 = vsyncpa [#allocation4], 0  ;;  %s5427_s15 = smov [#allocation3]   ;;  %s7234_s0 = inlined_call_operand.vmem [shape: bf16[2,10,16,256], index: 0, kind: input, shape index: {}]   ;;  %s7235_s1 = inlined_call_operand.vmem [shape: bf16[2,10,16,256], index: 1, kind: input, shape index: {}]   ;;  %s7236_s2 = inlined_call_operand.hbm [shape: bf16[1024,384], index: 2, kind: input, shape index: {}]   ;;  %s7237_s3 = inlined_call_operand.vmem [shape: f32[1,384], index: 3, kind: input, shape index: {}]   ;;  %s7238_s4 = inlined_call_operand.vmem [shape: f32[288,384], index: 4, kind: output, shape index: {}]  }
   0x1   :  { %s19_s16 = sshll.u32 %s5427_s15, 4  ;;  %s20_s16 = int_to_ptr.vmem [resolvable:$true] %s19_s16 }
   0x2   :  { %s5413_s17 = scalar_lea.vmem %s20_s16, 24576  ;;  %p5418_p1 = scmp.lt.s32.totalorder %s20_s16, %s20_s16 }
   0x3   :  { %p5414_p0 = scmp.ne.s32.totalorder %s20_s16, %s5413_s17  ;;  %p5419_p2 = scmp.lt.s32.totalorder %s5413_s17, %s5413_s17 }
   0x5   :  { %p5420_p3 = por %p5419_p2, %p5418_p1 }
   0x7   :  { %p5421_p4 = pnand %p5420_p3, %p5414_p0 }
   0x9   :  { %5424 = shalt.err (!%p5421_p4)
}
   0xa   :  { %s5428_s18 = smov 192   ;;  %s5429_s19 = smov 12  }
   0xb   :  { %25 = dma.hbm_to_vmem [thread:$0]  %s7236_s2, 24576, %s20_s16, [#allocation4], %s5428_s18, %s5428_s18, %s5429_s19  }
   0xc   :  { %5425 = dma.done.wait [#allocation4], 24576  }
   0xd   :  { %5426 = vsyncadd [#allocation4], 4294942720  ;;  %v4892_v0 = vld [vmem:[#allocation3 + $0xac] ss:$12 sps:$4 sm:$0xff]   ;;  %v4896_v2 = vld [vmem:[#allocation3 + $0xa8] ss:$12 sps:$4 sm:$0xff]  }
   0xe   :  { %v4894_v1 = vld [vmem:[#allocation3 + $0x22c] ss:$12 sps:$4 sm:$0xff]   ;;  %2483 = vmatprep.subr.bf16.mxu0 %v4892_v0  ;;  %v4897_v3 = vld [vmem:[#allocation3 + $0x228] ss:$12 sps:$4 sm:$0xff]   ;;  %v4902_v6 = vld [vmem:[#allocation3 + $0x90] ss:$12 sps:$4 sm:$0xff]  }
   0xf   :  { %2696 = vmatprep.subr.bf16.mxu1 %v4894_v1  ;;  %v4898_v4 = vld [vmem:[#allocation3 + $0x94] ss:$12 sps:$4 sm:$0xff]   ;;  %2484 = vmatpush1.bf16.msra.mxu0 %v4896_v2  ;;  %v4903_v7 = vld [vmem:[#allocation3 + $0x210] ss:$12 sps:$4 sm:$0xff]   ;;  %v4908_v10 = vld [vmem:[#allocation3 + $0x78] ss:$12 sps:$4 sm:$0xff]  }
  0x10   :  { %2697 = vmatpush1.bf16.msra.mxu1 %v4897_v3  ;;  %v4900_v5 = vld [vmem:[#allocation3 + $0x214] ss:$12 sps:$4 sm:$0xff]   ;;  %2485 = vmatprep.subr.bf16.mxu0 %v4898_v4  ;;  %v4904_v8 = vld [vmem:[#allocation3 + $0x7c] ss:$12 sps:$4 sm:$0xff]   ;;  %v4909_v11 = vld [vmem:[#allocation3 + $0x1f8] ss:$12 sps:$4 sm:$0xff]  }
  0x11   :  { %2698 = vmatprep.subr.bf16.mxu1 %v4900_v5  ;;  %v4906_v9 = vld [vmem:[#allocation3 + $0x1fc] ss:$12 sps:$4 sm:$0xff]   ;;  %v4910_v12 = vld [vmem:[#allocation3 + $0x64] ss:$12 sps:$4 sm:$0xff]   ;;  %v4914_v14 = vld [vmem:[#allocation3 + $0x60] ss:$12 sps:$4 sm:$0xff]  }
  0x12   :  { %v4912_v13 = vld [vmem:[#allocation3 + $0x1e4] ss:$12 sps:$4 sm:$0xff]   ;;  %v4915_v15 = vld [vmem:[#allocation3 + $0x1e0] ss:$12 sps:$4 sm:$0xff]   ;;  %v4920_v18 = vld [vmem:[#allocation3 + $0x48] ss:$12 sps:$4 sm:$0xff]  }
  0x13   :  { %2486 = vmatpush1.bf16.msra.mxu0 %v4902_v6  ;;  %v4916_v16 = vld [vmem:[#allocation3 + $0x4c] ss:$12 sps:$4 sm:$0xff]   ;;  %v4921_v19 = vld [vmem:[#allocation3 + $0x1c8] ss:$12 sps:$4 sm:$0xff]   ;;  %v4926_v22 = vld [vmem:[#allocation3 + $0x30] ss:$12 sps:$4 sm:$0xff]  }
  0x14   :  { %2699 = vmatpush1.bf16.msra.mxu1 %v4903_v7  ;;  %2487 = vmatprep.subr.bf16.mxu0 %v4904_v8  ;;  %v4918_v17 = vld [vmem:[#allocation3 + $0x1cc] ss:$12 sps:$4 sm:$0xff]   ;;  %v4922_v20 = vld [vmem:[#allocation3 + $0x34] ss:$12 sps:$4 sm:$0xff]   ;;  %v4927_v23 = vld [vmem:[#allocation3 + $0x1b0] ss:$12 sps:$4 sm:$0xff]  }
  0x15   :  { %2700 = vmatprep.subr.bf16.mxu1 %v4906_v9  ;;  %v4924_v21 = vld [vmem:[#allocation3 + $0x1b4] ss:$12 sps:$4 sm:$0xff]   ;;  %v4928_v24 = vld [vmem:[#allocation3 + $0x1c] ss:$12 sps:$4 sm:$0xff]   ;;  %v4932_v26 = vld [vmem:[#allocation3 + $0x18] ss:$12 sps:$4 sm:$0xff]  }
  0x16   :  { %v4930_v25 = vld [vmem:[#allocation3 + $0x19c] ss:$12 sps:$4 sm:$0xff]   ;;  %v4933_v27 = vld [vmem:[#allocation3 + $0x198] ss:$12 sps:$4 sm:$0xff]   ;;  %v4938_v30 = vld [vmem:[#allocation3] ss:$12 sps:$4 sm:$0xff]  }
  0x17   :  { %2488 = vmatpush1.bf16.msra.mxu0 %v4908_v10  ;;  %v4934_v28 = vld [vmem:[#allocation3 + $0x4] ss:$12 sps:$4 sm:$0xff]   ;;  %v4939_v31 = vld [vmem:[#allocation3 + $0x180] ss:$12 sps:$4 sm:$0xff]   ;;  %v4944_v34 = vld [vmem:[#allocation3 + $0x168] ss:$12 sps:$4 sm:$0xff]  }
  0x18   :  { %2701 = vmatpush1.bf16.msra.mxu1 %v4909_v11  ;;  %2489 = vmatprep.subr.bf16.mxu0 %v4910_v12  ;;  %v4936_v29 = vld [vmem:[#allocation3 + $0x184] ss:$12 sps:$4 sm:$0xff]   ;;  %v4940_v32 = vld [vmem:[#allocation3 + $0x16c] ss:$12 sps:$4 sm:$0xff]   ;;  %v4945_v35 = vld [vmem:[#allocation3 + $0x2e8] ss:$12 sps:$4 sm:$0xff]  }
  0x19   :  { %2702 = vmatprep.subr.bf16.mxu1 %v4912_v13  ;;  %v4942_v33 = vld [vmem:[#allocation3 + $0x2ec] ss:$12 sps:$4 sm:$0xff]   ;;  %v4946_v36 = vld [vmem:[#allocation3 + $0x154] ss:$12 sps:$4 sm:$0xff]   ;;  %v4950_v38 = vld [vmem:[#allocation3 + $0x150] ss:$12 sps:$4 sm:$0xff]  }
  0x1a   :  { %v4948_v37 = vld [vmem:[#allocation3 + $0x2d4] ss:$12 sps:$4 sm:$0xff]   ;;  %v4951_v39 = vld [vmem:[#allocation3 + $0x2d0] ss:$12 sps:$4 sm:$0xff]   ;;  %v4956_v42 = vld [vmem:[#allocation3 + $0x138] ss:$12 sps:$4 sm:$0xff]  }
  0x1b   :  { %2490 = vmatpush1.bf16.msra.mxu0 %v4914_v14  ;;  %v4952_v40 = vld [vmem:[#allocation3 + $0x13c] ss:$12 sps:$4 sm:$0xff]   ;;  %v4957_v43 = vld [vmem:[#allocation3 + $0x2b8] ss:$12 sps:$4 sm:$0xff]   ;;  %v4962_v46 = vld [vmem:[#allocation3 + $0x120] ss:$12 sps:$4 sm:$0xff]  }
  0x1c   :  { %2703 = vmatpush1.bf16.msra.mxu1 %v4915_v15  ;;  %2491 = vmatprep.subr.bf16.mxu0 %v4916_v16  ;;  %v4954_v41 = vld [vmem:[#allocation3 + $0x2bc] ss:$12 sps:$4 sm:$0xff]   ;;  %v4958_v44 = vld [vmem:[#allocation3 + $0x124] ss:$12 sps:$4 sm:$0xff]   ;;  %v4963_v47 = vld [vmem:[#allocation3 + $0x2a0] ss:$12 sps:$4 sm:$0xff]  }
  0x1d   :  { %2704 = vmatprep.subr.bf16.mxu1 %v4918_v17  ;;  %v4960_v45 = vld [vmem:[#allocation3 + $0x2a4] ss:$12 sps:$4 sm:$0xff]   ;;  %v4964_v48 = vld [vmem:[#allocation3 + $0x10c] ss:$12 sps:$4 sm:$0xff]   ;;  %v4968_v52 = vld [vmem:[#allocation3 + $0x108] ss:$12 sps:$4 sm:$0xff]  }
  0x1e   :  { %v4990_v49 = vld [vmem:[%s7234_s0 + $0x4] ss:$8 sps:$4 sm:$0xff]   ;;  %v4969_v53 = vld [vmem:[#allocation3 + $0x288] ss:$12 sps:$4 sm:$0xff]   ;;  %v4974_v56 = vld [vmem:[#allocation3 + $0xf0] ss:$12 sps:$4 sm:$0xff]  }
  0x1f   :  { %2492 = vmatpush1.bf16.msra.mxu0 %v4920_v18  ;;  %v4966_v50 = vld [vmem:[#allocation3 + $0x28c] ss:$12 sps:$4 sm:$0xff]   ;;  %2515 = vmatprep.mubr.bf16.mxu0 %v4990_v49  ;;  %v4970_v54 = vld [vmem:[#allocation3 + $0xf4] ss:$12 sps:$4 sm:$0xff]   ;;  %v4975_v57 = vld [vmem:[#allocation3 + $0x270] ss:$12 sps:$4 sm:$0xff]  }
  0x20   :  { %2705 = vmatpush1.bf16.msra.mxu1 %v4921_v19  ;;  %2493 = vmatprep.subr.bf16.mxu0 %v4922_v20  ;;  %v4993_v51 = vld [vmem:[%s7235_s1 + $0x4] ss:$8 sps:$4 sm:$0xff]   ;;  %v4972_v55 = vld [vmem:[#allocation3 + $0x274] ss:$12 sps:$4 sm:$0xff]   ;;  %v4976_v58 = vld [vmem:[#allocation3 + $0xdc] ss:$12 sps:$4 sm:$0xff]  }
  0x21   :  { %2706 = vmatprep.subr.bf16.mxu1 %v4924_v21  ;;  %2728 = vmatprep.mubr.bf16.mxu1 %v4993_v51  ;;  %v4978_v59 = vld [vmem:[#allocation3 + $0x25c] ss:$12 sps:$4 sm:$0xff]   ;;  %v4980_v60 = vld [vmem:[#allocation3 + $0xd8] ss:$12 sps:$4 sm:$0xff]   ;;  %v4986_v0 = vld [vmem:[#allocation3 + $0xc0] ss:$12 sps:$4 sm:$0xff]  }
  0x22   :  { %v4981_v61 = vld [vmem:[#allocation3 + $0x258] ss:$12 sps:$4 sm:$0xff]   ;;  %v4987_v1 = vld [vmem:[#allocation3 + $0x240] ss:$12 sps:$4 sm:$0xff]   ;;  %v4994_v6 = vld [vmem:[#allocation3 + $0x3a8] ss:$12 sps:$4 sm:$0xff]  }
  0x23   :  { %2494 = vmatpush1.bf16.msra.mxu0 %v4926_v22  ;;  %v4982_v62 = vld [vmem:[#allocation3 + $0xc4] ss:$12 sps:$4 sm:$0xff]   ;;  %v4996_v2 = vld [vmem:[#allocation3 + $0x3ac] ss:$12 sps:$4 sm:$0xff]   ;;  %v4988_v4 = vld [vmem:[%s7234_s0] ss:$8 sps:$4 sm:$0xff]  }
  0x24   :  { %2707 = vmatpush1.bf16.msra.mxu1 %v4927_v23  ;;  %2495 = vmatprep.subr.bf16.mxu0 %v4928_v24  ;;  %v4984_v63 = vld [vmem:[#allocation3 + $0x244] ss:$12 sps:$4 sm:$0xff]   ;;  %v4999_v3 = vld [vmem:[#allocation3 + $0x52c] ss:$12 sps:$4 sm:$0xff]   ;;  %v4991_v5 = vld [vmem:[%s7235_s1] ss:$8 sps:$4 sm:$0xff]  }
  0x25   :  { %2708 = vmatprep.subr.bf16.mxu1 %v4930_v25  ;;  %v4997_v7 = vld [vmem:[#allocation3 + $0x528] ss:$12 sps:$4 sm:$0xff]   ;;  %v5006_v12 = vld [vmem:[#allocation3 + $0x390] ss:$12 sps:$4 sm:$0xff]   ;;  %v5496_v18 = vld [vmem:[%s7234_s0 + $0x24] ss:$8 sps:$4 sm:$0xff]  }
  0x26   :  { %v5474_v8 = vld [vmem:[%s7234_s0 + $0x14] ss:$8 sps:$4 sm:$0xff]   ;;  %v5486_v15 = vld [vmem:[%s7234_s0 + $0x10] ss:$8 sps:$4 sm:$0xff]   ;;  %v5501_v19 = vld [vmem:[%s7235_s1 + $0x24] ss:$8 sps:$4 sm:$0xff]  }
  0x27   :  { %2496 = vmatpush1.bf16.msra.mxu0 %v4932_v26  ;;  %v5479_v9 = vld [vmem:[%s7235_s1 + $0x14] ss:$8 sps:$4 sm:$0xff]   ;;  %v5491_v17 = vld [vmem:[%s7235_s1 + $0x10] ss:$8 sps:$4 sm:$0xff]   ;;  %v5030_v24 = vld [vmem:[#allocation3 + $0x360] ss:$12 sps:$4 sm:$0xff]  }
  0x28   :  { %2709 = vmatpush1.bf16.msra.mxu1 %v4933_v27  ;;  %2497 = vmatprep.subr.bf16.mxu0 %v4934_v28  ;;  %v5008_v10 = vld [vmem:[#allocation3 + $0x394] ss:$12 sps:$4 sm:$0xff]   ;;  %v5009_v13 = vld [vmem:[#allocation3 + $0x510] ss:$12 sps:$4 sm:$0xff]   ;;  %v5018_v20 = vld [vmem:[#allocation3 + $0x378] ss:$12 sps:$4 sm:$0xff]  }
  0x29   :  { %2710 = vmatprep.subr.bf16.mxu1 %v4936_v29  ;;  %v5011_v11 = vld [vmem:[#allocation3 + $0x514] ss:$12 sps:$4 sm:$0xff]   ;;  %v5020_v14 = vld [vmem:[#allocation3 + $0x37c] ss:$12 sps:$4 sm:$0xff]   ;;  %v5021_v21 = vld [vmem:[#allocation3 + $0x4f8] ss:$12 sps:$4 sm:$0xff]  }
  0x2a   :  { %v5023_v16 = vld [vmem:[#allocation3 + $0x4fc] ss:$12 sps:$4 sm:$0xff]   ;;  %v5032_v22 = vld [vmem:[#allocation3 + $0x364] ss:$12 sps:$4 sm:$0xff]   ;;  %v5033_v27 = vld [vmem:[#allocation3 + $0x4e0] ss:$12 sps:$4 sm:$0xff]  }
  0x2b   :  { %2498 = vmatpush1.bf16.msra.mxu0 %v4938_v30  ;;  %v5035_v23 = vld [vmem:[#allocation3 + $0x4e4] ss:$12 sps:$4 sm:$0xff]   ;;  %v5510_v25 = vld [vmem:[%s7234_s0 + $0x20] ss:$8 sps:$4 sm:$0xff]   ;;  %v5044_v28 = vld [vmem:[#allocation3 + $0x34c] ss:$12 sps:$4 sm:$0xff]  }
  0x2c   :  { %2711 = vmatpush1.bf16.msra.mxu1 %v4939_v31  ;;  %2499 = vmatprep.subr.bf16.mxu0 %v4940_v32  ;;  %v5515_v26 = vld [vmem:[%s7235_s1 + $0x20] ss:$8 sps:$4 sm:$0xff]   ;;  %v5047_v29 = vld [vmem:[#allocation3 + $0x4cc] ss:$12 sps:$4 sm:$0xff]   ;;  %v5520_v30 = vld [vmem:[%s7234_s0 + $0x34] ss:$8 sps:$4 sm:$0xff]  }
  0x2d   :  { %2712 = vmatprep.subr.bf16.mxu1 %v4942_v33  ;;  %v5525_v31 = vld [vmem:[%s7235_s1 + $0x34] ss:$8 sps:$4 sm:$0xff]   ;;  %v5087_v49 = vld [vmem:[#allocation3 + $0x480] ss:$12 sps:$4 sm:$0xff]  }
  0x2e   :  { %v5042_v32 = vld [vmem:[#allocation3 + $0x348] ss:$12 sps:$4 sm:$0xff]   ;;  %v5098_v51 = vld [vmem:[#allocation3 + $0x46c] ss:$12 sps:$4 sm:$0xff]  }
  0x2f   :  { %2500 = vmatpush2.bf16.msra.mxu0 %v4944_v34  ;;  %v5045_v33 = vld [vmem:[#allocation3 + $0x4c8] ss:$12 sps:$4 sm:$0xff]  }
  0x30   :  { %2713 = vmatpush2.bf16.msra.mxu1 %v4945_v35  ;;  %2501 = vmatprep.subr.bf16.mxu0 %v4946_v36  ;;  %v5056_v34 = vld [vmem:[#allocation3 + $0x334] ss:$12 sps:$4 sm:$0xff]   ;;  %v5534_v36 = vld [vmem:[%s7234_s0 + $0x30] ss:$8 sps:$4 sm:$0xff]  }
  0x31   :  { %2714 = vmatprep.subr.bf16.mxu1 %v4948_v37  ;;  %v5063_v35 = vld [vmem:[#allocation3 + $0x4b4] ss:$12 sps:$4 sm:$0xff]   ;;  %v5539_v37 = vld [vmem:[%s7235_s1 + $0x30] ss:$8 sps:$4 sm:$0xff]  }
  0x33   :  { %2502 = vmatpush2.bf16.msra.mxu0 %v4950_v38  ;;  %v5054_v38 = vld [vmem:[#allocation3 + $0x330] ss:$12 sps:$4 sm:$0xff]  }
  0x34   :  { %2715 = vmatpush2.bf16.msra.mxu1 %v4951_v39  ;;  %2503 = vmatprep.subr.bf16.mxu0 %v4952_v40  ;;  %v5061_v39 = vld [vmem:[#allocation3 + $0x4b0] ss:$12 sps:$4 sm:$0xff]  }
  0x35   :  { %2716 = vmatprep.subr.bf16.mxu1 %v4954_v41  ;;  %v5068_v40 = vld [vmem:[#allocation3 + $0x31c] ss:$12 sps:$4 sm:$0xff]  }
  0x36   :  { %v5077_v41 = vld [vmem:[#allocation3 + $0x49c] ss:$12 sps:$4 sm:$0xff]  }
  0x37   :  { %2504 = vmatpush2.bf16.msra.mxu0 %v4956_v42  ;;  %v5544_v42 = vld [vmem:[%s7234_s0 + $0x44] ss:$8 sps:$4 sm:$0xff]  }
  0x38   :  { %2717 = vmatpush2.bf16.msra.mxu1 %v4957_v43  ;;  %2505 = vmatprep.subr.bf16.mxu0 %v4958_v44  ;;  %v5549_v43 = vld [vmem:[%s7235_s1 + $0x44] ss:$8 sps:$4 sm:$0xff]  }
  0x39   :  { %2718 = vmatprep.subr.bf16.mxu1 %v4960_v45  ;;  %v5066_v44 = vld [vmem:[#allocation3 + $0x318] ss:$12 sps:$4 sm:$0xff]  }
  0x3a   :  { %v5075_v45 = vld [vmem:[#allocation3 + $0x498] ss:$12 sps:$4 sm:$0xff]  }
  0x3b   :  { %2506 = vmatpush2.bf16.msra.mxu0 %v4962_v46  ;;  %v5084_v46 = vld [vmem:[#allocation3 + $0x304] ss:$12 sps:$4 sm:$0xff]  }
  0x3c   :  { %2719 = vmatpush2.bf16.msra.mxu1 %v4963_v47  ;;  %2507 = vmatprep.subr.bf16.mxu0 %v4964_v48  ;;  %v5089_v47 = vld [vmem:[#allocation3 + $0x484] ss:$12 sps:$4 sm:$0xff]   ;;  %v5082_v48 = vld [vmem:[#allocation3 + $0x300] ss:$12 sps:$4 sm:$0xff]  }
  0x3d   :  { %2720 = vmatprep.subr.bf16.mxu1 %v4966_v50  ;;  %v5558_v50 = vld [vmem:[%s7234_s0 + $0x40] ss:$8 sps:$4 sm:$0xff]  }
  0x3f   :  { %2508 = vmatpush2.bf16.msra.mxu0 %v4968_v52  ;;  %v5101_v52 = vld [vmem:[#allocation3 + $0x5ec] ss:$12 sps:$4 sm:$0xff]  }
  0x40   :  { %2721 = vmatpush2.bf16.msra.mxu1 %v4969_v53  ;;  %2509 = vmatprep.subr.bf16.mxu0 %v4970_v54  ;;  %v5563_v53 = vld [vmem:[%s7235_s1 + $0x40] ss:$8 sps:$4 sm:$0xff]   ;;  %v5568_v54 = vld [vmem:[%s7234_s0 + $0x54] ss:$8 sps:$4 sm:$0xff]  }
  0x41   :  { %2722 = vmatprep.subr.bf16.mxu1 %v4972_v55  ;;  %v5573_v55 = vld [vmem:[%s7235_s1 + $0x54] ss:$8 sps:$4 sm:$0xff]  }
  0x43   :  { %2510 = vmatpush2.bf16.msra.mxu0 %v4974_v56  ;;  %v5096_v56 = vld [vmem:[#allocation3 + $0x468] ss:$12 sps:$4 sm:$0xff]  }
  0x44   :  { %2723 = vmatpush2.bf16.msra.mxu1 %v4975_v57  ;;  %2511 = vmatprep.subr.bf16.mxu0 %v4976_v58  ;;  %v5099_v57 = vld [vmem:[#allocation3 + $0x5e8] ss:$12 sps:$4 sm:$0xff]  }
  0x45   :  { %2724 = vmatprep.subr.bf16.mxu1 %v4978_v59  ;;  %v5110_v58 = vld [vmem:[#allocation3 + $0x454] ss:$12 sps:$4 sm:$0xff]  }
  0x46   :  { %v5113_v59 = vld [vmem:[#allocation3 + $0x5d4] ss:$12 sps:$4 sm:$0xff]  }
  0x47   :  { %2512 = vmatpush2.bf16.msra.mxu0 %v4980_v60  ;;  %v5108_v60 = vld [vmem:[#allocation3 + $0x450] ss:$12 sps:$4 sm:$0xff]  }
  0x48   :  { %2725 = vmatpush2.bf16.msra.mxu1 %v4981_v61  ;;  %2513 = vmatprep.subr.bf16.mxu0 %v4982_v62  ;;  %v5582_v61 = vld [vmem:[%s7234_s0 + $0x50] ss:$8 sps:$4 sm:$0xff]  }
  0x49   :  { %2726 = vmatprep.subr.bf16.mxu1 %v4984_v63  ;;  %v5587_v62 = vld [vmem:[%s7235_s1 + $0x50] ss:$8 sps:$4 sm:$0xff]  }
  0x4a   :  { %v5111_v63 = vld [vmem:[#allocation3 + $0x5d0] ss:$12 sps:$4 sm:$0xff]  }
  0x4b   :  { %2514 = vmatpush2.bf16.msra.mxu0 %v4986_v0  ;;  %v5592_v0 = vld [vmem:[%s7234_s0 + $0x64] ss:$8 sps:$4 sm:$0xff]  }
  0x4c   :  { %2727 = vmatpush2.bf16.msra.mxu1 %v4987_v1  ;;  %2909 = vmatprep.subr.bf16.mxu0 %v4996_v2  ;;  %v5122_v1 = vld [vmem:[#allocation3 + $0x43c] ss:$12 sps:$4 sm:$0xff]   ;;  %v5597_v2 = vld [vmem:[%s7235_s1 + $0x64] ss:$8 sps:$4 sm:$0xff]  }
  0x4d   :  { %3122 = vmatprep.subr.bf16.mxu1 %v4999_v3  ;;  %v5125_v3 = vld [vmem:[#allocation3 + $0x5bc] ss:$12 sps:$4 sm:$0xff]  }
  0x4e   :  { %2516 = vmatmul.mubr.bf16.vlgmr.msra.gmra.mxu0 %v4988_v4  ;;  %v5120_v4 = vld [vmem:[#allocation3 + $0x438] ss:$12 sps:$4 sm:$0xff]  }
  0x4f   :  { %2729 = vmatmul.mubr.bf16.vlgmr.msra.gmra.mxu1 %v4991_v5  ;;  %2910 = vmatpush1.bf16.msra.mxu0 %v4994_v6  ;;  %v5123_v5 = vld [vmem:[#allocation3 + $0x5b8] ss:$12 sps:$4 sm:$0xff]   ;;  %v5132_v6 = vld [vmem:[#allocation3 + $0x420] ss:$12 sps:$4 sm:$0xff]  }
  0x50   :  { %3123 = vmatpush1.bf16.msra.mxu1 %v4997_v7  ;;  %2525 = vmatprep.mubr.bf16.mxu0 %v5474_v8  ;;  %v5134_v7 = vld [vmem:[#allocation3 + $0x424] ss:$12 sps:$4 sm:$0xff]  }
  0x51   :  { %2738 = vmatprep.mubr.bf16.mxu1 %v5479_v9  ;;  %2911 = vmatprep.subr.bf16.mxu0 %v5008_v10  ;;  %v5135_v10 = vld [vmem:[#allocation3 + $0x5a0] ss:$12 sps:$4 sm:$0xff]  }
  0x52   :  { %3124 = vmatprep.subr.bf16.mxu1 %v5011_v11  ;;  %v5137_v11 = vld [vmem:[#allocation3 + $0x5a4] ss:$12 sps:$4 sm:$0xff]  }
  0x53   :  { %2912 = vmatpush1.bf16.msra.mxu0 %v5006_v12  ;;  %v5606_v12 = vld [vmem:[%s7234_s0 + $0x60] ss:$8 sps:$4 sm:$0xff]  }
  0x54   :  { %3125 = vmatpush1.bf16.msra.mxu1 %v5009_v13  ;;  %2913 = vmatprep.subr.bf16.mxu0 %v5020_v14  ;;  %v5611_v13 = vld [vmem:[%s7235_s1 + $0x60] ss:$8 sps:$4 sm:$0xff]   ;;  %v5616_v14 = vld [vmem:[%s7234_s0 + $0x74] ss:$8 sps:$4 sm:$0xff]  }
  0x55   :  { %3126 = vmatprep.subr.bf16.mxu1 %v5023_v16  ;;  %v5621_v16 = vld [vmem:[%s7235_s1 + $0x74] ss:$8 sps:$4 sm:$0xff]  }
  0x56   :  { %2526 = vmatmul.mubr.bf16.gmra.mxu0 %v5486_v15 }
  0x57   :  { %2739 = vmatmul.mubr.bf16.gmra.mxu1 %v5491_v17  ;;  %2535 = vmatprep.mubr.bf16.mxu0 %v5496_v18 }
  0x58   :  { %2748 = vmatprep.mubr.bf16.mxu1 %v5501_v19  ;;  %2914 = vmatpush1.bf16.msra.mxu0 %v5018_v20  ;;  %v5144_v20 = vld [vmem:[#allocation3 + $0x408] ss:$12 sps:$4 sm:$0xff]  }
  0x59   :  { %3127 = vmatpush1.bf16.msra.mxu1 %v5021_v21  ;;  %2915 = vmatprep.subr.bf16.mxu0 %v5032_v22  ;;  %v5146_v21 = vld [vmem:[#allocation3 + $0x40c] ss:$12 sps:$4 sm:$0xff]   ;;  %v5147_v22 = vld [vmem:[#allocation3 + $0x588] ss:$12 sps:$4 sm:$0xff]  }
  0x5a   :  { %3128 = vmatprep.subr.bf16.mxu1 %v5035_v23  ;;  %v5149_v23 = vld [vmem:[#allocation3 + $0x58c] ss:$12 sps:$4 sm:$0xff]  }
  0x5c   :  { %2916 = vmatpush1.bf16.msra.mxu0 %v5030_v24  ;;  %v5630_v24 = vld [vmem:[%s7234_s0 + $0x70] ss:$8 sps:$4 sm:$0xff]  }
  0x5d   :  { %3129 = vmatpush1.bf16.msra.mxu1 %v5033_v27  ;;  %2917 = vmatprep.subr.bf16.mxu0 %v5044_v28  ;;  %v5635_v27 = vld [vmem:[%s7235_s1 + $0x70] ss:$8 sps:$4 sm:$0xff]  }
  0x5e   :  { %3130 = vmatprep.subr.bf16.mxu1 %v5047_v29  ;;  %2536 = vmatmul.mubr.bf16.gmra.mxu0 %v5510_v25  ;;  %v5156_v28 = vld [vmem:[#allocation3 + $0x3f0] ss:$12 sps:$4 sm:$0xff]   ;;  %v5158_v29 = vld [vmem:[#allocation3 + $0x3f4] ss:$12 sps:$4 sm:$0xff]  }
  0x5f   :  { %2749 = vmatmul.mubr.bf16.gmra.mxu1 %v5515_v26  ;;  %2545 = vmatprep.mubr.bf16.mxu0 %v5520_v30 }
  0x60   :  { %2758 = vmatprep.mubr.bf16.mxu1 %v5525_v31  ;;  %2918 = vmatpush1.bf16.msra.mxu0 %v5042_v32  ;;  %v5640_v32 = vld [vmem:[%s7234_s0 + $0x84] ss:$8 sps:$4 sm:$0xff]  }
  0x61   :  { %3131 = vmatpush1.bf16.msra.mxu1 %v5045_v33  ;;  %2919 = vmatprep.subr.bf16.mxu0 %v5056_v34  ;;  %v5645_v33 = vld [vmem:[%s7235_s1 + $0x84] ss:$8 sps:$4 sm:$0xff]   ;;  %v5165_v34 = vld [vmem:[#allocation3 + $0x574] ss:$12 sps:$4 sm:$0xff]  }
  0x62   :  { %3132 = vmatprep.subr.bf16.mxu1 %v5063_v35  ;;  %v5163_v35 = vld [vmem:[#allocation3 + $0x570] ss:$12 sps:$4 sm:$0xff]  }
  0x64   :  { %2920 = vmatpush1.bf16.msra.mxu0 %v5054_v38  ;;  %v5168_v38 = vld [vmem:[#allocation3 + $0x3d8] ss:$12 sps:$4 sm:$0xff]  }
  0x65   :  { %3133 = vmatpush1.bf16.msra.mxu1 %v5061_v39  ;;  %2921 = vmatprep.subr.bf16.mxu0 %v5068_v40  ;;  %v5170_v39 = vld [vmem:[#allocation3 + $0x3dc] ss:$12 sps:$4 sm:$0xff]  }
  0x66   :  { %3134 = vmatprep.subr.bf16.mxu1 %v5077_v41  ;;  %2546 = vmatmul.mubr.bf16.gmra.mxu0 %v5534_v36  ;;  %v5654_v40 = vld [vmem:[%s7234_s0 + $0x80] ss:$8 sps:$4 sm:$0xff]  }
  0x67   :  { %2759 = vmatmul.mubr.bf16.gmra.mxu1 %v5539_v37  ;;  %2555 = vmatprep.mubr.bf16.mxu0 %v5544_v42  ;;  %v5659_v41 = vld [vmem:[%s7235_s1 + $0x80] ss:$8 sps:$4 sm:$0xff]  }
  0x68   :  { %2768 = vmatprep.mubr.bf16.mxu1 %v5549_v43  ;;  %2922 = vmatpush1.bf16.msra.mxu0 %v5066_v44  ;;  %v5090_v44 = vld [vmem:[%s7234_s0 + $0xa4] ss:$8 sps:$4 sm:$0xff]  }
  0x69   :  { %3135 = vmatpush1.bf16.msra.mxu1 %v5075_v45  ;;  %2923 = vmatprep.subr.bf16.mxu0 %v5084_v46  ;;  %v5177_v45 = vld [vmem:[#allocation3 + $0x558] ss:$12 sps:$4 sm:$0xff]   ;;  %v5179_v46 = vld [vmem:[#allocation3 + $0x55c] ss:$12 sps:$4 sm:$0xff]  }
  0x6a   :  { %3136 = vmatprep.subr.bf16.mxu1 %v5089_v47  ;;  %v5092_v47 = vld [vmem:[%s7235_s1 + $0xa4] ss:$8 sps:$4 sm:$0xff]  }
  0x6c   :  { %2924 = vmatpush1.bf16.msra.mxu0 %v5082_v48  ;;  %v5184_v48 = vld [vmem:[#allocation3 + $0x3c0] ss:$12 sps:$4 sm:$0xff]  }
  0x6d   :  { %3137 = vmatpush1.bf16.msra.mxu1 %v5087_v49  ;;  %2925 = vmatprep.subr.bf16.mxu0 %v5098_v51  ;;  %v5186_v49 = vld [vmem:[#allocation3 + $0x3c4] ss:$12 sps:$4 sm:$0xff]   ;;  %v5189_v51 = vld [vmem:[#allocation3 + $0x540] ss:$12 sps:$4 sm:$0xff]  }
  0x6e   :  { %3138 = vmatprep.subr.bf16.mxu1 %v5101_v52  ;;  %2556 = vmatmul.mubr.bf16.gmra.mxu0 %v5558_v50  ;;  %v5094_v52 = vld [vmem:[%s7234_s0 + $0xa0] ss:$8 sps:$4 sm:$0xff]  }
  0x6f   :  { %2769 = vmatmul.mubr.bf16.gmra.mxu1 %v5563_v53  ;;  %2565 = vmatprep.mubr.bf16.mxu0 %v5568_v54 }
  0x70   :  { %2778 = vmatprep.mubr.bf16.mxu1 %v5573_v55  ;;  %2926 = vmatpush2.bf16.msra.mxu0 %v5096_v56  ;;  %v5191_v56 = vld [vmem:[#allocation3 + $0x544] ss:$12 sps:$4 sm:$0xff]  }
  0x71   :  { %3139 = vmatpush2.bf16.msra.mxu1 %v5099_v57  ;;  %2927 = vmatprep.subr.bf16.mxu0 %v5110_v58  ;;  %v5095_v57 = vld [vmem:[%s7235_s1 + $0xa0] ss:$8 sps:$4 sm:$0xff]   ;;  %v5678_v58 = vld [vmem:[%s7234_s0 + $0xb4] ss:$8 sps:$4 sm:$0xff]  }
  0x72   :  { %3140 = vmatprep.subr.bf16.mxu1 %v5113_v59  ;;  %v7239_v59 = vmov 0  }
  0x74   :  { %2928 = vmatpush2.bf16.msra.mxu0 %v5108_v60  ;;  %v5684_v60 = vld [vmem:[%s7235_s1 + $0xb4] ss:$8 sps:$4 sm:$0xff]  }
  0x75   :  { %3141 = vmatpush2.bf16.msra.mxu1 %v5111_v63  ;;  %2929 = vmatprep.subr.bf16.mxu0 %v5122_v1  ;;  %v5692_v63 = vld [vmem:[%s7234_s0 + $0xb0] ss:$8 sps:$4 sm:$0xff]  }
  0x76   :  { %3142 = vmatprep.subr.bf16.mxu1 %v5125_v3  ;;  %2566 = vmatmul.mubr.bf16.gmra.mxu0 %v5582_v61  ;;  %v5697_v1 = vld [vmem:[%s7235_s1 + $0xb0] ss:$8 sps:$4 sm:$0xff]   ;;  %v5702_v3 = vld [vmem:[%s7234_s0 + $0xc4] ss:$8 sps:$4 sm:$0xff]  }
  0x77   :  { %2779 = vmatmul.mubr.bf16.gmra.mxu1 %v5587_v62  ;;  %2575 = vmatprep.mubr.bf16.mxu0 %v5592_v0 }
  0x78   :  { %2788 = vmatprep.mubr.bf16.mxu1 %v5597_v2  ;;  %2930 = vmatpush2.bf16.msra.mxu0 %v5120_v4  ;;  %v5707_v4 = vld [vmem:[%s7235_s1 + $0xc4] ss:$8 sps:$4 sm:$0xff]  }
  0x79   :  { %3143 = vmatpush2.bf16.msra.mxu1 %v5123_v5  ;;  %2931 = vmatprep.subr.bf16.mxu0 %v5134_v7  ;;  %v5716_v5 = vld [vmem:[%s7234_s0 + $0xc0] ss:$8 sps:$4 sm:$0xff]   ;;  %v5726_v7 = vld [vmem:[%s7234_s0 + $0xd4] ss:$8 sps:$4 sm:$0xff]  }
  0x7a   :  { %3144 = vmatprep.subr.bf16.mxu1 %v5137_v11  ;;  %v5740_v11 = vld [vmem:[%s7234_s0 + $0xd0] ss:$8 sps:$4 sm:$0xff]  }
  0x7c   :  { %2932 = vmatpush2.bf16.msra.mxu0 %v5132_v6  ;;  %v5721_v6 = vld [vmem:[%s7235_s1 + $0xc0] ss:$8 sps:$4 sm:$0xff]  }
  0x7d   :  { %3145 = vmatpush2.bf16.msra.mxu1 %v5135_v10  ;;  %2933 = vmatprep.subr.bf16.mxu0 %v5146_v21  ;;  %v5731_v10 = vld [vmem:[%s7235_s1 + $0xd4] ss:$8 sps:$4 sm:$0xff]   ;;  %v5750_v21 = vld [vmem:[%s7234_s0 + $0xe4] ss:$8 sps:$4 sm:$0xff]  }
  0x7e   :  { %2576 = vmatmul.mubr.bf16.gmra.mxu0 %v5606_v12  ;;  %3146 = vmatprep.subr.bf16.mxu1 %v5149_v23  ;;  %v5764_v23 = vld [vmem:[%s7234_s0 + $0xe0] ss:$8 sps:$4 sm:$0xff]  }
  0x7f   :  { %2789 = vmatmul.mubr.bf16.gmra.mxu1 %v5611_v13  ;;  %2585 = vmatprep.mubr.bf16.mxu0 %v5616_v14 }
  0x80   :  { %2798 = vmatprep.mubr.bf16.mxu1 %v5621_v16  ;;  %2934 = vmatpush2.bf16.msra.mxu0 %v5144_v20  ;;  %v5745_v20 = vld [vmem:[%s7235_s1 + $0xd0] ss:$8 sps:$4 sm:$0xff]  }
  0x81   :  { %3147 = vmatpush2.bf16.msra.mxu1 %v5147_v22  ;;  %2935 = vmatprep.subr.bf16.mxu0 %v5158_v29  ;;  %v5755_v22 = vld [vmem:[%s7235_s1 + $0xe4] ss:$8 sps:$4 sm:$0xff]   ;;  %v5774_v29 = vld [vmem:[%s7234_s0 + $0xf4] ss:$8 sps:$4 sm:$0xff]  }
  0x82   :  { %3148 = vmatprep.subr.bf16.mxu1 %v5165_v34  ;;  %v5779_v34 = vld [vmem:[%s7235_s1 + $0xf4] ss:$8 sps:$4 sm:$0xff]  }
  0x84   :  { %2936 = vmatpush2.bf16.msra.mxu0 %v5156_v28  ;;  %v5769_v28 = vld [vmem:[%s7235_s1 + $0xe0] ss:$8 sps:$4 sm:$0xff]  }
  0x85   :  { %2937 = vmatprep.subr.bf16.mxu0 %v5170_v39  ;;  %3149 = vmatpush2.bf16.msra.mxu1 %v5163_v35  ;;  %v5788_v35 = vld [vmem:[%s7234_s0 + $0xf0] ss:$8 sps:$4 sm:$0xff]   ;;  %v5798_v39 = vld [vmem:[%s7234_s0 + $0x104] ss:$8 sps:$4 sm:$0xff]  }
  0x86   :  { %2586 = vmatmul.mubr.bf16.gmra.mxu0 %v5630_v24  ;;  %3150 = vmatprep.subr.bf16.mxu1 %v5179_v46  ;;  %v5817_v46 = vld [vmem:[%s7235_s1 + $0x100] ss:$8 sps:$4 sm:$0xff]  }
  0x87   :  { %2799 = vmatmul.mubr.bf16.gmra.mxu1 %v5635_v27  ;;  %2595 = vmatprep.mubr.bf16.mxu0 %v5640_v32 }
  0x88   :  { %2808 = vmatprep.mubr.bf16.mxu1 %v5645_v33  ;;  %2938 = vmatpush2.bf16.msra.mxu0 %v5168_v38  ;;  %v5793_v38 = vld [vmem:[%s7235_s1 + $0xf0] ss:$8 sps:$4 sm:$0xff]  }
  0x89   :  { %3151 = vmatpush2.bf16.msra.mxu1 %v5177_v45  ;;  %2939 = vmatprep.subr.bf16.mxu0 %v5186_v49  ;;  %v5812_v45 = vld [vmem:[%s7234_s0 + $0x100] ss:$8 sps:$4 sm:$0xff]   ;;  %v5836_v49 = vld [vmem:[%s7234_s0 + $0x110] ss:$8 sps:$4 sm:$0xff]  }
  0x8a   :  { %3152 = vmatprep.subr.bf16.mxu1 %v5191_v56  ;;  %7245 = vst [vmem:[#allocation7_spill] sm:$0xff] %v5836_v49  ;;  %v5182_v56 = vld [vmem:[%s7235_s1 + $0x124] ss:$8 sps:$4 sm:$0xff]  }
  0x8c   :  { %2940 = vmatpush2.bf16.msra.mxu0 %v5184_v48  ;;  %v5827_v48 = vld [vmem:[%s7235_s1 + $0x114] ss:$8 sps:$4 sm:$0xff]  }
  0x8d   :  { %3335 = vmatprep.subr.bf16.mxu0 %v7239_v59  ;;  %3153 = vmatpush2.bf16.msra.mxu1 %v5189_v51  ;;  %7244 = vst [vmem:[#allocation6_spill] sm:$0xff] %v5827_v48  ;;  %v5841_v51 = vld [vmem:[%s7235_s1 + $0x110] ss:$8 sps:$4 sm:$0xff]  }
  0x8e   :  { %2596 = vmatmul.mubr.bf16.gmra.mxu0 %v5654_v40  ;;  %3512 = vmatprep.subr.bf16.mxu1 %v7239_v59  ;;  %v5188_v59 = vld [vmem:[%s7235_s1 + $0x120] ss:$8 sps:$4 sm:$0xff]  }
  0x8f   :  { %2809 = vmatmul.mubr.bf16.gmra.mxu1 %v5659_v41  ;;  %2605 = vmatprep.mubr.bf16.mxu0 %v5090_v44  ;;  %v5803_v44 = vld [vmem:[%s7235_s1 + $0x104] ss:$8 sps:$4 sm:$0xff]  }
  0x90   :  { %2818 = vmatprep.mubr.bf16.mxu1 %v5092_v47  ;;  %v5822_v47 = vld [vmem:[%s7234_s0 + $0x114] ss:$8 sps:$4 sm:$0xff]  }
  0x96   :  { %2606 = vmatmul.mubr.bf16.gmra.mxu0 %v5094_v52  ;;  %v5180_v52 = vld [vmem:[%s7234_s0 + $0x124] ss:$8 sps:$4 sm:$0xff]  }
  0x97   :  { %2819 = vmatmul.mubr.bf16.gmra.mxu1 %v5095_v57  ;;  %2615 = vmatprep.mubr.bf16.mxu0 %v5678_v58  ;;  %v5187_v57 = vld [vmem:[%s7234_s0 + $0x120] ss:$8 sps:$4 sm:$0xff]  }
  0x98   :  { %2828 = vmatprep.mubr.bf16.mxu1 %v5684_v60 }
  0x9e   :  { %2616 = vmatmul.mubr.bf16.gmra.mxu0 %v5692_v63 }
  0x9f   :  { %2829 = vmatmul.mubr.bf16.gmra.mxu1 %v5697_v1  ;;  %2625 = vmatprep.mubr.bf16.mxu0 %v5702_v3 }
  0xa0   :  { %2838 = vmatprep.mubr.bf16.mxu1 %v5707_v4 }
  0xa6   :  { %2626 = vmatmul.mubr.bf16.gmra.mxu0 %v5716_v5 }
  0xa7   :  { %2839 = vmatmul.mubr.bf16.gmra.mxu1 %v5721_v6  ;;  %2635 = vmatprep.mubr.bf16.mxu0 %v5726_v7 }
  0xa8   :  { %2848 = vmatprep.mubr.bf16.mxu1 %v5731_v10 }
  0xae   :  { %2636 = vmatmul.mubr.bf16.gmra.mxu0 %v5740_v11 }
  0xaf   :  { %2849 = vmatmul.mubr.bf16.gmra.mxu1 %v5745_v20  ;;  %2645 = vmatprep.mubr.bf16.mxu0 %v5750_v21 }
  0xb0   :  { %2858 = vmatprep.mubr.bf16.mxu1 %v5755_v22 }
  0xb6   :  { %2646 = vmatmul.mubr.bf16.gmra.mxu0 %v5764_v23 }
  0xb7   :  { %2859 = vmatmul.mubr.bf16.gmra.mxu1 %v5769_v28  ;;  %2655 = vmatprep.mubr.bf16.mxu0 %v5774_v29 }
  0xb8   :  { %2868 = vmatprep.mubr.bf16.mxu1 %v5779_v34 }
  0xbe   :  { %2656 = vmatmul.mubr.bf16.gmra.mxu0 %v5788_v35 }
  0xbf   :  { %2869 = vmatmul.mubr.bf16.gmra.mxu1 %v5793_v38  ;;  %2665 = vmatprep.mubr.bf16.mxu0 %v5798_v39 }
  0xc0   :  { %2878 = vmatprep.mubr.bf16.mxu1 %v5803_v44 }
  0xc6   :  { %2666 = vmatmul.mubr.bf16.gmra.mxu0 %v5812_v45 }
  0xc7   :  { %2879 = vmatmul.mubr.bf16.gmra.mxu1 %v5817_v46  ;;  %2675 = vmatprep.mubr.bf16.mxu0 %v5822_v47 }
  0xc8   :  { %2888 = vmatprep.mubr.bf16.mxu1 %v5827_v48  ;;  %v5192_v48 = vld [vmem:[#allocation3 + $0xb0] ss:$12 sps:$4 sm:$0xff]  }
  0xce   :  { %2676 = vmatmul.mubr.bf16.gmra.mxu0 %v5836_v49  ;;  %v5193_v49 = vld [vmem:[#allocation3 + $0x230] ss:$12 sps:$4 sm:$0xff]  }
  0xcf   :  { %2889 = vmatmul.mubr.bf16.gmra.mxu1 %v5841_v51  ;;  %2685 = vmatprep.mubr.bf16.mxu0 %v5180_v52  ;;  %v5194_v52 = vld [vmem:[#allocation3 + $0x98] ss:$12 sps:$4 sm:$0xff]  }
  0xd0   :  { %2898 = vmatprep.mubr.bf16.mxu1 %v5182_v56  ;;  %v5195_v56 = vld [vmem:[#allocation3 + $0x218] ss:$12 sps:$4 sm:$0xff]  }
  0xd6   :  { %2686 = vmatmul.mubr.bf16.gmra.mxu0 %v5187_v57  ;;  %v7246_v57 = vmov 0  }
  0xd7   :  { %2899 = vmatmul.mubr.bf16.gmra.mxu1 %v5188_v59  ;;  %2941 = vmatprep.mubr.bf16.mxu0 %v5474_v8  ;;  %v5196_v8 = vld [vmem:[#allocation3 + $0x80] ss:$12 sps:$4 sm:$0xff]  }
  0xd8   :  { %3154 = vmatprep.mubr.bf16.mxu1 %v5479_v9  ;;  %v5197_v9 = vld [vmem:[#allocation3 + $0x200] ss:$12 sps:$4 sm:$0xff]  }
  0xd9   :  { %v5219_v59 = vld [vmem:[#allocation3 + $0x2c0] ss:$12 sps:$4 sm:$0xff]  }
  0xde   :  { %2942 = vmatmul.mubr.bf16.vlgmr.msra.gmra.mxu0 %v5486_v15  ;;  %v5198_v15 = vld [vmem:[#allocation3 + $0x68] ss:$12 sps:$4 sm:$0xff]  }
  0xdf   :  { %3155 = vmatmul.mubr.bf16.vlgmr.msra.gmra.mxu1 %v5491_v17  ;;  %3336 = vmatpush1.bf16.msra.mxu0 %v5192_v48  ;;  %v5199_v17 = vld [vmem:[#allocation3 + $0x1e8] ss:$12 sps:$4 sm:$0xff]  }
  0xe0   :  { %3513 = vmatpush1.bf16.msra.mxu1 %v5193_v49  ;;  %2951 = vmatprep.mubr.bf16.mxu0 %v5496_v18  ;;  %v5200_v18 = vld [vmem:[#allocation3 + $0x50] ss:$12 sps:$4 sm:$0xff]   ;;  %v5221_v48 = vld [vmem:[#allocation3 + $0x2a8] ss:$12 sps:$4 sm:$0xff]  }
  0xe1   :  { %3164 = vmatprep.mubr.bf16.mxu1 %v5501_v19  ;;  %3337 = vmatprep.subr.bf16.mxu0 %v7246_v57  ;;  %v5201_v19 = vld [vmem:[#allocation3 + $0x1d0] ss:$12 sps:$4 sm:$0xff]  }
  0xe2   :  { %3514 = vmatprep.subr.bf16.mxu1 %v7246_v57 }
  0xe3   :  { %3338 = vmatpush1.bf16.msra.mxu0 %v5194_v52 }
  0xe4   :  { %3515 = vmatpush1.bf16.msra.mxu1 %v5195_v56  ;;  %3339 = vmatprep.subr.bf16.mxu0 %v7246_v57 }
  0xe5   :  { %3516 = vmatprep.subr.bf16.mxu1 %v7246_v57 }
  0xe6   :  { %2952 = vmatmul.mubr.bf16.gmra.mxu0 %v5510_v25  ;;  %v5202_v25 = vld [vmem:[#allocation3 + $0x38] ss:$12 sps:$4 sm:$0xff]  }
  0xe7   :  { %3165 = vmatmul.mubr.bf16.gmra.mxu1 %v5515_v26  ;;  %2961 = vmatprep.mubr.bf16.mxu0 %v5520_v30  ;;  %v5203_v26 = vld [vmem:[#allocation3 + $0x1b8] ss:$12 sps:$4 sm:$0xff]   ;;  %v5204_v30 = vld [vmem:[#allocation3 + $0x20] ss:$12 sps:$4 sm:$0xff]  }
  0xe8   :  { %3174 = vmatprep.mubr.bf16.mxu1 %v5525_v31  ;;  %3340 = vmatpush1.bf16.msra.mxu0 %v5196_v8  ;;  %v5205_v31 = vld [vmem:[#allocation3 + $0x1a0] ss:$12 sps:$4 sm:$0xff]  }
  0xe9   :  { %3517 = vmatpush1.bf16.msra.mxu1 %v5197_v9  ;;  %3341 = vmatprep.subr.bf16.mxu0 %v7246_v57 }
  0xea   :  { %3518 = vmatprep.subr.bf16.mxu1 %v7246_v57 }
  0xec   :  { %3342 = vmatpush1.bf16.msra.mxu0 %v5198_v15 }
  0xed   :  { %3519 = vmatpush1.bf16.msra.mxu1 %v5199_v17  ;;  %3343 = vmatprep.subr.bf16.mxu0 %v7246_v57  ;;  %v5224_v17 = vld [vmem:[#allocation3 + $0xf8] ss:$12 sps:$4 sm:$0xff]  }
  0xee   :  { %3520 = vmatprep.subr.bf16.mxu1 %v7246_v57  ;;  %2962 = vmatmul.mubr.bf16.gmra.mxu0 %v5534_v36  ;;  %v5212_v36 = vld [vmem:[#allocation3 + $0x8] ss:$12 sps:$4 sm:$0xff]  }
  0xef   :  { %3175 = vmatmul.mubr.bf16.gmra.mxu1 %v5539_v37  ;;  %2971 = vmatprep.mubr.bf16.mxu0 %v5544_v42  ;;  %v5213_v37 = vld [vmem:[#allocation3 + $0x188] ss:$12 sps:$4 sm:$0xff]   ;;  %v5214_v42 = vld [vmem:[#allocation3 + $0x170] ss:$12 sps:$4 sm:$0xff]  }
  0xf0   :  { %3184 = vmatprep.mubr.bf16.mxu1 %v5549_v43  ;;  %3344 = vmatpush1.bf16.msra.mxu0 %v5200_v18  ;;  %v5215_v43 = vld [vmem:[#allocation3 + $0x2f0] ss:$12 sps:$4 sm:$0xff]   ;;  %v5225_v18 = vld [vmem:[#allocation3 + $0x278] ss:$12 sps:$4 sm:$0xff]  }
  0xf1   :  { %3521 = vmatpush1.bf16.msra.mxu1 %v5201_v19  ;;  %3345 = vmatprep.subr.bf16.mxu0 %v7246_v57 }
  0xf2   :  { %3522 = vmatprep.subr.bf16.mxu1 %v7246_v57 }
  0xf4   :  { %3346 = vmatpush1.bf16.msra.mxu0 %v5202_v25 }
  0xf5   :  { %3523 = vmatpush1.bf16.msra.mxu1 %v5203_v26  ;;  %3347 = vmatprep.subr.bf16.mxu0 %v7246_v57 }
  0xf6   :  { %3524 = vmatprep.subr.bf16.mxu1 %v7246_v57  ;;  %2972 = vmatmul.mubr.bf16.gmra.mxu0 %v5558_v50  ;;  %v724_v50 = vlaneseq }
  0xf7   :  { %3185 = vmatmul.mubr.bf16.gmra.mxu1 %v5563_v53  ;;  %2981 = vmatprep.mubr.bf16.mxu0 %v5568_v54  ;;  %v5216_v53 = vld [vmem:[#allocation3 + $0x158] ss:$12 sps:$4 sm:$0xff]  }
  0xf8   :  { %3194 = vmatprep.mubr.bf16.mxu1 %v5573_v55  ;;  %3348 = vmatpush1.bf16.msra.mxu0 %v5204_v30  ;;  %v5217_v54 = vld [vmem:[#allocation3 + $0x2d8] ss:$12 sps:$4 sm:$0xff]   ;;  %v5897_v55 = vshrl.u32 %v724_v50, 7  ;;  %v5208_v30 = vld [vmem:[%s7235_s1 + $0x94] ss:$8 sps:$4 sm:$0xff]  }
  0xf9   :  { %3525 = vmatpush1.bf16.msra.mxu1 %v5205_v31  ;;  %3349 = vmatprep.subr.bf16.mxu0 %v7246_v57 }
  0xfa   :  { %3526 = vmatprep.subr.bf16.mxu1 %v7246_v57  ;;  %7247 = vst [vmem:[#allocation8_spill] sm:$0xff] %v5897_v55  ;;  %v730_v49 = vsub.s32 1, %v5897_v55 }
  0xfc   :  { %3350 = vmatpush1.bf16.msra.mxu0 %v5212_v36 }
  0xfd   :  { %3527 = vmatpush1.bf16.msra.mxu1 %v5213_v37  ;;  %3351 = vmatprep.subr.bf16.mxu0 %v7246_v57  ;;  %v5232_v37 = vld [vmem:[#allocation3 + $0xe0] ss:$12 sps:$4 sm:$0xff]  }
  0xfe   :  { %3528 = vmatprep.subr.bf16.mxu1 %v7246_v57  ;;  %2982 = vmatmul.mubr.bf16.gmra.mxu0 %v5582_v61  ;;  %v5218_v61 = vld [vmem:[#allocation3 + $0x140] ss:$12 sps:$4 sm:$0xff]  }
  0xff   :  { %3195 = vmatmul.mubr.bf16.gmra.mxu1 %v5587_v62  ;;  %2991 = vmatprep.mubr.bf16.mxu0 %v5592_v0  ;;  %v726_v62 = vsub.s32 0, %v5897_v55  ;;  %v722_v0 = vld [vmem:[%s7237_s3] sm:$0x7] }
 0x100   :  { %3204 = vmatprep.mubr.bf16.mxu1 %v5597_v2  ;;  %3352 = vmatpush2.bf16.msra.mxu0 %v5214_v42  ;;  %v5220_v2 = vld [vmem:[#allocation3 + $0x128] ss:$12 sps:$4 sm:$0xff]   ;;  %v5233_v42 = vld [vmem:[#allocation3 + $0x260] ss:$12 sps:$4 sm:$0xff]  }
 0x101   :  { %3529 = vmatpush2.bf16.msra.mxu1 %v5215_v43  ;;  %3353 = vmatprep.subr.bf16.mxu0 %v7246_v57 }
 0x102   :  { %3530 = vmatprep.subr.bf16.mxu1 %v7246_v57 }
 0x104   :  { %3354 = vmatpush2.bf16.msra.mxu0 %v5216_v53 }
 0x105   :  { %3531 = vmatpush2.bf16.msra.mxu1 %v5217_v54  ;;  %3355 = vmatprep.subr.bf16.mxu0 %v7246_v57 }
 0x106   :  { %3532 = vmatprep.subr.bf16.mxu1 %v7246_v57  ;;  %2992 = vmatmul.mubr.bf16.gmra.mxu0 %v5606_v12  ;;  %v5912_v12 = vrot.slane %v722_v0, %v726_v62 }
 0x107   :  { %3205 = vmatmul.mubr.bf16.gmra.mxu1 %v5611_v13  ;;  %3001 = vmatprep.mubr.bf16.mxu0 %v5616_v14  ;;  %v5222_v13 = vld [vmem:[#allocation3 + $0x110] ss:$12 sps:$4 sm:$0xff]  }
 0x108   :  { %3214 = vmatprep.mubr.bf16.mxu1 %v5621_v16  ;;  %3356 = vmatpush2.bf16.msra.mxu0 %v5218_v61  ;;  %v5223_v14 = vld [vmem:[#allocation3 + $0x290] ss:$12 sps:$4 sm:$0xff]   ;;  %v5914_v16 = vrot.slane %v722_v0, %v730_v49 }
 0x109   :  { %3533 = vmatpush2.bf16.msra.mxu1 %v5219_v59  ;;  %3357 = vmatprep.subr.bf16.mxu0 %v7246_v57 }
 0x10a   :  { %3534 = vmatprep.subr.bf16.mxu1 %v7246_v57 }
 0x10c   :  { %3358 = vmatpush2.bf16.msra.mxu0 %v5220_v2  ;;  %v5240_v2 = vld [vmem:[#allocation3 + $0xc8] ss:$12 sps:$4 sm:$0xff]  }
 0x10d   :  { %3535 = vmatpush2.bf16.msra.mxu1 %v5221_v48  ;;  %3359 = vmatprep.subr.bf16.mxu0 %v7246_v57  ;;  %v5241_v48 = vld [vmem:[#allocation3 + $0x248] ss:$12 sps:$4 sm:$0xff]  }
 0x10e   :  { %3536 = vmatprep.subr.bf16.mxu1 %v7246_v57  ;;  %v2517_v52 = vpop.f32.mrf.mxu0  ;;  %3002 = vmatmul.mubr.bf16.gmra.mxu0 %v5630_v24 }
 0x10f   :  { %v2730_v56 = vpop.f32.mrf.mxu1  ;;  %3215 = vmatmul.mubr.bf16.gmra.mxu1 %v5635_v27  ;;  %v2518_v8 = vadd.f32 %v2517_v52, %v5912_v12  ;;  %3011 = vmatprep.mubr.bf16.mxu0 %v5640_v32  ;;  %v5211_v52 = vld [vmem:[%s7235_s1 + $0x90] ss:$8 sps:$4 sm:$0xff]  }
 0x110   :  { %3224 = vmatprep.mubr.bf16.mxu1 %v5645_v33  ;;  %v2519_v9 = vpop.f32.mrf.mxu0  ;;  %3360 = vmatpush2.bf16.msra.mxu0 %v5222_v13  ;;  %v5206_v33 = vld [vmem:[%s7234_s0 + $0x94] ss:$8 sps:$4 sm:$0xff]  }
 0x111   :  { %v2732_v15 = vpop.f32.mrf.mxu1  ;;  %3537 = vmatpush2.bf16.msra.mxu1 %v5223_v14  ;;  %v5923_v19 = vadd.f32 %v2730_v56, %v2518_v8  ;;  %v2520_v25 = vadd.f32 %v2519_v9, %v5914_v16  ;;  %3361 = vmatprep.subr.bf16.mxu0 %v7246_v57  ;;  %v5210_v14 = vld [vmem:[%s7234_s0 + $0x90] ss:$8 sps:$4 sm:$0xff]  }
 0x112   :  { %3538 = vmatprep.subr.bf16.mxu1 %v7246_v57  ;;  %v2521_v24 = vpop.f32.mrf.mxu0 }
 0x113   :  { %v2734_v27 = vpop.f32.mrf.mxu1  ;;  %v5928_v26 = vadd.f32 %v2732_v15, %v2520_v25  ;;  %v2522_v32 = vadd.f32 %v2521_v24, %v5912_v12 }
 0x114   :  { %v2523_v31 = vpop.f32.mrf.mxu0  ;;  %3362 = vmatpush2.bf16.msra.mxu0 %v5224_v17 }
 0x115   :  { %v2736_v36 = vpop.f32.mrf.mxu1  ;;  %3539 = vmatpush2.bf16.msra.mxu1 %v5225_v18  ;;  %v5937_v43 = vadd.f32 %v2734_v27, %v2522_v32  ;;  %v2524_v50 = vadd.f32 %v2523_v31, %v5914_v16  ;;  %3363 = vmatprep.subr.bf16.mxu0 %v7246_v57 }
 0x116   :  { %3540 = vmatprep.subr.bf16.mxu1 %v7246_v57  ;;  %v2527_v53 = vpop.f32.mrf.mxu0  ;;  %3012 = vmatmul.mubr.bf16.gmra.mxu0 %v5654_v40 }
 0x117   :  { %v2740_v54 = vpop.f32.mrf.mxu1  ;;  %3225 = vmatmul.mubr.bf16.gmra.mxu1 %v5659_v41  ;;  %v5944_v61 = vadd.f32 %v2736_v36, %v2524_v50  ;;  %v2528_v59 = vadd.f32 %v2527_v53, %v5912_v12  ;;  %3021 = vmatprep.mubr.bf16.mxu0 %v5206_v33 }
 0x118   :  { %3234 = vmatprep.mubr.bf16.mxu1 %v5208_v30  ;;  %v2529_v62 = vpop.f32.mrf.mxu0  ;;  %3364 = vmatpush2.bf16.msra.mxu0 %v5232_v37 }
 0x119   :  { %v2742_v0 = vpop.f32.mrf.mxu1  ;;  %3541 = vmatpush2.bf16.msra.mxu1 %v5233_v42  ;;  %v5947_v49 = vadd.f32 %v2740_v54, %v2528_v59  ;;  %v2530_v13 = vadd.f32 %v2529_v62, %v5914_v16  ;;  %3365 = vmatprep.subr.bf16.mxu0 %v7246_v57 }
 0x11a   :  { %3542 = vmatprep.subr.bf16.mxu1 %v7246_v57  ;;  %v2531_v40 = vpop.f32.mrf.mxu0 }
 0x11b   :  { %v2744_v41 = vpop.f32.mrf.mxu1  ;;  %v5958_v56 = vadd.f32 %v2742_v0, %v2530_v13  ;;  %v2532_v8 = vadd.f32 %v2531_v40, %v5912_v12 }
 0x11c   :  { %v2533_v9 = vpop.f32.mrf.mxu0  ;;  %3366 = vmatpush2.bf16.msra.mxu0 %v5240_v2 }
 0x11d   :  { %v2746_v15 = vpop.f32.mrf.mxu1  ;;  %3543 = vmatpush2.bf16.msra.mxu1 %v5241_v48  ;;  %v5961_v17 = vadd.f32 %v2744_v41, %v2532_v8  ;;  %v2534_v18 = vadd.f32 %v2533_v9, %v5914_v16  ;;  %3689 = vmatprep.subr.bf16.mxu0 %v7246_v57 }
 0x11e   :  { %3866 = vmatprep.subr.bf16.mxu1 %v7246_v57  ;;  %v2537_v25 = vpop.f32.mrf.mxu0  ;;  %3022 = vmatmul.mubr.bf16.gmra.mxu0 %v5210_v14 }
 0x11f   :  { %v2750_v24 = vpop.f32.mrf.mxu1  ;;  %3235 = vmatmul.mubr.bf16.gmra.mxu1 %v5211_v52  ;;  %v5966_v27 = vadd.f32 %v2746_v15, %v2534_v18  ;;  %v2538_v32 = vadd.f32 %v2537_v25, %v5912_v12  ;;  %3031 = vmatprep.mubr.bf16.mxu0 %v5678_v58 }
 0x120   :  { %3244 = vmatprep.mubr.bf16.mxu1 %v5684_v60  ;;  %v2539_v33 = vpop.f32.mrf.mxu0 }
 0x121   :  { %v2752_v30 = vpop.f32.mrf.mxu1  ;;  %v5971_v31 = vadd.f32 %v2750_v24, %v2538_v32  ;;  %v2540_v36 = vadd.f32 %v2539_v33, %v5914_v16 }
 0x122   :  { %v2541_v37 = vpop.f32.mrf.mxu0 }
 0x123   :  { %v2754_v42 = vpop.f32.mrf.mxu1  ;;  %v5974_v50 = vadd.f32 %v2752_v30, %v2540_v36  ;;  %v2542_v53 = vadd.f32 %v2541_v37, %v5912_v12 }
 0x124   :  { %v2543_v54 = vpop.f32.mrf.mxu0 }
 0x125   :  { %v2756_v59 = vpop.f32.mrf.mxu1  ;;  %v5977_v62 = vadd.f32 %v2754_v42, %v2542_v53  ;;  %v2544_v58 = vadd.f32 %v2543_v54, %v5914_v16 }
 0x126   :  { %v2547_v0 = vpop.f32.mrf.mxu0  ;;  %3032 = vmatmul.mubr.bf16.gmra.mxu0 %v5692_v63 }
 0x127   :  { %v2760_v60 = vpop.f32.mrf.mxu1  ;;  %3245 = vmatmul.mubr.bf16.gmra.mxu1 %v5697_v1  ;;  %v5982_v2 = vadd.f32 %v2756_v59, %v2544_v58  ;;  %v2548_v48 = vadd.f32 %v2547_v0, %v5912_v12  ;;  %3041 = vmatprep.mubr.bf16.mxu0 %v5702_v3 }
 0x128   :  { %3254 = vmatprep.mubr.bf16.mxu1 %v5707_v4  ;;  %v2549_v13 = vpop.f32.mrf.mxu0 }
 0x129   :  { %v2762_v40 = vpop.f32.mrf.mxu1  ;;  %v5987_v41 = vadd.f32 %v2760_v60, %v2548_v48  ;;  %v2550_v14 = vadd.f32 %v2549_v13, %v5914_v16 }
 0x12a   :  { %v2551_v52 = vpop.f32.mrf.mxu0 }
 0x12b   :  { %v2764_v8 = vpop.f32.mrf.mxu1  ;;  %v5990_v9 = vadd.f32 %v2762_v40, %v2550_v14  ;;  %v2552_v63 = vadd.f32 %v2551_v52, %v5912_v12 }
 0x12c   :  { %v2553_v1 = vpop.f32.mrf.mxu0 }
 0x12d   :  { %v2766_v15 = vpop.f32.mrf.mxu1  ;;  %v5993_v18 = vadd.f32 %v2764_v8, %v2552_v63  ;;  %v2554_v3 = vadd.f32 %v2553_v1, %v5914_v16 }
 0x12e   :  { %v2557_v25 = vpop.f32.mrf.mxu0  ;;  %3042 = vmatmul.mubr.bf16.gmra.mxu0 %v5716_v5 }
 0x12f   :  { %v2770_v4 = vpop.f32.mrf.mxu1  ;;  %3255 = vmatmul.mubr.bf16.gmra.mxu1 %v5721_v6  ;;  %v5998_v24 = vadd.f32 %v2766_v15, %v2554_v3  ;;  %v2558_v32 = vadd.f32 %v2557_v25, %v5912_v12  ;;  %3051 = vmatprep.mubr.bf16.mxu0 %v5726_v7 }
 0x130   :  { %3264 = vmatprep.mubr.bf16.mxu1 %v5731_v10  ;;  %v2559_v33 = vpop.f32.mrf.mxu0 }
 0x131   :  { %v2772_v30 = vpop.f32.mrf.mxu1  ;;  %v6003_v36 = vadd.f32 %v2770_v4, %v2558_v32  ;;  %v2560_v37 = vadd.f32 %v2559_v33, %v5914_v16 }
 0x132   :  { %v2561_v42 = vpop.f32.mrf.mxu0 }
 0x133   :  { %v2774_v53 = vpop.f32.mrf.mxu1  ;;  %v6006_v54 = vadd.f32 %v2772_v30, %v2560_v37  ;;  %v2562_v5 = vadd.f32 %v2561_v42, %v5912_v12 }
 0x134   :  { %v2563_v6 = vpop.f32.mrf.mxu0 }
 0x135   :  { %v2776_v59 = vpop.f32.mrf.mxu1  ;;  %v6009_v58 = vadd.f32 %v2774_v53, %v2562_v5  ;;  %v2564_v7 = vadd.f32 %v2563_v6, %v5914_v16 }
 0x136   :  { %v2567_v0 = vpop.f32.mrf.mxu0  ;;  %3052 = vmatmul.mubr.bf16.gmra.mxu0 %v5740_v11 }
 0x137   :  { %v2780_v10 = vpop.f32.mrf.mxu1  ;;  %3265 = vmatmul.mubr.bf16.gmra.mxu1 %v5745_v20  ;;  %v6014_v60 = vadd.f32 %v2776_v59, %v2564_v7  ;;  %v2568_v48 = vadd.f32 %v2567_v0, %v5912_v12  ;;  %3061 = vmatprep.mubr.bf16.mxu0 %v5750_v21 }
 0x138   :  { %3274 = vmatprep.mubr.bf16.mxu1 %v5755_v22  ;;  %v2569_v13 = vpop.f32.mrf.mxu0 }
 0x139   :  { %v2782_v40 = vpop.f32.mrf.mxu1  ;;  %v6019_v14 = vadd.f32 %v2780_v10, %v2568_v48  ;;  %v2570_v52 = vadd.f32 %v2569_v13, %v5914_v16 }
 0x13a   :  { %v2571_v8 = vpop.f32.mrf.mxu0 }
 0x13b   :  { %v2784_v63 = vpop.f32.mrf.mxu1  ;;  %v6022_v1 = vadd.f32 %v2782_v40, %v2570_v52  ;;  %v2572_v11 = vadd.f32 %v2571_v8, %v5912_v12 }
 0x13c   :  { %v2573_v20 = vpop.f32.mrf.mxu0 }
 0x13d   :  { %v2786_v15 = vpop.f32.mrf.mxu1  ;;  %v6025_v3 = vadd.f32 %v2784_v63, %v2572_v11  ;;  %v2574_v21 = vadd.f32 %v2573_v20, %v5914_v16 }
 0x13e   :  { %v2577_v25 = vpop.f32.mrf.mxu0  ;;  %3062 = vmatmul.mubr.bf16.gmra.mxu0 %v5764_v23 }
 0x13f   :  { %v2790_v22 = vpop.f32.mrf.mxu1  ;;  %3275 = vmatmul.mubr.bf16.gmra.mxu1 %v5769_v28  ;;  %v6030_v4 = vadd.f32 %v2786_v15, %v2574_v21  ;;  %v2578_v32 = vadd.f32 %v2577_v25, %v5912_v12  ;;  %3071 = vmatprep.mubr.bf16.mxu0 %v5774_v29 }
 0x140   :  { %3284 = vmatprep.mubr.bf16.mxu1 %v5779_v34  ;;  %v2579_v33 = vpop.f32.mrf.mxu0 }
 0x141   :  { %v2792_v30 = vpop.f32.mrf.mxu1  ;;  %v6035_v37 = vadd.f32 %v2790_v22, %v2578_v32  ;;  %v2580_v42 = vadd.f32 %v2579_v33, %v5914_v16  ;;  %v7248_v33 = vld [vmem:[#allocation6_spill] sm:$0xff] }
 0x142   :  { %v2581_v53 = vpop.f32.mrf.mxu0 }
 0x143   :  { %v2794_v5 = vpop.f32.mrf.mxu1  ;;  %v6038_v6 = vadd.f32 %v2792_v30, %v2580_v42  ;;  %v2582_v23 = vadd.f32 %v2581_v53, %v5912_v12 }
 0x144   :  { %v2583_v28 = vpop.f32.mrf.mxu0 }
 0x145   :  { %v2796_v59 = vpop.f32.mrf.mxu1  ;;  %v6041_v7 = vadd.f32 %v2794_v5, %v2582_v23  ;;  %v2584_v29 = vadd.f32 %v2583_v28, %v5914_v16 }
 0x146   :  { %v2587_v0 = vpop.f32.mrf.mxu0  ;;  %3072 = vmatmul.mubr.bf16.gmra.mxu0 %v5788_v35 }
 0x147   :  { %v2800_v34 = vpop.f32.mrf.mxu1  ;;  %3285 = vmatmul.mubr.bf16.gmra.mxu1 %v5793_v38  ;;  %v6046_v10 = vadd.f32 %v2796_v59, %v2584_v29  ;;  %v2588_v48 = vadd.f32 %v2587_v0, %v5912_v12  ;;  %3081 = vmatprep.mubr.bf16.mxu0 %v5798_v39 }
 0x148   :  { %3294 = vmatprep.mubr.bf16.mxu1 %v5803_v44  ;;  %v2589_v13 = vpop.f32.mrf.mxu0 }
 0x149   :  { %v2802_v40 = vpop.f32.mrf.mxu1  ;;  %v6051_v52 = vadd.f32 %v2800_v34, %v2588_v48  ;;  %v2590_v8 = vadd.f32 %v2589_v13, %v5914_v16 }
 0x14a   :  { %v2591_v63 = vpop.f32.mrf.mxu0 }
 0x14b   :  { %v2804_v11 = vpop.f32.mrf.mxu1  ;;  %v6054_v20 = vadd.f32 %v2802_v40, %v2590_v8  ;;  %v2592_v35 = vadd.f32 %v2591_v63, %v5912_v12  ;;  %v7249_v8 = vld [vmem:[#allocation7_spill] sm:$0xff] }
 0x14c   :  { %v2593_v38 = vpop.f32.mrf.mxu0 }
 0x14d   :  { %v2806_v15 = vpop.f32.mrf.mxu1  ;;  %v6057_v21 = vadd.f32 %v2804_v11, %v2592_v35  ;;  %v2594_v39 = vadd.f32 %v2593_v38, %v5914_v16 }
 0x14e   :  { %v2597_v25 = vpop.f32.mrf.mxu0  ;;  %3082 = vmatmul.mubr.bf16.gmra.mxu0 %v5812_v45 }
 0x14f   :  { %v2810_v44 = vpop.f32.mrf.mxu1  ;;  %3295 = vmatmul.mubr.bf16.gmra.mxu1 %v5817_v46  ;;  %v6062_v22 = vadd.f32 %v2806_v15, %v2594_v39  ;;  %v2598_v32 = vadd.f32 %v2597_v25, %v5912_v12  ;;  %3091 = vmatprep.mubr.bf16.mxu0 %v5822_v47  ;;  %v5228_v46 = vld [vmem:[%s7234_s0 + $0x124] ss:$8 sps:$4 sm:$0xff]  }
 0x150   :  { %3304 = vmatprep.mubr.bf16.mxu1 %v7248_v33  ;;  %v2599_v30 = vpop.f32.mrf.mxu0  ;;  %v5231_v47 = vld [vmem:[%s7235_s1 + $0x124] ss:$8 sps:$4 sm:$0xff]  }
 0x151   :  { %v2812_v42 = vpop.f32.mrf.mxu1  ;;  %v6067_v53 = vadd.f32 %v2810_v44, %v2598_v32  ;;  %v2600_v5 = vadd.f32 %v2599_v30, %v5914_v16  ;;  %v5226_v32 = vld [vmem:[%s7234_s0 + $0x120] ss:$8 sps:$4 sm:$0xff]  }
 0x152   :  { %v2601_v23 = vpop.f32.mrf.mxu0 }
 0x153   :  { %v2814_v28 = vpop.f32.mrf.mxu1  ;;  %v6070_v59 = vadd.f32 %v2812_v42, %v2600_v5  ;;  %v2602_v45 = vadd.f32 %v2601_v23, %v5912_v12  ;;  %v5236_v42 = vld [vmem:[%s7234_s0 + $0x134] ss:$8 sps:$4 sm:$0xff]  }
 0x154   :  { %v2603_v29 = vpop.f32.mrf.mxu0  ;;  %v5239_v5 = vld [vmem:[%s7235_s1 + $0x134] ss:$8 sps:$4 sm:$0xff]  }
 0x155   :  { %v2816_v0 = vpop.f32.mrf.mxu1  ;;  %v6079_v34 = vadd.f32 %v2814_v28, %v2602_v45  ;;  %v2604_v48 = vadd.f32 %v2603_v29, %v5914_v16 }
 0x156   :  { %v2607_v13 = vpop.f32.mrf.mxu0  ;;  %3092 = vmatmul.mubr.bf16.gmra.mxu0 %v7249_v8 }
 0x157   :  { %v2820_v40 = vpop.f32.mrf.mxu1  ;;  %3305 = vmatmul.mubr.bf16.gmra.mxu1 %v5841_v51  ;;  %v6084_v63 = vadd.f32 %v2816_v0, %v2604_v48  ;;  %v2608_v11 = vadd.f32 %v2607_v13, %v5912_v12  ;;  %3101 = vmatprep.mubr.bf16.mxu0 %v5228_v46  ;;  %v5229_v51 = vld [vmem:[%s7235_s1 + $0x120] ss:$8 sps:$4 sm:$0xff]  }
 0x158   :  { %3314 = vmatprep.mubr.bf16.mxu1 %v5231_v47  ;;  %v2609_v35 = vpop.f32.mrf.mxu0 }
 0x159   :  { %v2822_v38 = vpop.f32.mrf.mxu1  ;;  %v6087_v15 = vadd.f32 %v2820_v40, %v2608_v11  ;;  %v2610_v39 = vadd.f32 %v2609_v35, %v5914_v16 }
 0x15a   :  { %v2611_v25 = vpop.f32.mrf.mxu0 }
 0x15b   :  { %v2824_v44 = vpop.f32.mrf.mxu1  ;;  %v6096_v33 = vadd.f32 %v2822_v38, %v2610_v39  ;;  %v2612_v30 = vadd.f32 %v2611_v25, %v5912_v12  ;;  %v5234_v39 = vld [vmem:[%s7234_s0 + $0x130] ss:$8 sps:$4 sm:$0xff]  }
 0x15c   :  { %v2613_v23 = vpop.f32.mrf.mxu0  ;;  %v5237_v25 = vld [vmem:[%s7235_s1 + $0x130] ss:$8 sps:$4 sm:$0xff]  }
 0x15d   :  { %v2826_v28 = vpop.f32.mrf.mxu1  ;;  %v6105_v45 = vadd.f32 %v2824_v44, %v2612_v30  ;;  %v2614_v46 = vadd.f32 %v2613_v23, %v5914_v16 }
 0x15e   :  { %v2617_v47 = vpop.f32.mrf.mxu0  ;;  %3102 = vmatmul.mubr.bf16.gmra.mxu0 %v5226_v32 }
 0x15f   :  { %v2830_v29 = vpop.f32.mrf.mxu1  ;;  %3315 = vmatmul.mubr.bf16.gmra.mxu1 %v5229_v51  ;;  %v6108_v0 = vadd.f32 %v2826_v28, %v2614_v46  ;;  %v2618_v48 = vadd.f32 %v2617_v47, %v5912_v12  ;;  %3111 = vmatprep.mubr.bf16.mxu0 %v5236_v42 }
 0x160   :  { %3324 = vmatprep.mubr.bf16.mxu1 %v5239_v5  ;;  %v2619_v13 = vpop.f32.mrf.mxu0 }
 0x161   :  { %v2832_v40 = vpop.f32.mrf.mxu1  ;;  %v6111_v8 = vadd.f32 %v2830_v29, %v2618_v48  ;;  %v2620_v11 = vadd.f32 %v2619_v13, %v5914_v16  ;;  %v5274_v29 = vld [vmem:[%s7234_s0 + $0x4] ss:$8 sps:$4 sm:$0xff]  }
 0x162   :  { %v2621_v35 = vpop.f32.mrf.mxu0  ;;  %v5275_v48 = vld [vmem:[%s7235_s1 + $0x4] ss:$8 sps:$4 sm:$0xff]  }
 0x163   :  { %v2834_v38 = vpop.f32.mrf.mxu1  ;;  %v6120_v44 = vadd.f32 %v2832_v40, %v2620_v11  ;;  %v2622_v32 = vadd.f32 %v2621_v35, %v5912_v12 }
 0x164   :  { %v2623_v51 = vpop.f32.mrf.mxu0 }
 0x165   :  { %v2836_v30 = vpop.f32.mrf.mxu1  ;;  %v6123_v42 = vadd.f32 %v2834_v38, %v2622_v32  ;;  %v2624_v5 = vadd.f32 %v2623_v51, %v5914_v16  ;;  %v5242_v51 = vld [vmem:[#allocation3 + $0x3b0] ss:$12 sps:$4 sm:$0xff]  }
 0x166   :  { %v2627_v23 = vpop.f32.mrf.mxu0  ;;  %3112 = vmatmul.mubr.bf16.gmra.mxu0 %v5234_v39 }
 0x167   :  { %v2840_v28 = vpop.f32.mrf.mxu1  ;;  %3325 = vmatmul.mubr.bf16.gmra.mxu1 %v5237_v25  ;;  %v6126_v46 = vadd.f32 %v2836_v30, %v2624_v5  ;;  %v2628_v47 = vadd.f32 %v2627_v23, %v5912_v12  ;;  %3367 = vmatprep.mubr.bf16.mxu0 %v5274_v29  ;;  %v5243_v30 = vld [vmem:[#allocation3 + $0x530] ss:$12 sps:$4 sm:$0xff]  }
 0x168   :  { %3544 = vmatprep.mubr.bf16.mxu1 %v5275_v48  ;;  %v2629_v13 = vpop.f32.mrf.mxu0 }
 0x169   :  { %7250 = vst [vmem:[#allocation6_spill] sm:$0xff] %v6126_v46  ;;  %v2842_v40 = vpop.f32.mrf.mxu1  ;;  %v6135_v11 = vadd.f32 %v2840_v28, %v2628_v47  ;;  %v2630_v35 = vadd.f32 %v2629_v13, %v5914_v16  ;;  %v5276_v28 = vld [vmem:[%s7234_s0] ss:$8 sps:$4 sm:$0xff]  }
 0x16a   :  { %v2631_v38 = vpop.f32.mrf.mxu0  ;;  %v5277_v47 = vld [vmem:[%s7235_s1] ss:$8 sps:$4 sm:$0xff]  }
 0x16b   :  { %v2844_v39 = vpop.f32.mrf.mxu1  ;;  %v6138_v25 = vadd.f32 %v2842_v40, %v2630_v35  ;;  %v2632_v32 = vadd.f32 %v2631_v38, %v5912_v12  ;;  %v5244_v35 = vld [vmem:[#allocation3 + $0x398] ss:$12 sps:$4 sm:$0xff]  }
 0x16c   :  { %v2633_v5 = vpop.f32.mrf.mxu0  ;;  %v5245_v38 = vld [vmem:[#allocation3 + $0x518] ss:$12 sps:$4 sm:$0xff]  }
 0x16d   :  { %v2846_v23 = vpop.f32.mrf.mxu1  ;;  %v6141_v29 = vadd.f32 %v2844_v39, %v2632_v32  ;;  %v2634_v48 = vadd.f32 %v2633_v5, %v5914_v16  ;;  %v5278_v5 = vld [vmem:[%s7234_s0 + $0x14] ss:$8 sps:$4 sm:$0xff]  }
 0x16e   :  { %v2637_v55 = vpop.f32.mrf.mxu0  ;;  %3368 = vmatmul.mubr.bf16.vlgmr.msra.gmra.mxu0 %v5276_v28  ;;  %v5279_v28 = vld [vmem:[%s7235_s1 + $0x14] ss:$8 sps:$4 sm:$0xff]  }
 0x16f   :  { %7251 = vst [vmem:[#allocation7_spill] sm:$0xff] %v6141_v29  ;;  %v2850_v46 = vpop.f32.mrf.mxu1  ;;  %3545 = vmatmul.mubr.bf16.vlgmr.msra.gmra.mxu1 %v5277_v47  ;;  %v6150_v13 = vadd.f32 %v2846_v23, %v2634_v48  ;;  %v2638_v40 = vadd.f32 %v2637_v55, %v5912_v12  ;;  %3690 = vmatpush1.bf16.msra.mxu0 %v5242_v51 }
 0x170   :  { %3867 = vmatpush1.bf16.msra.mxu1 %v5243_v30  ;;  %v2639_v39 = vpop.f32.mrf.mxu0  ;;  %3375 = vmatprep.mubr.bf16.mxu0 %v5278_v5 }
 0x171   :  { %7252 = vst [vmem:[#allocation9_spill] sm:$0xff] %v6150_v13  ;;  %v2852_v32 = vpop.f32.mrf.mxu1  ;;  %3552 = vmatprep.mubr.bf16.mxu1 %v5279_v28  ;;  %v6159_v23 = vadd.f32 %v2850_v46, %v2638_v40  ;;  %v2640_v55 = vadd.f32 %v2639_v39, %v5914_v16  ;;  %3691 = vmatprep.subr.bf16.mxu0 %v7246_v57  ;;  %v5246_v46 = vld [vmem:[#allocation3 + $0x380] ss:$12 sps:$4 sm:$0xff]  }
 0x172   :  { %3868 = vmatprep.subr.bf16.mxu1 %v7246_v57  ;;  %v2641_v51 = vpop.f32.mrf.mxu0  ;;  %v5247_v40 = vld [vmem:[#allocation3 + $0x500] ss:$12 sps:$4 sm:$0xff]  }
 0x173   :  { %7253 = vst [vmem:[#allocation10_spill] sm:$0xff] %v6159_v23  ;;  %v2854_v30 = vpop.f32.mrf.mxu1  ;;  %v6164_v48 = vadd.f32 %v2852_v32, %v2640_v55  ;;  %v2642_v47 = vadd.f32 %v2641_v51, %v5912_v12  ;;  %3692 = vmatpush1.bf16.msra.mxu0 %v5244_v35  ;;  %v5280_v32 = vld [vmem:[%s7234_s0 + $0x10] ss:$8 sps:$4 sm:$0xff]   ;;  %v5282_v51 = vld [vmem:[%s7234_s0 + $0x24] ss:$8 sps:$4 sm:$0xff]  }
 0x174   :  { %3869 = vmatpush1.bf16.msra.mxu1 %v5245_v38  ;;  %v2643_v5 = vpop.f32.mrf.mxu0  ;;  %3693 = vmatprep.subr.bf16.mxu0 %v7246_v57  ;;  %v5281_v35 = vld [vmem:[%s7235_s1 + $0x10] ss:$8 sps:$4 sm:$0xff]  }
 0x175   :  { %7254 = vst [vmem:[#allocation11_spill] sm:$0xff] %v6164_v48  ;;  %v2856_v13 = vpop.f32.mrf.mxu1  ;;  %3870 = vmatprep.subr.bf16.mxu1 %v7246_v57  ;;  %v6169_v39 = vadd.f32 %v2854_v30, %v2642_v47  ;;  %v2644_v28 = vadd.f32 %v2643_v5, %v5914_v16  ;;  %v5283_v30 = vld [vmem:[%s7235_s1 + $0x24] ss:$8 sps:$4 sm:$0xff]  }
 0x176   :  { %v2647_v23 = vpop.f32.mrf.mxu0  ;;  %3376 = vmatmul.mubr.bf16.gmra.mxu0 %v5280_v32  ;;  %v5248_v32 = vld [vmem:[#allocation3 + $0x368] ss:$12 sps:$4 sm:$0xff]  }
 0x177   :  { %7255 = vst [vmem:[#allocation12_spill] sm:$0xff] %v6169_v39  ;;  %v2860_v29 = vpop.f32.mrf.mxu1  ;;  %3553 = vmatmul.mubr.bf16.gmra.mxu1 %v5281_v35  ;;  %v6178_v38 = vadd.f32 %v2856_v13, %v2644_v28  ;;  %v2648_v55 = vadd.f32 %v2647_v23, %v5912_v12  ;;  %3383 = vmatprep.mubr.bf16.mxu0 %v5282_v51  ;;  %v5249_v35 = vld [vmem:[#allocation3 + $0x4e8] ss:$12 sps:$4 sm:$0xff]  }
 0x178   :  { %3560 = vmatprep.mubr.bf16.mxu1 %v5283_v30  ;;  %v2649_v47 = vpop.f32.mrf.mxu0  ;;  %3694 = vmatpush1.bf16.msra.mxu0 %v5246_v46  ;;  %v5250_v46 = vld [vmem:[#allocation3 + $0x350] ss:$12 sps:$4 sm:$0xff]  }
 0x179   :  { %7256 = vst [vmem:[#allocation13_spill] sm:$0xff] %v6178_v38  ;;  %v2862_v5 = vpop.f32.mrf.mxu1  ;;  %3871 = vmatpush1.bf16.msra.mxu1 %v5247_v40  ;;  %v6187_v13 = vadd.f32 %v2860_v29, %v2648_v55  ;;  %v2650_v23 = vadd.f32 %v2649_v47, %v5914_v16  ;;  %3695 = vmatprep.subr.bf16.mxu0 %v7246_v57  ;;  %v5251_v40 = vld [vmem:[#allocation3 + $0x4d0] ss:$12 sps:$4 sm:$0xff]  }
 0x17a   :  { %3872 = vmatprep.subr.bf16.mxu1 %v7246_v57  ;;  %v2651_v28 = vpop.f32.mrf.mxu0 }
 0x17b   :  { %7257 = vst [vmem:[#allocation14_spill] sm:$0xff] %v6187_v13  ;;  %v2864_v51 = vpop.f32.mrf.mxu1  ;;  %v6192_v38 = vadd.f32 %v2862_v5, %v2650_v23  ;;  %v2652_v30 = vadd.f32 %v2651_v28, %v5912_v12  ;;  %v5284_v5 = vld [vmem:[%s7234_s0 + $0x20] ss:$8 sps:$4 sm:$0xff]   ;;  %v5286_v23 = vld [vmem:[%s7234_s0 + $0x34] ss:$8 sps:$4 sm:$0xff]  }
 0x17c   :  { %v2653_v39 = vpop.f32.mrf.mxu0  ;;  %3696 = vmatpush1.bf16.msra.mxu0 %v5248_v32  ;;  %v5285_v32 = vld [vmem:[%s7235_s1 + $0x20] ss:$8 sps:$4 sm:$0xff]   ;;  %v5287_v28 = vld [vmem:[%s7235_s1 + $0x34] ss:$8 sps:$4 sm:$0xff]  }
 0x17d   :  { %7258 = vst [vmem:[#allocation15_spill] sm:$0xff] %v6192_v38  ;;  %v2866_v48 = vpop.f32.mrf.mxu1  ;;  %3873 = vmatpush1.bf16.msra.mxu1 %v5249_v35  ;;  %v6195_v29 = vadd.f32 %v2864_v51, %v2652_v30  ;;  %v2654_v55 = vadd.f32 %v2653_v39, %v5914_v16  ;;  %3697 = vmatprep.subr.bf16.mxu0 %v7246_v57 }
 0x17e   :  { %3874 = vmatprep.subr.bf16.mxu1 %v7246_v57  ;;  %v2657_v47 = vpop.f32.mrf.mxu0  ;;  %3384 = vmatmul.mubr.bf16.gmra.mxu0 %v5284_v5  ;;  %v5252_v5 = vld [vmem:[#allocation3 + $0x338] ss:$12 sps:$4 sm:$0xff]  }
 0x17f   :  { %7259 = vst [vmem:[#allocation16_spill] sm:$0xff] %v6195_v29  ;;  %v2870_v13 = vpop.f32.mrf.mxu1  ;;  %3561 = vmatmul.mubr.bf16.gmra.mxu1 %v5285_v32  ;;  %v6206_v35 = vadd.f32 %v2866_v48, %v2654_v55  ;;  %v2658_v39 = vadd.f32 %v2657_v47, %v5912_v12  ;;  %3391 = vmatprep.mubr.bf16.mxu0 %v5286_v23  ;;  %v5253_v32 = vld [vmem:[#allocation3 + $0x4b8] ss:$12 sps:$4 sm:$0xff]  }
 0x180   :  { %3568 = vmatprep.mubr.bf16.mxu1 %v5287_v28  ;;  %v2659_v51 = vpop.f32.mrf.mxu0  ;;  %3698 = vmatpush1.bf16.msra.mxu0 %v5250_v46  ;;  %v5254_v46 = vld [vmem:[#allocation3 + $0x320] ss:$12 sps:$4 sm:$0xff]  }
 0x181   :  { %7260 = vst [vmem:[#allocation17_spill] sm:$0xff] %v6206_v35  ;;  %v2872_v30 = vpop.f32.mrf.mxu1  ;;  %3875 = vmatpush1.bf16.msra.mxu1 %v5251_v40  ;;  %v6215_v48 = vadd.f32 %v2870_v13, %v2658_v39  ;;  %v2660_v55 = vadd.f32 %v2659_v51, %v5914_v16  ;;  %3699 = vmatprep.subr.bf16.mxu0 %v7246_v57  ;;  %v5255_v40 = vld [vmem:[#allocation3 + $0x4a0] ss:$12 sps:$4 sm:$0xff]  }
 0x182   :  { %3876 = vmatprep.subr.bf16.mxu1 %v7246_v57  ;;  %v2661_v47 = vpop.f32.mrf.mxu0 }
 0x183   :  { %7261 = vst [vmem:[#allocation18_spill] sm:$0xff] %v6215_v48  ;;  %v2874_v23 = vpop.f32.mrf.mxu1  ;;  %v6220_v35 = vadd.f32 %v2872_v30, %v2660_v55  ;;  %v2662_v28 = vadd.f32 %v2661_v47, %v5912_v12  ;;  %v5288_v30 = vld [vmem:[%s7234_s0 + $0x30] ss:$8 sps:$4 sm:$0xff]   ;;  %v5290_v55 = vld [vmem:[%s7234_s0 + $0x44] ss:$8 sps:$4 sm:$0xff]  }
 0x184   :  { %v2663_v29 = vpop.f32.mrf.mxu0  ;;  %3700 = vmatpush1.bf16.msra.mxu0 %v5252_v5  ;;  %v5289_v5 = vld [vmem:[%s7235_s1 + $0x30] ss:$8 sps:$4 sm:$0xff]   ;;  %v5291_v47 = vld [vmem:[%s7235_s1 + $0x44] ss:$8 sps:$4 sm:$0xff]  }
 0x185   :  { %7262 = vst [vmem:[#allocation19_spill] sm:$0xff] %v6220_v35  ;;  %v2876_v38 = vpop.f32.mrf.mxu1  ;;  %3877 = vmatpush1.bf16.msra.mxu1 %v5253_v32  ;;  %v6223_v13 = vadd.f32 %v2874_v23, %v2662_v28  ;;  %v2664_v39 = vadd.f32 %v2663_v29, %v5914_v16  ;;  %3701 = vmatprep.subr.bf16.mxu0 %v7246_v57 }
 0x186   :  { %3878 = vmatprep.subr.bf16.mxu1 %v7246_v57  ;;  %v2667_v51 = vpop.f32.mrf.mxu0  ;;  %3392 = vmatmul.mubr.bf16.gmra.mxu0 %v5288_v30  ;;  %v5256_v30 = vld [vmem:[#allocation3 + $0x308] ss:$12 sps:$4 sm:$0xff]  }
 0x187   :  { %7263 = vst [vmem:[#allocation20_spill] sm:$0xff] %v6223_v13  ;;  %v2880_v48 = vpop.f32.mrf.mxu1  ;;  %3569 = vmatmul.mubr.bf16.gmra.mxu1 %v5289_v5  ;;  %v6234_v32 = vadd.f32 %v2876_v38, %v2664_v39  ;;  %v2668_v29 = vadd.f32 %v2667_v51, %v5912_v12  ;;  %3399 = vmatprep.mubr.bf16.mxu0 %v5290_v55  ;;  %v5257_v5 = vld [vmem:[#allocation3 + $0x488] ss:$12 sps:$4 sm:$0xff]  }
 0x188   :  { %3576 = vmatprep.mubr.bf16.mxu1 %v5291_v47  ;;  %v2669_v23 = vpop.f32.mrf.mxu0  ;;  %3702 = vmatpush1.bf16.msra.mxu0 %v5254_v46  ;;  %v5258_v46 = vld [vmem:[#allocation3 + $0x470] ss:$12 sps:$4 sm:$0xff]  }
 0x189   :  { %7264 = vst [vmem:[#allocation21_spill] sm:$0xff] %v6234_v32  ;;  %v2882_v28 = vpop.f32.mrf.mxu1  ;;  %3879 = vmatpush1.bf16.msra.mxu1 %v5255_v40  ;;  %v6243_v38 = vadd.f32 %v2880_v48, %v2668_v29  ;;  %v2670_v39 = vadd.f32 %v2669_v23, %v5914_v16  ;;  %3703 = vmatprep.subr.bf16.mxu0 %v7246_v57  ;;  %v5259_v40 = vld [vmem:[#allocation3 + $0x5f0] ss:$12 sps:$4 sm:$0xff]  }
 0x18a   :  { %3880 = vmatprep.subr.bf16.mxu1 %v7246_v57  ;;  %v2671_v51 = vpop.f32.mrf.mxu0 }
 0x18b   :  { %7265 = vst [vmem:[#allocation22_spill] sm:$0xff] %v6243_v38  ;;  %v2884_v55 = vpop.f32.mrf.mxu1  ;;  %v6248_v32 = vadd.f32 %v2882_v28, %v2670_v39  ;;  %v2672_v47 = vadd.f32 %v2671_v51, %v5912_v12  ;;  %v5292_v28 = vld [vmem:[%s7234_s0 + $0x40] ss:$8 sps:$4 sm:$0xff]   ;;  %v5294_v39 = vld [vmem:[%s7234_s0 + $0x54] ss:$8 sps:$4 sm:$0xff]  }
 0x18c   :  { %v2673_v13 = vpop.f32.mrf.mxu0  ;;  %3704 = vmatpush1.bf16.msra.mxu0 %v5256_v30  ;;  %v5293_v30 = vld [vmem:[%s7235_s1 + $0x40] ss:$8 sps:$4 sm:$0xff]   ;;  %v5295_v51 = vld [vmem:[%s7235_s1 + $0x54] ss:$8 sps:$4 sm:$0xff]  }
 0x18d   :  { %7266 = vst [vmem:[#allocation23_spill] sm:$0xff] %v6248_v32  ;;  %v2886_v35 = vpop.f32.mrf.mxu1  ;;  %3881 = vmatpush1.bf16.msra.mxu1 %v5257_v5  ;;  %v6251_v48 = vadd.f32 %v2884_v55, %v2672_v47  ;;  %v2674_v29 = vadd.f32 %v2673_v13, %v5914_v16  ;;  %3705 = vmatprep.subr.bf16.mxu0 %v7246_v57 }
 0x18e   :  { %3882 = vmatprep.subr.bf16.mxu1 %v7246_v57  ;;  %v2677_v23 = vpop.f32.mrf.mxu0  ;;  %3400 = vmatmul.mubr.bf16.gmra.mxu0 %v5292_v28  ;;  %v5260_v28 = vld [vmem:[#allocation3 + $0x458] ss:$12 sps:$4 sm:$0xff]  }
 0x18f   :  { %7267 = vst [vmem:[#allocation24_spill] sm:$0xff] %v6251_v48  ;;  %v2890_v38 = vpop.f32.mrf.mxu1  ;;  %3577 = vmatmul.mubr.bf16.gmra.mxu1 %v5293_v30  ;;  %v6262_v5 = vadd.f32 %v2886_v35, %v2674_v29  ;;  %v2678_v13 = vadd.f32 %v2677_v23, %v5912_v12  ;;  %3407 = vmatprep.mubr.bf16.mxu0 %v5294_v39  ;;  %v5261_v30 = vld [vmem:[#allocation3 + $0x5d8] ss:$12 sps:$4 sm:$0xff]  }
 0x190   :  { %3584 = vmatprep.mubr.bf16.mxu1 %v5295_v51  ;;  %v2679_v55 = vpop.f32.mrf.mxu0  ;;  %3706 = vmatpush2.bf16.msra.mxu0 %v5258_v46  ;;  %v5262_v46 = vld [vmem:[#allocation3 + $0x440] ss:$12 sps:$4 sm:$0xff]  }
 0x191   :  { %7268 = vst [vmem:[#allocation25_spill] sm:$0xff] %v6262_v5  ;;  %v2892_v47 = vpop.f32.mrf.mxu1  ;;  %3883 = vmatpush2.bf16.msra.mxu1 %v5259_v40  ;;  %v6271_v35 = vadd.f32 %v2890_v38, %v2678_v13  ;;  %v2680_v29 = vadd.f32 %v2679_v55, %v5914_v16  ;;  %3707 = vmatprep.subr.bf16.mxu0 %v7246_v57  ;;  %v5263_v40 = vld [vmem:[#allocation3 + $0x5c0] ss:$12 sps:$4 sm:$0xff]  }
 0x192   :  { %3884 = vmatprep.subr.bf16.mxu1 %v7246_v57  ;;  %v2681_v23 = vpop.f32.mrf.mxu0 }
 0x193   :  { %7269 = vst [vmem:[#allocation26_spill] sm:$0xff] %v6271_v35  ;;  %v2894_v39 = vpop.f32.mrf.mxu1  ;;  %v6276_v5 = vadd.f32 %v2892_v47, %v2680_v29  ;;  %v2682_v51 = vadd.f32 %v2681_v23, %v5912_v12  ;;  %v5296_v47 = vld [vmem:[%s7234_s0 + $0x50] ss:$8 sps:$4 sm:$0xff]   ;;  %v5298_v29 = vld [vmem:[%s7234_s0 + $0x64] ss:$8 sps:$4 sm:$0xff]  }
 0x194   :  { %v2683_v48 = vpop.f32.mrf.mxu0  ;;  %3708 = vmatpush2.bf16.msra.mxu0 %v5260_v28  ;;  %v5297_v28 = vld [vmem:[%s7235_s1 + $0x50] ss:$8 sps:$4 sm:$0xff]   ;;  %v5299_v23 = vld [vmem:[%s7235_s1 + $0x64] ss:$8 sps:$4 sm:$0xff]  }
 0x195   :  { %7270 = vst [vmem:[#allocation27_spill] sm:$0xff] %v6276_v5  ;;  %v2896_v32 = vpop.f32.mrf.mxu1  ;;  %3885 = vmatpush2.bf16.msra.mxu1 %v5261_v30  ;;  %v6279_v38 = vadd.f32 %v2894_v39, %v2682_v51  ;;  %v2684_v13 = vadd.f32 %v2683_v48, %v5914_v16  ;;  %3709 = vmatprep.subr.bf16.mxu0 %v7246_v57 }
 0x196   :  { %3886 = vmatprep.subr.bf16.mxu1 %v7246_v57  ;;  %v2687_v55 = vpop.f32.mrf.mxu0  ;;  %3408 = vmatmul.mubr.bf16.gmra.mxu0 %v5296_v47  ;;  %v5264_v47 = vld [vmem:[#allocation3 + $0x428] ss:$12 sps:$4 sm:$0xff]  }
 0x197   :  { %7271 = vst [vmem:[#allocation28_spill] sm:$0xff] %v6279_v38  ;;  %v2900_v35 = vpop.f32.mrf.mxu1  ;;  %3585 = vmatmul.mubr.bf16.gmra.mxu1 %v5297_v28  ;;  %v6290_v30 = vadd.f32 %v2896_v32, %v2684_v13  ;;  %v2688_v48 = vadd.f32 %v2687_v55, %v5912_v12  ;;  %3415 = vmatprep.mubr.bf16.mxu0 %v5298_v29  ;;  %v5265_v28 = vld [vmem:[#allocation3 + $0x5a8] ss:$12 sps:$4 sm:$0xff]  }
 0x198   :  { %3592 = vmatprep.mubr.bf16.mxu1 %v5299_v23  ;;  %v2689_v39 = vpop.f32.mrf.mxu0  ;;  %3710 = vmatpush2.bf16.msra.mxu0 %v5262_v46  ;;  %v5266_v46 = vld [vmem:[#allocation3 + $0x410] ss:$12 sps:$4 sm:$0xff]  }
 0x199   :  { %7272 = vst [vmem:[#allocation29_spill] sm:$0xff] %v6290_v30  ;;  %v2902_v51 = vpop.f32.mrf.mxu1  ;;  %3887 = vmatpush2.bf16.msra.mxu1 %v5263_v40  ;;  %v6299_v32 = vadd.f32 %v2900_v35, %v2688_v48  ;;  %v2690_v13 = vadd.f32 %v2689_v39, %v5914_v16  ;;  %3711 = vmatprep.subr.bf16.mxu0 %v7246_v57  ;;  %v5267_v40 = vld [vmem:[#allocation3 + $0x590] ss:$12 sps:$4 sm:$0xff]  }
 0x19a   :  { %3888 = vmatprep.subr.bf16.mxu1 %v7246_v57  ;;  %v2691_v55 = vpop.f32.mrf.mxu0 }
 0x19b   :  { %7273 = vst [vmem:[#allocation30_spill] sm:$0xff] %v6299_v32  ;;  %v2904_v29 = vpop.f32.mrf.mxu1  ;;  %v6304_v30 = vadd.f32 %v2902_v51, %v2690_v13  ;;  %v2692_v23 = vadd.f32 %v2691_v55, %v5912_v12  ;;  %v5300_v12 = vld [vmem:[%s7234_s0 + $0x60] ss:$8 sps:$4 sm:$0xff]  }
 0x19c   :  { %v2693_v38 = vpop.f32.mrf.mxu0  ;;  %3712 = vmatpush2.bf16.msra.mxu0 %v5264_v47  ;;  %v5301_v51 = vld [vmem:[%s7235_s1 + $0x60] ss:$8 sps:$4 sm:$0xff]  }
 0x19d   :  { %v2906_v5 = vpop.f32.mrf.mxu1  ;;  %3889 = vmatpush2.bf16.msra.mxu1 %v5265_v28  ;;  %v6307_v35 = vadd.f32 %v2904_v29, %v2692_v23  ;;  %v2694_v48 = vadd.f32 %v2693_v38, %v5914_v16  ;;  %3713 = vmatprep.subr.bf16.mxu0 %v7246_v57  ;;  %v5302_v38 = vld [vmem:[%s7234_s0 + $0x74] ss:$8 sps:$4 sm:$0xff]   ;;  %v5268_v29 = vld [vmem:[#allocation3 + $0x3f8] ss:$12 sps:$4 sm:$0xff]  }
 0x19e   :  { %3890 = vmatprep.subr.bf16.mxu1 %v7246_v57  ;;  %v2943_v39 = vpop.f32.mrf.mxu0  ;;  %3416 = vmatmul.mubr.bf16.gmra.mxu0 %v5300_v12  ;;  %v5303_v28 = vld [vmem:[%s7235_s1 + $0x74] ss:$8 sps:$4 sm:$0xff]   ;;  %v5269_v23 = vld [vmem:[#allocation3 + $0x578] ss:$12 sps:$4 sm:$0xff]  }
 0x19f   :  { %v3156_v32 = vpop.f32.mrf.mxu1  ;;  %3593 = vmatmul.mubr.bf16.gmra.mxu1 %v5301_v51  ;;  %v6318_v47 = vadd.f32 %v2906_v5, %v2694_v48  ;;  %v2944_v16 = vadd.f32 %v2943_v39, %v5923_v19  ;;  %3423 = vmatprep.mubr.bf16.mxu0 %v5302_v38 }
 0x1a0   :  { %3600 = vmatprep.mubr.bf16.mxu1 %v5303_v28  ;;  %v2945_v13 = vpop.f32.mrf.mxu0  ;;  %3714 = vmatpush2.bf16.msra.mxu0 %v5266_v46  ;;  %v5270_v46 = vld [vmem:[#allocation3 + $0x3e0] ss:$12 sps:$4 sm:$0xff]  }
 0x1a1   :  { %7274 = vst [vmem:[#allocation31_spill] sm:$0xff] %v6318_v47  ;;  %v3158_v55 = vpop.f32.mrf.mxu1  ;;  %3891 = vmatpush2.bf16.msra.mxu1 %v5267_v40  ;;  %v3157_v5 = vadd.f32 %v3156_v32, %v2944_v16  ;;  %v2946_v48 = vadd.f32 %v2945_v13, %v5928_v26  ;;  %3715 = vmatprep.subr.bf16.mxu0 %v7246_v57  ;;  %v5271_v40 = vld [vmem:[#allocation3 + $0x560] ss:$12 sps:$4 sm:$0xff]  }
 0x1a2   :  { %3892 = vmatprep.subr.bf16.mxu1 %v7246_v57  ;;  %v2947_v19 = vpop.f32.mrf.mxu0 }
 0x1a3   :  { %v3160_v39 = vpop.f32.mrf.mxu1  ;;  %vm4043_vm0 = vcmp.gt.f32.partialorder %v3157_v5, 0.0  ;;  %v4151_v12 = vmul.f32 -0.26, %v3157_v5  ;;  %v3159_v51 = vadd.f32 %v3158_v55, %v2946_v48  ;;  %v2948_v38 = vadd.f32 %v2947_v19, %v5937_v43 }
 0x1a4   :  { %v2949_v28 = vpop.f32.mrf.mxu0  ;;  %3716 = vmatpush2.bf16.msra.mxu0 %v5268_v29  ;;  %v5304_v29 = vld [vmem:[%s7234_s0 + $0x70] ss:$8 sps:$4 sm:$0xff]  }
 0x1a5   :  { %v3162_v47 = vpop.f32.mrf.mxu1  ;;  %3893 = vmatpush2.bf16.msra.mxu1 %v5269_v23  ;;  %v4259_v32 = vsel %vm4043_vm0, %v3157_v5, %v4151_v12  ;;  %vm4044_vm1 = vcmp.gt.f32.partialorder %v3159_v51, 0.0  ;;  %v4152_v26 = vmul.f32 -0.26, %v3159_v51  ;;  %v3161_v16 = vadd.f32 %v3160_v39, %v2948_v38  ;;  %3717 = vmatprep.subr.bf16.mxu0 %v7246_v57  ;;  %v5305_v23 = vld [vmem:[%s7235_s1 + $0x70] ss:$8 sps:$4 sm:$0xff]  }
 0x1a6   :  { %3894 = vmatprep.subr.bf16.mxu1 %v7246_v57  ;;  %4367 = vst [vmem:[%s7238_s4] sm:$0xff] %v4259_v32  ;;  %v2950_v43 = vadd.f32 %v2949_v28, %v5944_v61  ;;  %v2953_v13 = vpop.f32.mrf.mxu0  ;;  %3424 = vmatmul.mubr.bf16.gmra.mxu0 %v5304_v29  ;;  %v5306_v61 = vld [vmem:[%s7234_s0 + $0x84] ss:$8 sps:$4 sm:$0xff]   ;;  %v5273_v28 = vld [vmem:[#allocation3 + $0x548] ss:$12 sps:$4 sm:$0xff]  }
 0x1a7   :  { %v3166_v55 = vpop.f32.mrf.mxu1  ;;  %3601 = vmatmul.mubr.bf16.gmra.mxu1 %v5305_v23  ;;  %v4260_v5 = vsel %vm4044_vm1, %v3159_v51, %v4152_v26  ;;  %vm4046_vm2 = vcmp.gt.f32.partialorder %v3161_v16, 0.0  ;;  %v4154_v48 = vmul.f32 -0.26, %v3161_v16  ;;  %v2954_v19 = vadd.f32 %v2953_v13, %v5947_v49  ;;  %3431 = vmatprep.mubr.bf16.mxu0 %v5306_v61  ;;  %v5307_v39 = vld [vmem:[%s7235_s1 + $0x84] ss:$8 sps:$4 sm:$0xff]  }
 0x1a8   :  { %3608 = vmatprep.mubr.bf16.mxu1 %v5307_v39  ;;  %4368 = vst [vmem:[%s7238_s4 + $0x8] sm:$0xff] %v4260_v5  ;;  %v3163_v12 = vadd.f32 %v3162_v47, %v2950_v43  ;;  %v2955_v51 = vpop.f32.mrf.mxu0  ;;  %3718 = vmatpush2.bf16.msra.mxu0 %v5270_v46  ;;  %v5272_v49 = vld [vmem:[#allocation3 + $0x3c8] ss:$12 sps:$4 sm:$0xff]  }
 0x1a9   :  { %v3168_v38 = vpop.f32.mrf.mxu1  ;;  %3895 = vmatpush2.bf16.msra.mxu1 %v5271_v40  ;;  %v4262_v32 = vsel %vm4046_vm2, %v3161_v16, %v4154_v48  ;;  %v3167_v26 = vadd.f32 %v3166_v55, %v2954_v19  ;;  %v2956_v13 = vadd.f32 %v2955_v51, %v5958_v56  ;;  %3719 = vmatprep.subr.bf16.mxu0 %v7246_v57  ;;  %v5308_v39 = vld [vmem:[%s7234_s0 + $0x80] ss:$8 sps:$4 sm:$0xff]  }
 0x1aa   :  { %3896 = vmatprep.subr.bf16.mxu1 %v7246_v57  ;;  %4370 = vst [vmem:[%s7238_s4 + $0x18] sm:$0xff] %v4262_v32  ;;  %vm4047_vm3 = vcmp.gt.f32.partialorder %v3163_v12, 0.0  ;;  %v4155_v47 = vmul.f32 -0.26, %v3163_v12  ;;  %v2957_v43 = vpop.f32.mrf.mxu0 }
 0x1ab   :  { %v3170_v29 = vpop.f32.mrf.mxu1  ;;  %vm4049_vm4 = vcmp.gt.f32.partialorder %v3167_v26, 0.0  ;;  %v4157_v46 = vmul.f32 -0.26, %v3167_v26  ;;  %v3169_v40 = vadd.f32 %v3168_v38, %v2956_v13  ;;  %v2958_v16 = vadd.f32 %v2957_v43, %v5961_v17 }
 0x1ac   :  { %v4263_v55 = vsel %vm4047_vm3, %v3163_v12, %v4155_v47  ;;  %v2959_v23 = vpop.f32.mrf.mxu0  ;;  %3720 = vmatpush2.bf16.msra.mxu0 %v5272_v49  ;;  %v5309_v12 = vld [vmem:[%s7235_s1 + $0x80] ss:$8 sps:$4 sm:$0xff]  }
 0x1ad   :  { %v3172_v56 = vpop.f32.mrf.mxu1  ;;  %3897 = vmatpush2.bf16.msra.mxu1 %v5273_v28  ;;  %4371 = vst [vmem:[%s7238_s4 + $0x20] sm:$0xff] %v4263_v55  ;;  %v4265_v57 = vsel %vm4049_vm4, %v3167_v26, %v4157_v46  ;;  %vm4050_vm5 = vcmp.gt.f32.partialorder %v3169_v40, 0.0  ;;  %v4158_v5 = vmul.f32 -0.26, %v3169_v40  ;;  %v3171_v48 = vadd.f32 %v3170_v29, %v2958_v16  ;;  %v5311_v28 = vld [vmem:[%s7235_s1 + $0xa4] ss:$8 sps:$4 sm:$0xff]  }
 0x1ae   :  { %4373 = vst [vmem:[%s7238_s4 + $0x30] sm:$0xff] %v4265_v57  ;;  %v2960_v19 = vadd.f32 %v2959_v23, %v5966_v27  ;;  %v2963_v17 = vpop.f32.mrf.mxu0  ;;  %3432 = vmatmul.mubr.bf16.gmra.mxu0 %v5308_v39  ;;  %v5310_v27 = vld [vmem:[%s7234_s0 + $0xa4] ss:$8 sps:$4 sm:$0xff]  }
 0x1af   :  { %v3176_v61 = vpop.f32.mrf.mxu1  ;;  %3609 = vmatmul.mubr.bf16.gmra.mxu1 %v5309_v12  ;;  %v4266_v51 = vsel %vm4050_vm5, %v3169_v40, %v4158_v5  ;;  %vm4052_vm6 = vcmp.gt.f32.partialorder %v3171_v48, 0.0  ;;  %v4160_v38 = vmul.f32 -0.26, %v3171_v48  ;;  %v2964_v49 = vadd.f32 %v2963_v17, %v5971_v31  ;;  %3439 = vmatprep.mubr.bf16.mxu0 %v5310_v27  ;;  %v5313_v12 = vld [vmem:[%s7235_s1 + $0xa0] ss:$8 sps:$4 sm:$0xff]  }
 0x1b0   :  { %3616 = vmatprep.mubr.bf16.mxu1 %v5311_v28  ;;  %4374 = vst [vmem:[%s7238_s4 + $0x38] sm:$0xff] %v4266_v51  ;;  %v3173_v32 = vadd.f32 %v3172_v56, %v2960_v19  ;;  %v2965_v26 = vpop.f32.mrf.mxu0  ;;  %v5315_v27 = vld [vmem:[%s7235_s1 + $0xb4] ss:$8 sps:$4 sm:$0xff]  }
 0x1b1   :  { %v3178_v13 = vpop.f32.mrf.mxu1  ;;  %v4268_v47 = vsel %vm4052_vm6, %v3171_v48, %v4160_v38  ;;  %v3177_v43 = vadd.f32 %v3176_v61, %v2964_v49  ;;  %v2966_v31 = vadd.f32 %v2965_v26, %v5974_v50 }
 0x1b2   :  { %4376 = vst [vmem:[%s7238_s4 + $0x48] sm:$0xff] %v4268_v47  ;;  %vm4053_vm7 = vcmp.gt.f32.partialorder %v3173_v32, 0.0  ;;  %v4161_v29 = vmul.f32 -0.26, %v3173_v32  ;;  %v2967_v46 = vpop.f32.mrf.mxu0 }
 0x1b3   :  { %v3180_v40 = vpop.f32.mrf.mxu1  ;;  %vm4055_vm8 = vcmp.gt.f32.partialorder %v3177_v43, 0.0  ;;  %v4163_v16 = vmul.f32 -0.26, %v3177_v43  ;;  %v3179_v55 = vadd.f32 %v3178_v13, %v2966_v31  ;;  %v2968_v23 = vadd.f32 %v2967_v46, %v5977_v62  ;;  %v5312_v62 = vld [vmem:[%s7234_s0 + $0xa0] ss:$8 sps:$4 sm:$0xff]  }
 0x1b4   :  { %v4269_v56 = vsel %vm4053_vm7, %v3173_v32, %v4161_v29  ;;  %v2969_v57 = vpop.f32.mrf.mxu0 }
 0x1b5   :  { %v3182_v5 = vpop.f32.mrf.mxu1  ;;  %4377 = vst [vmem:[%s7238_s4 + $0x50] sm:$0xff] %v4269_v56  ;;  %v4271_v50 = vsel %vm4055_vm8, %v3177_v43, %v4163_v16  ;;  %vm4056_vm9 = vcmp.gt.f32.partialorder %v3179_v55, 0.0  ;;  %v4164_v48 = vmul.f32 -0.26, %v3179_v55  ;;  %v3181_v19 = vadd.f32 %v3180_v40, %v2968_v23 }
 0x1b6   :  { %4379 = vst [vmem:[%s7238_s4 + $0x60] sm:$0xff] %v4271_v50  ;;  %v2970_v17 = vadd.f32 %v2969_v57, %v5982_v2  ;;  %v2973_v61 = vpop.f32.mrf.mxu0  ;;  %3440 = vmatmul.mubr.bf16.gmra.mxu0 %v5312_v62  ;;  %v5314_v2 = vld [vmem:[%s7234_s0 + $0xb4] ss:$8 sps:$4 sm:$0xff]  }
 0x1b7   :  { %v3186_v39 = vpop.f32.mrf.mxu1  ;;  %3617 = vmatmul.mubr.bf16.gmra.mxu1 %v5313_v12  ;;  %v4272_v51 = vsel %vm4056_vm9, %v3179_v55, %v4164_v48  ;;  %vm4058_vm10 = vcmp.gt.f32.partialorder %v3181_v19, 0.0  ;;  %v4166_v38 = vmul.f32 -0.26, %v3181_v19  ;;  %v2974_v49 = vadd.f32 %v2973_v61, %v5987_v41  ;;  %3447 = vmatprep.mubr.bf16.mxu0 %v5314_v2  ;;  %v5319_v12 = vld [vmem:[%s7235_s1 + $0xc4] ss:$8 sps:$4 sm:$0xff]  }
 0x1b8   :  { %3624 = vmatprep.mubr.bf16.mxu1 %v5315_v27  ;;  %4380 = vst [vmem:[%s7238_s4 + $0x68] sm:$0xff] %v4272_v51  ;;  %v3183_v28 = vadd.f32 %v3182_v5, %v2970_v17  ;;  %v2975_v32 = vpop.f32.mrf.mxu0  ;;  %v5317_v17 = vld [vmem:[%s7235_s1 + $0xb0] ss:$8 sps:$4 sm:$0xff]  }
 0x1b9   :  { %v3188_v26 = vpop.f32.mrf.mxu1  ;;  %v4274_v13 = vsel %vm4058_vm10, %v3181_v19, %v4166_v38  ;;  %v3187_v47 = vadd.f32 %v3186_v39, %v2974_v49  ;;  %v2976_v41 = vadd.f32 %v2975_v32, %v5990_v9 }
 0x1ba   :  { %4382 = vst [vmem:[%s7238_s4 + $0x78] sm:$0xff] %v4274_v13  ;;  %vm4059_vm11 = vcmp.gt.f32.partialorder %v3183_v28, 0.0  ;;  %v4167_v43 = vmul.f32 -0.26, %v3183_v28  ;;  %v2977_v31 = vpop.f32.mrf.mxu0 }
 0x1bb   :  { %v3190_v29 = vpop.f32.mrf.mxu1  ;;  %vm4061_vm12 = vcmp.gt.f32.partialorder %v3187_v47, 0.0  ;;  %v4169_v46 = vmul.f32 -0.26, %v3187_v47  ;;  %v3189_v40 = vadd.f32 %v3188_v26, %v2976_v41  ;;  %v2978_v16 = vadd.f32 %v2977_v31, %v5993_v18  ;;  %v5316_v18 = vld [vmem:[%s7234_s0 + $0xb0] ss:$8 sps:$4 sm:$0xff]  }
 0x1bc   :  { %v4275_v55 = vsel %vm4059_vm11, %v3183_v28, %v4167_v43  ;;  %v2979_v23 = vpop.f32.mrf.mxu0 }
 0x1bd   :  { %v3192_v56 = vpop.f32.mrf.mxu1  ;;  %4383 = vst [vmem:[%s7238_s4 + $0x80] sm:$0xff] %v4275_v55  ;;  %v4277_v9 = vsel %vm4061_vm12, %v3187_v47, %v4169_v46  ;;  %vm4062_vm13 = vcmp.gt.f32.partialorder %v3189_v40, 0.0  ;;  %v4170_v57 = vmul.f32 -0.26, %v3189_v40  ;;  %v3191_v5 = vadd.f32 %v3190_v29, %v2978_v16 }
 0x1be   :  { %4385 = vst [vmem:[%s7238_s4 + $0x90] sm:$0xff] %v4277_v9  ;;  %v2980_v50 = vadd.f32 %v2979_v23, %v5998_v24  ;;  %v2983_v48 = vpop.f32.mrf.mxu0  ;;  %3448 = vmatmul.mubr.bf16.gmra.mxu0 %v5316_v18  ;;  %v5318_v24 = vld [vmem:[%s7234_s0 + $0xc4] ss:$8 sps:$4 sm:$0xff]  }
 0x1bf   :  { %v3196_v19 = vpop.f32.mrf.mxu1  ;;  %3625 = vmatmul.mubr.bf16.gmra.mxu1 %v5317_v17  ;;  %v4278_v61 = vsel %vm4062_vm13, %v3189_v40, %v4170_v57  ;;  %vm4064_vm14 = vcmp.gt.f32.partialorder %v3191_v5, 0.0  ;;  %v4172_v39 = vmul.f32 -0.26, %v3191_v5  ;;  %v2984_v62 = vadd.f32 %v2983_v48, %v6003_v36  ;;  %3455 = vmatprep.mubr.bf16.mxu0 %v5318_v24 }
 0x1c0   :  { %3632 = vmatprep.mubr.bf16.mxu1 %v5319_v12  ;;  %4386 = vst [vmem:[%s7238_s4 + $0x98] sm:$0xff] %v4278_v61  ;;  %v3193_v51 = vadd.f32 %v3192_v56, %v2980_v50  ;;  %v2985_v38 = vpop.f32.mrf.mxu0  ;;  %v5321_v56 = vld [vmem:[%s7235_s1 + $0xc0] ss:$8 sps:$4 sm:$0xff]   ;;  %v5323_v50 = vld [vmem:[%s7235_s1 + $0xd4] ss:$8 sps:$4 sm:$0xff]  }
 0x1c1   :  { %v3198_v49 = vpop.f32.mrf.mxu1  ;;  %v4280_v2 = vsel %vm4064_vm14, %v3191_v5, %v4172_v39  ;;  %v3197_v27 = vadd.f32 %v3196_v19, %v2984_v62  ;;  %v2986_v36 = vadd.f32 %v2985_v38, %v6006_v54 }
 0x1c2   :  { %4388 = vst [vmem:[%s7238_s4 + $0xa8] sm:$0xff] %v4280_v2  ;;  %vm4065_vm15 = vcmp.gt.f32.partialorder %v3193_v51, 0.0  ;;  %v4173_v28 = vmul.f32 -0.26, %v3193_v51  ;;  %v2987_v32 = vpop.f32.mrf.mxu0 }
 0x1c3   :  { %v3200_v26 = vpop.f32.mrf.mxu1  ;;  %vm4067_vm0 = vcmp.gt.f32.partialorder %v3197_v27, 0.0  ;;  %v4175_v13 = vmul.f32 -0.26, %v3197_v27  ;;  %v3199_v47 = vadd.f32 %v3198_v49, %v2986_v36  ;;  %v2988_v41 = vadd.f32 %v2987_v32, %v6009_v58  ;;  %v5320_v58 = vld [vmem:[%s7234_s0 + $0xc0] ss:$8 sps:$4 sm:$0xff]  }
 0x1c4   :  { %v4281_v43 = vsel %vm4065_vm15, %v3193_v51, %v4173_v28  ;;  %v2989_v31 = vpop.f32.mrf.mxu0 }
 0x1c5   :  { %v3202_v29 = vpop.f32.mrf.mxu1  ;;  %4389 = vst [vmem:[%s7238_s4 + $0xb0] sm:$0xff] %v4281_v43  ;;  %v4283_v54 = vsel %vm4067_vm0, %v3197_v27, %v4175_v13  ;;  %vm4068_vm1 = vcmp.gt.f32.partialorder %v3199_v47, 0.0  ;;  %v4176_v46 = vmul.f32 -0.26, %v3199_v47  ;;  %v3201_v40 = vadd.f32 %v3200_v26, %v2988_v41 }
 0x1c6   :  { %4391 = vst [vmem:[%s7238_s4 + $0xc0] sm:$0xff] %v4283_v54  ;;  %v2990_v16 = vadd.f32 %v2989_v31, %v6014_v60  ;;  %v2993_v55 = vpop.f32.mrf.mxu0  ;;  %3456 = vmatmul.mubr.bf16.gmra.mxu0 %v5320_v58  ;;  %v5322_v60 = vld [vmem:[%s7234_s0 + $0xd4] ss:$8 sps:$4 sm:$0xff]  }
 0x1c7   :  { %v3206_v23 = vpop.f32.mrf.mxu1  ;;  %3633 = vmatmul.mubr.bf16.gmra.mxu1 %v5321_v56  ;;  %v4284_v9 = vsel %vm4068_vm1, %v3199_v47, %v4176_v46  ;;  %vm4070_vm2 = vcmp.gt.f32.partialorder %v3201_v40, 0.0  ;;  %v4178_v57 = vmul.f32 -0.26, %v3201_v40  ;;  %v2994_v5 = vadd.f32 %v2993_v55, %v6019_v14  ;;  %3463 = vmatprep.mubr.bf16.mxu0 %v5322_v60  ;;  %v5325_v47 = vld [vmem:[%s7235_s1 + $0xd0] ss:$8 sps:$4 sm:$0xff]  }
 0x1c8   :  { %3640 = vmatprep.mubr.bf16.mxu1 %v5323_v50  ;;  %4392 = vst [vmem:[%s7238_s4 + $0xc8] sm:$0xff] %v4284_v9  ;;  %v3203_v48 = vadd.f32 %v3202_v29, %v2990_v16  ;;  %v2995_v19 = vpop.f32.mrf.mxu0  ;;  %v5327_v29 = vld [vmem:[%s7235_s1 + $0xe4] ss:$8 sps:$4 sm:$0xff]  }
 0x1c9   :  { %v3208_v18 = vpop.f32.mrf.mxu1  ;;  %v4286_v17 = vsel %vm4070_vm2, %v3201_v40, %v4178_v57  ;;  %v3207_v61 = vadd.f32 %v3206_v23, %v2994_v5  ;;  %v2996_v14 = vadd.f32 %v2995_v19, %v6022_v1 }
 0x1ca   :  { %4394 = vst [vmem:[%s7238_s4 + $0xd8] sm:$0xff] %v4286_v17  ;;  %vm4071_vm3 = vcmp.gt.f32.partialorder %v3203_v48, 0.0  ;;  %v4179_v39 = vmul.f32 -0.26, %v3203_v48  ;;  %v2997_v62 = vpop.f32.mrf.mxu0 }
 0x1cb   :  { %v3210_v24 = vpop.f32.mrf.mxu1  ;;  %vm4073_vm4 = vcmp.gt.f32.partialorder %v3207_v61, 0.0  ;;  %v4181_v12 = vmul.f32 -0.26, %v3207_v61  ;;  %v3209_v51 = vadd.f32 %v3208_v18, %v2996_v14  ;;  %v2998_v38 = vadd.f32 %v2997_v62, %v6025_v3  ;;  %v5324_v3 = vld [vmem:[%s7234_s0 + $0xd0] ss:$8 sps:$4 sm:$0xff]  }
 0x1cc   :  { %v4287_v49 = vsel %vm4071_vm3, %v3203_v48, %v4179_v39  ;;  %v2999_v2 = vpop.f32.mrf.mxu0  ;;  %v6516_v39 = vld [vmem:[%s7235_s1 + $0xe0] ss:$8 sps:$4 sm:$0xff]  }
 0x1cd   :  { %v3212_v27 = vpop.f32.mrf.mxu1  ;;  %4395 = vst [vmem:[%s7238_s4 + $0xe0] sm:$0xff] %v4287_v49  ;;  %v4289_v1 = vsel %vm4073_vm4, %v3207_v61, %v4181_v12  ;;  %vm4074_vm5 = vcmp.gt.f32.partialorder %v3209_v51, 0.0  ;;  %v4182_v36 = vmul.f32 -0.26, %v3209_v51  ;;  %v3211_v28 = vadd.f32 %v3210_v24, %v2998_v38  ;;  %v6523_v12 = vld [vmem:[%s7234_s0 + $0xf4] ss:$8 sps:$4 sm:$0xff]  }
 0x1ce   :  { %4397 = vst [vmem:[%s7238_s4 + $0xf0] sm:$0xff] %v4289_v1  ;;  %v3000_v32 = vadd.f32 %v2999_v2, %v6030_v4  ;;  %v3003_v26 = vpop.f32.mrf.mxu0  ;;  %3464 = vmatmul.mubr.bf16.gmra.mxu0 %v5324_v3  ;;  %v5326_v4 = vld [vmem:[%s7234_s0 + $0xe4] ss:$8 sps:$4 sm:$0xff]  }
 0x1cf   :  { %v3216_v13 = vpop.f32.mrf.mxu1  ;;  %3641 = vmatmul.mubr.bf16.gmra.mxu1 %v5325_v47  ;;  %v4290_v41 = vsel %vm4074_vm5, %v3209_v51, %v4182_v36  ;;  %vm4076_vm6 = vcmp.gt.f32.partialorder %v3211_v28, 0.0  ;;  %v4184_v43 = vmul.f32 -0.26, %v3211_v28  ;;  %v3004_v31 = vadd.f32 %v3003_v26, %v6035_v37  ;;  %3471 = vmatprep.mubr.bf16.mxu0 %v5326_v4  ;;  %v6529_v51 = vld [vmem:[%s7235_s1 + $0xf4] ss:$8 sps:$4 sm:$0xff]  }
 0x1d0   :  { %3648 = vmatprep.mubr.bf16.mxu1 %v5327_v29  ;;  %4398 = vst [vmem:[%s7238_s4 + $0xf8] sm:$0xff] %v4290_v41  ;;  %v3213_v54 = vadd.f32 %v3212_v27, %v3000_v32  ;;  %v3005_v46 = vpop.f32.mrf.mxu0 }
 0x1d1   :  { %v3218_v40 = vpop.f32.mrf.mxu1  ;;  %v4292_v16 = vsel %vm4076_vm6, %v3211_v28, %v4184_v43  ;;  %v3217_v55 = vadd.f32 %v3216_v13, %v3004_v31  ;;  %v3006_v37 = vadd.f32 %v3005_v46, %v6038_v6 }
 0x1d2   :  { %4400 = vst [vmem:[%s7238_s4 + $0x108] sm:$0xff] %v4292_v16  ;;  %vm4077_vm7 = vcmp.gt.f32.partialorder %v3213_v54, 0.0  ;;  %v4185_v23 = vmul.f32 -0.26, %v3213_v54  ;;  %v3007_v58 = vpop.f32.mrf.mxu0 }
 0x1d3   :  { %v3220_v56 = vpop.f32.mrf.mxu1  ;;  %vm4079_vm8 = vcmp.gt.f32.partialorder %v3217_v55, 0.0  ;;  %v4187_v9 = vmul.f32 -0.26, %v3217_v55  ;;  %v3219_v57 = vadd.f32 %v3218_v40, %v3006_v37  ;;  %v3008_v5 = vadd.f32 %v3007_v58, %v6041_v7  ;;  %v6510_v7 = vld [vmem:[%s7234_s0 + $0xe0] ss:$8 sps:$4 sm:$0xff]  }
 0x1d4   :  { %v4293_v60 = vsel %vm4077_vm7, %v3213_v54, %v4185_v23  ;;  %v3009_v50 = vpop.f32.mrf.mxu0  ;;  %v6556_v40 = vld [vmem:[%s7235_s1 + $0xf0] ss:$8 sps:$4 sm:$0xff]   ;;  %v6563_v37 = vld [vmem:[%s7234_s0 + $0x104] ss:$8 sps:$4 sm:$0xff]  }
 0x1d5   :  { %v3222_v48 = vpop.f32.mrf.mxu1  ;;  %4401 = vst [vmem:[%s7238_s4 + $0x110] sm:$0xff] %v4293_v60  ;;  %v4295_v6 = vsel %vm4079_vm8, %v3217_v55, %v4187_v9  ;;  %vm4080_vm9 = vcmp.gt.f32.partialorder %v3219_v57, 0.0  ;;  %v4188_v19 = vmul.f32 -0.26, %v3219_v57  ;;  %v3221_v18 = vadd.f32 %v3220_v56, %v3008_v5  ;;  %v6569_v23 = vld [vmem:[%s7235_s1 + $0x104] ss:$8 sps:$4 sm:$0xff]  }
 0x1d6   :  { %4403 = vst [vmem:[%s7238_s4 + $0x120] sm:$0xff] %v4295_v6  ;;  %v3010_v17 = vadd.f32 %v3009_v50, %v6046_v10  ;;  %v3013_v61 = vpop.f32.mrf.mxu0  ;;  %3472 = vmatmul.mubr.bf16.gmra.mxu0 %v6510_v7 }
 0x1d7   :  { %v3226_v14 = vpop.f32.mrf.mxu1  ;;  %3649 = vmatmul.mubr.bf16.gmra.mxu1 %v6516_v39  ;;  %v4296_v62 = vsel %vm4080_vm9, %v3219_v57, %v4188_v19  ;;  %vm4082_vm10 = vcmp.gt.f32.partialorder %v3221_v18, 0.0  ;;  %v4190_v24 = vmul.f32 -0.26, %v3221_v18  ;;  %v3014_v10 = vadd.f32 %v3013_v61, %v6051_v52  ;;  %3479 = vmatprep.mubr.bf16.mxu0 %v6523_v12 }
 0x1d8   :  { %3656 = vmatprep.mubr.bf16.mxu1 %v6529_v51  ;;  %4404 = vst [vmem:[%s7238_s4 + $0x128] sm:$0xff] %v4296_v62  ;;  %v3223_v38 = vadd.f32 %v3222_v48, %v3010_v17  ;;  %v3015_v52 = vpop.f32.mrf.mxu0 }
 0x1d9   :  { %v3228_v49 = vpop.f32.mrf.mxu1  ;;  %v4298_v2 = vsel %vm4082_vm10, %v3221_v18, %v4190_v24  ;;  %v3227_v27 = vadd.f32 %v3226_v14, %v3014_v10  ;;  %v3016_v1 = vadd.f32 %v3015_v52, %v6054_v20 }
 0x1da   :  { %4406 = vst [vmem:[%s7238_s4 + $0x138] sm:$0xff] %v4298_v2  ;;  %vm4083_vm11 = vcmp.gt.f32.partialorder %v3223_v38, 0.0  ;;  %v4191_v36 = vmul.f32 -0.26, %v3223_v38  ;;  %v3017_v28 = vpop.f32.mrf.mxu0 }
 0x1db   :  { %v3230_v32 = vpop.f32.mrf.mxu1  ;;  %vm4085_vm12 = vcmp.gt.f32.partialorder %v3227_v27, 0.0  ;;  %v4193_v26 = vmul.f32 -0.26, %v3227_v27  ;;  %v3229_v13 = vadd.f32 %v3228_v49, %v3016_v1  ;;  %v3018_v3 = vadd.f32 %v3017_v28, %v6057_v21  ;;  %v6550_v21 = vld [vmem:[%s7234_s0 + $0xf0] ss:$8 sps:$4 sm:$0xff]  }
 0x1dc   :  { %v4299_v47 = vsel %vm4083_vm11, %v3223_v38, %v4191_v36  ;;  %v3019_v41 = vpop.f32.mrf.mxu0  ;;  %v6596_v49 = vld [vmem:[%s7235_s1 + $0x100] ss:$8 sps:$4 sm:$0xff]   ;;  %v6603_v1 = vld [vmem:[%s7234_s0 + $0x114] ss:$8 sps:$4 sm:$0xff]  }
 0x1dd   :  { %v3232_v43 = vpop.f32.mrf.mxu1  ;;  %4407 = vst [vmem:[%s7238_s4 + $0x140] sm:$0xff] %v4299_v47  ;;  %v4301_v20 = vsel %vm4085_vm12, %v3227_v27, %v4193_v26  ;;  %vm4086_vm13 = vcmp.gt.f32.partialorder %v3229_v13, 0.0  ;;  %v4194_v31 = vmul.f32 -0.26, %v3229_v13  ;;  %v3231_v4 = vadd.f32 %v3230_v32, %v3018_v3  ;;  %v6609_v36 = vld [vmem:[%s7235_s1 + $0x114] ss:$8 sps:$4 sm:$0xff]  }
 0x1de   :  { %4409 = vst [vmem:[%s7238_s4 + $0x150] sm:$0xff] %v4301_v20  ;;  %v3020_v29 = vadd.f32 %v3019_v41, %v6062_v22  ;;  %v3023_v54 = vpop.f32.mrf.mxu0  ;;  %3480 = vmatmul.mubr.bf16.gmra.mxu0 %v6550_v21 }
 0x1df   :  { %v3236_v46 = vpop.f32.mrf.mxu1  ;;  %3657 = vmatmul.mubr.bf16.gmra.mxu1 %v6556_v40  ;;  %v4302_v16 = vsel %vm4086_vm13, %v3229_v13, %v4194_v31  ;;  %vm4088_vm14 = vcmp.gt.f32.partialorder %v3231_v4, 0.0  ;;  %v4196_v55 = vmul.f32 -0.26, %v3231_v4  ;;  %v3024_v22 = vadd.f32 %v3023_v54, %v6067_v53  ;;  %3487 = vmatprep.mubr.bf16.mxu0 %v6563_v37 }
 0x1e0   :  { %3664 = vmatprep.mubr.bf16.mxu1 %v6569_v23  ;;  %4410 = vst [vmem:[%s7238_s4 + $0x158] sm:$0xff] %v4302_v16  ;;  %v3233_v58 = vadd.f32 %v3232_v43, %v3020_v29  ;;  %v3025_v53 = vpop.f32.mrf.mxu0 }
 0x1e1   :  { %v3238_v56 = vpop.f32.mrf.mxu1  ;;  %v4304_v9 = vsel %vm4088_vm14, %v3231_v4, %v4196_v55  ;;  %v3237_v57 = vadd.f32 %v3236_v46, %v3024_v22  ;;  %v3026_v5 = vadd.f32 %v3025_v53, %v6070_v59 }
 0x1e2   :  { %4412 = vst [vmem:[%s7238_s4 + $0x168] sm:$0xff] %v4304_v9  ;;  %vm4089_vm15 = vcmp.gt.f32.partialorder %v3233_v58, 0.0  ;;  %v4197_v60 = vmul.f32 -0.26, %v3233_v58  ;;  %v3027_v50 = vpop.f32.mrf.mxu0 }
 0x1e3   :  { %v3240_v48 = vpop.f32.mrf.mxu1  ;;  %vm4091_vm0 = vcmp.gt.f32.partialorder %v3237_v57, 0.0  ;;  %v4199_v6 = vmul.f32 -0.26, %v3237_v57  ;;  %v3239_v19 = vadd.f32 %v3238_v56, %v3026_v5  ;;  %v3028_v18 = vadd.f32 %v3027_v50, %v6079_v34  ;;  %v6590_v34 = vld [vmem:[%s7234_s0 + $0x100] ss:$8 sps:$4 sm:$0xff]  }
 0x1e4   :  { %v4305_v17 = vsel %vm4089_vm15, %v3233_v58, %v4197_v60  ;;  %v3029_v61 = vpop.f32.mrf.mxu0  ;;  %v6636_v56 = vld [vmem:[%s7235_s1 + $0x110] ss:$8 sps:$4 sm:$0xff]   ;;  %v5342_v5 = vld [vmem:[%s7234_s0 + $0x124] ss:$8 sps:$4 sm:$0xff]  }
 0x1e5   :  { %v3242_v14 = vpop.f32.mrf.mxu1  ;;  %4413 = vst [vmem:[%s7238_s4 + $0x170] sm:$0xff] %v4305_v17  ;;  %v4307_v59 = vsel %vm4091_vm0, %v3237_v57, %v4199_v6  ;;  %vm4092_vm1 = vcmp.gt.f32.partialorder %v3239_v19, 0.0  ;;  %v4200_v62 = vmul.f32 -0.26, %v3239_v19  ;;  %v3241_v24 = vadd.f32 %v3240_v48, %v3028_v18  ;;  %v5343_v60 = vld [vmem:[%s7235_s1 + $0x124] ss:$8 sps:$4 sm:$0xff]  }
 0x1e6   :  { %4415 = vst [vmem:[%s7238_s4 + $0x180] sm:$0xff] %v4307_v59  ;;  %v3030_v10 = vadd.f32 %v3029_v61, %v6084_v63  ;;  %v3033_v38 = vpop.f32.mrf.mxu0  ;;  %3488 = vmatmul.mubr.bf16.gmra.mxu0 %v6590_v34 }
 0x1e7   :  { %v3246_v52 = vpop.f32.mrf.mxu1  ;;  %3665 = vmatmul.mubr.bf16.gmra.mxu1 %v6596_v49  ;;  %v4308_v2 = vsel %vm4092_vm1, %v3239_v19, %v4200_v62  ;;  %vm4094_vm2 = vcmp.gt.f32.partialorder %v3241_v24, 0.0  ;;  %v4202_v27 = vmul.f32 -0.26, %v3241_v24  ;;  %v3034_v63 = vadd.f32 %v3033_v38, %v6087_v15  ;;  %3495 = vmatprep.mubr.bf16.mxu0 %v6603_v1 }
 0x1e8   :  { %3672 = vmatprep.mubr.bf16.mxu1 %v6609_v36  ;;  %4416 = vst [vmem:[%s7238_s4 + $0x188] sm:$0xff] %v4308_v2  ;;  %v3243_v28 = vadd.f32 %v3242_v14, %v3030_v10  ;;  %v3035_v15 = vpop.f32.mrf.mxu0 }
 0x1e9   :  { %v3248_v32 = vpop.f32.mrf.mxu1  ;;  %v4310_v26 = vsel %vm4094_vm2, %v3241_v24, %v4202_v27  ;;  %v3247_v13 = vadd.f32 %v3246_v52, %v3034_v63  ;;  %v3036_v3 = vadd.f32 %v3035_v15, %v6096_v33  ;;  %v7275_v63 = vld [vmem:[#allocation6_spill] sm:$0xff] }
 0x1ea   :  { %4418 = vst [vmem:[%s7238_s4 + $0x198] sm:$0xff] %v4310_v26  ;;  %vm4095_vm3 = vcmp.gt.f32.partialorder %v3243_v28, 0.0  ;;  %v4203_v47 = vmul.f32 -0.26, %v3243_v28  ;;  %v3037_v41 = vpop.f32.mrf.mxu0  ;;  %v5345_v26 = vld [vmem:[%s7235_s1 + $0x120] ss:$8 sps:$4 sm:$0xff]  }
 0x1eb   :  { %v3250_v43 = vpop.f32.mrf.mxu1  ;;  %vm4097_vm4 = vcmp.gt.f32.partialorder %v3247_v13, 0.0  ;;  %v4205_v20 = vmul.f32 -0.26, %v3247_v13  ;;  %v3249_v31 = vadd.f32 %v3248_v32, %v3036_v3  ;;  %v3038_v4 = vadd.f32 %v3037_v41, %v6105_v45  ;;  %v6630_v45 = vld [vmem:[%s7234_s0 + $0x110] ss:$8 sps:$4 sm:$0xff]  }
 0x1ec   :  { %v4311_v29 = vsel %vm4095_vm3, %v3243_v28, %v4203_v47  ;;  %v3039_v54 = vpop.f32.mrf.mxu0  ;;  %v5346_v41 = vld [vmem:[%s7234_s0 + $0x14] ss:$8 sps:$4 sm:$0xff]  }
 0x1ed   :  { %v3252_v46 = vpop.f32.mrf.mxu1  ;;  %4419 = vst [vmem:[%s7238_s4 + $0x1a0] sm:$0xff] %v4311_v29  ;;  %v4313_v33 = vsel %vm4097_vm4, %v3247_v13, %v4205_v20  ;;  %vm4098_vm5 = vcmp.gt.f32.partialorder %v3249_v31, 0.0  ;;  %v4206_v16 = vmul.f32 -0.26, %v3249_v31  ;;  %v3251_v55 = vadd.f32 %v3250_v43, %v3038_v4  ;;  %v5347_v43 = vld [vmem:[%s7235_s1 + $0x14] ss:$8 sps:$4 sm:$0xff]  }
 0x1ee   :  { %4421 = vst [vmem:[%s7238_s4 + $0x1b0] sm:$0xff] %v4313_v33  ;;  %v3040_v22 = vadd.f32 %v3039_v54, %v6108_v0  ;;  %v3043_v58 = vpop.f32.mrf.mxu0  ;;  %3496 = vmatmul.mubr.bf16.gmra.mxu0 %v6630_v45 }
 0x1ef   :  { %v3256_v53 = vpop.f32.mrf.mxu1  ;;  %3673 = vmatmul.mubr.bf16.gmra.mxu1 %v6636_v56  ;;  %v4314_v9 = vsel %vm4098_vm5, %v3249_v31, %v4206_v16  ;;  %vm4100_vm6 = vcmp.gt.f32.partialorder %v3251_v55, 0.0  ;;  %v4208_v57 = vmul.f32 -0.26, %v3251_v55  ;;  %v3044_v0 = vadd.f32 %v3043_v58, %v6111_v8  ;;  %3503 = vmatprep.mubr.bf16.mxu0 %v5342_v5  ;;  %v7276_v58 = vld [vmem:[#allocation7_spill] sm:$0xff] }
 0x1f0   :  { %3680 = vmatprep.mubr.bf16.mxu1 %v5343_v60  ;;  %4422 = vst [vmem:[%s7238_s4 + $0x1b8] sm:$0xff] %v4314_v9  ;;  %v3253_v50 = vadd.f32 %v3252_v46, %v3040_v22  ;;  %v3045_v48 = vpop.f32.mrf.mxu0 }
 0x1f1   :  { %v3258_v6 = vpop.f32.mrf.mxu1  ;;  %v4316_v19 = vsel %vm4100_vm6, %v3251_v55, %v4208_v57  ;;  %v3257_v18 = vadd.f32 %v3256_v53, %v3044_v0  ;;  %v3046_v8 = vadd.f32 %v3045_v48, %v6120_v44 }
 0x1f2   :  { %4424 = vst [vmem:[%s7238_s4 + $0x1c8] sm:$0xff] %v4316_v19  ;;  %vm4101_vm7 = vcmp.gt.f32.partialorder %v3253_v50, 0.0  ;;  %v4209_v17 = vmul.f32 -0.26, %v3253_v50  ;;  %v3047_v61 = vpop.f32.mrf.mxu0 }
 0x1f3   :  { %v3260_v14 = vpop.f32.mrf.mxu1  ;;  %vm4103_vm8 = vcmp.gt.f32.partialorder %v3257_v18, 0.0  ;;  %v4211_v59 = vmul.f32 -0.26, %v3257_v18  ;;  %v3259_v62 = vadd.f32 %v3258_v6, %v3046_v8  ;;  %v3048_v24 = vadd.f32 %v3047_v61, %v6123_v42  ;;  %v5344_v42 = vld [vmem:[%s7234_s0 + $0x120] ss:$8 sps:$4 sm:$0xff]  }
 0x1f4   :  { %v4317_v10 = vsel %vm4101_vm7, %v3253_v50, %v4209_v17  ;;  %v3049_v38 = vpop.f32.mrf.mxu0  ;;  %v7277_v50 = vld [vmem:[#allocation9_spill] sm:$0xff] }
 0x1f5   :  { %v3262_v52 = vpop.f32.mrf.mxu1  ;;  %4425 = vst [vmem:[%s7238_s4 + $0x1d0] sm:$0xff] %v4317_v10  ;;  %v4319_v44 = vsel %vm4103_vm8, %v3257_v18, %v4211_v59  ;;  %vm4104_vm9 = vcmp.gt.f32.partialorder %v3259_v62, 0.0  ;;  %v4212_v2 = vmul.f32 -0.26, %v3259_v62  ;;  %v3261_v27 = vadd.f32 %v3260_v14, %v3048_v24  ;;  %v5348_v18 = vld [vmem:[%s7234_s0 + $0x10] ss:$8 sps:$4 sm:$0xff]  }
 0x1f6   :  { %4427 = vst [vmem:[%s7238_s4 + $0x1e0] sm:$0xff] %v4319_v44  ;;  %v3050_v28 = vadd.f32 %v3049_v38, %v7275_v63  ;;  %v3053_v15 = vpop.f32.mrf.mxu0  ;;  %3504 = vmatmul.mubr.bf16.gmra.mxu0 %v5344_v42  ;;  %v5349_v8 = vld [vmem:[%s7235_s1 + $0x10] ss:$8 sps:$4 sm:$0xff]   ;;  %v7278_v14 = vld [vmem:[#allocation10_spill] sm:$0xff] }
 0x1f7   :  { %v3266_v32 = vpop.f32.mrf.mxu1  ;;  %3681 = vmatmul.mubr.bf16.gmra.mxu1 %v5345_v26  ;;  %v4320_v13 = vsel %vm4104_vm9, %v3259_v62, %v4212_v2  ;;  %vm4106_vm10 = vcmp.gt.f32.partialorder %v3261_v27, 0.0  ;;  %v4214_v3 = vmul.f32 -0.26, %v3261_v27  ;;  %v3054_v47 = vadd.f32 %v3053_v15, %v6135_v11  ;;  %3721 = vmatprep.mubr.bf16.mxu0 %v5346_v41  ;;  %v5350_v62 = vld [vmem:[%s7234_s0 + $0x24] ss:$8 sps:$4 sm:$0xff]  }
 0x1f8   :  { %3898 = vmatprep.mubr.bf16.mxu1 %v5347_v43  ;;  %4428 = vst [vmem:[%s7238_s4 + $0x1e8] sm:$0xff] %v4320_v13  ;;  %v3263_v20 = vadd.f32 %v3262_v52, %v3050_v28  ;;  %v3055_v31 = vpop.f32.mrf.mxu0  ;;  %v5351_v24 = vld [vmem:[%s7235_s1 + $0x24] ss:$8 sps:$4 sm:$0xff]   ;;  %v7280_v13 = vld [vmem:[#allocation12_spill] sm:$0xff] }
 0x1f9   :  { %v3268_v4 = vpop.f32.mrf.mxu1  ;;  %v4322_v29 = vsel %vm4106_vm10, %v3261_v27, %v4214_v3  ;;  %v3267_v54 = vadd.f32 %v3266_v32, %v3054_v47  ;;  %v3056_v11 = vadd.f32 %v3055_v31, %v6138_v25  ;;  %v7279_v27 = vld [vmem:[#allocation11_spill] sm:$0xff] }
 0x1fa   :  { %4430 = vst [vmem:[%s7238_s4 + $0x1f8] sm:$0xff] %v4322_v29  ;;  %vm4107_vm11 = vcmp.gt.f32.partialorder %v3263_v20, 0.0  ;;  %v4215_v46 = vmul.f32 -0.26, %v3263_v20  ;;  %v3057_v33 = vpop.f32.mrf.mxu0  ;;  %v7281_v29 = vld [vmem:[#allocation13_spill] sm:$0xff] }
 0x1fb   :  { %v3270_v16 = vpop.f32.mrf.mxu1  ;;  %vm4109_vm12 = vcmp.gt.f32.partialorder %v3267_v54, 0.0  ;;  %v4217_v55 = vmul.f32 -0.26, %v3267_v54  ;;  %v3269_v22 = vadd.f32 %v3268_v4, %v3056_v11  ;;  %v3058_v53 = vadd.f32 %v3057_v33, %v7276_v58  ;;  %v5352_v33 = vld [vmem:[%s7234_s0 + $0x20] ss:$8 sps:$4 sm:$0xff]  }
 0x1fc   :  { %v4323_v9 = vsel %vm4107_vm11, %v3263_v20, %v4215_v46  ;;  %v3059_v57 = vpop.f32.mrf.mxu0  ;;  %v7282_v58 = vld [vmem:[#allocation14_spill] sm:$0xff] }
 0x1fd   :  { %v3272_v0 = vpop.f32.mrf.mxu1  ;;  %4431 = vst [vmem:[%s7238_s4 + $0x200] sm:$0xff] %v4323_v9  ;;  %v4325_v25 = vsel %vm4109_vm12, %v3267_v54, %v4217_v55  ;;  %vm4110_vm13 = vcmp.gt.f32.partialorder %v3269_v22, 0.0  ;;  %v4218_v5 = vmul.f32 -0.26, %v3269_v22  ;;  %v3271_v60 = vadd.f32 %v3270_v16, %v3058_v53  ;;  %v5353_v16 = vld [vmem:[%s7235_s1 + $0x20] ss:$8 sps:$4 sm:$0xff]  }
 0x1fe   :  { %4433 = vst [vmem:[%s7238_s4 + $0x210] sm:$0xff] %v4325_v25  ;;  %v3060_v48 = vadd.f32 %v3059_v57, %v7277_v50  ;;  %v3063_v6 = vpop.f32.mrf.mxu0  ;;  %3722 = vmatmul.mubr.bf16.vlgmr.msra.gmra.mxu0 %v5348_v18  ;;  %v5354_v9 = vld [vmem:[%s7234_s0 + $0x34] ss:$8 sps:$4 sm:$0xff]  }
 0x1ff   :  { %v3276_v19 = vpop.f32.mrf.mxu1  ;;  %3899 = vmatmul.mubr.bf16.vlgmr.msra.gmra.mxu1 %v5349_v8  ;;  %v4326_v17 = vsel %vm4110_vm13, %v3269_v22, %v4218_v5  ;;  %vm4112_vm14 = vcmp.gt.f32.partialorder %v3271_v60, 0.0  ;;  %v4220_v61 = vmul.f32 -0.26, %v3271_v60  ;;  %v3064_v59 = vadd.f32 %v3063_v6, %v7278_v14  ;;  %3729 = vmatprep.mubr.bf16.mxu0 %v5350_v62  ;;  %v5355_v57 = vld [vmem:[%s7235_s1 + $0x34] ss:$8 sps:$4 sm:$0xff]  }
 0x200   :  { %3906 = vmatprep.mubr.bf16.mxu1 %v5351_v24  ;;  %4434 = vst [vmem:[%s7238_s4 + $0x218] sm:$0xff] %v4326_v17  ;;  %v3273_v10 = vadd.f32 %v3272_v0, %v3060_v48  ;;  %v3065_v38 = vpop.f32.mrf.mxu0  ;;  %v7283_v48 = vld [vmem:[#allocation15_spill] sm:$0xff]  ;;  %v7284_v14 = vld [vmem:[#allocation16_spill] sm:$0xff] }
 0x201   :  { %v3278_v52 = vpop.f32.mrf.mxu1  ;;  %v4328_v44 = vsel %vm4112_vm14, %v3271_v60, %v4220_v61  ;;  %v3277_v2 = vadd.f32 %v3276_v19, %v3064_v59  ;;  %v3066_v63 = vadd.f32 %v3065_v38, %v7279_v27 }
 0x202   :  { %4436 = vst [vmem:[%s7238_s4 + $0x228] sm:$0xff] %v4328_v44  ;;  %vm4113_vm15 = vcmp.gt.f32.partialorder %v3273_v10, 0.0  ;;  %v4221_v28 = vmul.f32 -0.26, %v3273_v10  ;;  %v3067_v15 = vpop.f32.mrf.mxu0 }
 0x203   :  { %v3280_v32 = vpop.f32.mrf.mxu1  ;;  %vm4115_vm0 = vcmp.gt.f32.partialorder %v3277_v2, 0.0  ;;  %v4223_v42 = vmul.f32 -0.26, %v3277_v2  ;;  %v3279_v26 = vadd.f32 %v3278_v52, %v3066_v63  ;;  %v3068_v3 = vadd.f32 %v3067_v15, %v7280_v13  ;;  %v5356_v15 = vld [vmem:[%s7234_s0 + $0x30] ss:$8 sps:$4 sm:$0xff]   ;;  %v7286_v13 = vld [vmem:[#allocation18_spill] sm:$0xff] }
 0x204   :  { %v4329_v47 = vsel %vm4113_vm15, %v3273_v10, %v4221_v28  ;;  %v3069_v41 = vpop.f32.mrf.mxu0 }
 0x205   :  { %v3282_v43 = vpop.f32.mrf.mxu1  ;;  %4437 = vst [vmem:[%s7238_s4 + $0x230] sm:$0xff] %v4329_v47  ;;  %v4331_v20 = vsel %vm4115_vm0, %v3277_v2, %v4223_v42  ;;  %vm4116_vm1 = vcmp.gt.f32.partialorder %v3279_v26, 0.0  ;;  %v4224_v31 = vmul.f32 -0.26, %v3279_v26  ;;  %v3281_v4 = vadd.f32 %v3280_v32, %v3068_v3  ;;  %v7285_v2 = vld [vmem:[#allocation17_spill] sm:$0xff] }
 0x206   :  { %4439 = vst [vmem:[%s7238_s4 + $0x240] sm:$0xff] %v4331_v20  ;;  %v3070_v54 = vadd.f32 %v3069_v41, %v7281_v29  ;;  %v3073_v11 = vpop.f32.mrf.mxu0  ;;  %3730 = vmatmul.mubr.bf16.gmra.mxu0 %v5352_v33  ;;  %v5357_v32 = vld [vmem:[%s7235_s1 + $0x30] ss:$8 sps:$4 sm:$0xff]   ;;  %v5358_v47 = vld [vmem:[%s7234_s0 + $0x44] ss:$8 sps:$4 sm:$0xff]  }
 0x207   :  { %v3286_v46 = vpop.f32.mrf.mxu1  ;;  %3907 = vmatmul.mubr.bf16.gmra.mxu1 %v5353_v16  ;;  %v4332_v55 = vsel %vm4116_vm1, %v3279_v26, %v4224_v31  ;;  %vm4118_vm2 = vcmp.gt.f32.partialorder %v3281_v4, 0.0  ;;  %v4226_v22 = vmul.f32 -0.26, %v3281_v4  ;;  %v3074_v53 = vadd.f32 %v3073_v11, %v7282_v58  ;;  %3737 = vmatprep.mubr.bf16.mxu0 %v5354_v9  ;;  %v5359_v41 = vld [vmem:[%s7235_s1 + $0x44] ss:$8 sps:$4 sm:$0xff]   ;;  %v7288_v58 = vld [vmem:[#allocation20_spill] sm:$0xff] }
 0x208   :  { %3914 = vmatprep.mubr.bf16.mxu1 %v5355_v57  ;;  %4440 = vst [vmem:[%s7238_s4 + $0x248] sm:$0xff] %v4332_v55  ;;  %v3283_v0 = vadd.f32 %v3282_v43, %v3070_v54  ;;  %v3075_v25 = vpop.f32.mrf.mxu0  ;;  %v7287_v54 = vld [vmem:[#allocation19_spill] sm:$0xff] }
 0x209   :  { %v3288_v5 = vpop.f32.mrf.mxu1  ;;  %v4334_v60 = vsel %vm4118_vm2, %v3281_v4, %v4226_v22  ;;  %v3287_v50 = vadd.f32 %v3286_v46, %v3074_v53  ;;  %v3076_v6 = vadd.f32 %v3075_v25, %v7283_v48 }
 0x20a   :  { %4442 = vst [vmem:[%s7238_s4 + $0x258] sm:$0xff] %v4334_v60  ;;  %vm4119_vm3 = vcmp.gt.f32.partialorder %v3283_v0, 0.0  ;;  %v4227_v19 = vmul.f32 -0.26, %v3283_v0  ;;  %v3077_v18 = vpop.f32.mrf.mxu0 }
 0x20b   :  { %v3290_v8 = vpop.f32.mrf.mxu1  ;;  %vm4121_vm4 = vcmp.gt.f32.partialorder %v3287_v50, 0.0  ;;  %v4229_v17 = vmul.f32 -0.26, %v3287_v50  ;;  %v3289_v61 = vadd.f32 %v3288_v5, %v3076_v6  ;;  %v3078_v59 = vadd.f32 %v3077_v18, %v7284_v14  ;;  %v5360_v18 = vld [vmem:[%s7234_s0 + $0x40] ss:$8 sps:$4 sm:$0xff]  }
 0x20c   :  { %v4335_v62 = vsel %vm4119_vm3, %v3283_v0, %v4227_v19  ;;  %v3079_v24 = vpop.f32.mrf.mxu0  ;;  %v7290_v14 = vld [vmem:[#allocation22_spill] sm:$0xff] }
 0x20d   :  { %v3292_v10 = vpop.f32.mrf.mxu1  ;;  %4443 = vst [vmem:[%s7238_s4 + $0x260] sm:$0xff] %v4335_v62  ;;  %v4337_v38 = vsel %vm4121_vm4, %v3287_v50, %v4229_v17  ;;  %vm4122_vm5 = vcmp.gt.f32.partialorder %v3289_v61, 0.0  ;;  %v4230_v52 = vmul.f32 -0.26, %v3289_v61  ;;  %v3291_v44 = vadd.f32 %v3290_v8, %v3078_v59  ;;  %v7289_v50 = vld [vmem:[#allocation21_spill] sm:$0xff] }
 0x20e   :  { %4445 = vst [vmem:[%s7238_s4 + $0x270] sm:$0xff] %v4337_v38  ;;  %v3080_v27 = vadd.f32 %v3079_v24, %v7285_v2  ;;  %v3083_v63 = vpop.f32.mrf.mxu0  ;;  %3738 = vmatmul.mubr.bf16.gmra.mxu0 %v5356_v15  ;;  %v5361_v8 = vld [vmem:[%s7235_s1 + $0x40] ss:$8 sps:$4 sm:$0xff]   ;;  %v5362_v62 = vld [vmem:[%s7234_s0 + $0x54] ss:$8 sps:$4 sm:$0xff]  }
 0x20f   :  { %v3296_v28 = vpop.f32.mrf.mxu1  ;;  %3915 = vmatmul.mubr.bf16.gmra.mxu1 %v5357_v32  ;;  %v4338_v42 = vsel %vm4122_vm5, %v3289_v61, %v4230_v52  ;;  %vm4124_vm6 = vcmp.gt.f32.partialorder %v3291_v44, 0.0  ;;  %v4232_v26 = vmul.f32 -0.26, %v3291_v44  ;;  %v3084_v3 = vadd.f32 %v3083_v63, %v7286_v13  ;;  %3745 = vmatprep.mubr.bf16.mxu0 %v5358_v47  ;;  %v5363_v24 = vld [vmem:[%s7235_s1 + $0x54] ss:$8 sps:$4 sm:$0xff]  }
 0x210   :  { %3922 = vmatprep.mubr.bf16.mxu1 %v5359_v41  ;;  %4446 = vst [vmem:[%s7238_s4 + $0x278] sm:$0xff] %v4338_v42  ;;  %v3293_v43 = vadd.f32 %v3292_v10, %v3080_v27  ;;  %v3085_v20 = vpop.f32.mrf.mxu0  ;;  %v7291_v27 = vld [vmem:[#allocation23_spill] sm:$0xff]  ;;  %v7292_v13 = vld [vmem:[#allocation24_spill] sm:$0xff] }
 0x211   :  { %v3298_v31 = vpop.f32.mrf.mxu1  ;;  %v4340_v4 = vsel %vm4124_vm6, %v3291_v44, %v4232_v26  ;;  %v3297_v29 = vadd.f32 %v3296_v28, %v3084_v3  ;;  %v3086_v11 = vadd.f32 %v3085_v20, %v7287_v54 }
 0x212   :  { %4448 = vst [vmem:[%s7238_s4 + $0x288] sm:$0xff] %v4340_v4  ;;  %vm4125_vm7 = vcmp.gt.f32.partialorder %v3293_v43, 0.0  ;;  %v4233_v46 = vmul.f32 -0.26, %v3293_v43  ;;  %v3087_v33 = vpop.f32.mrf.mxu0 }
 0x213   :  { %v3300_v16 = vpop.f32.mrf.mxu1  ;;  %vm4127_vm8 = vcmp.gt.f32.partialorder %v3297_v29, 0.0  ;;  %v4235_v55 = vmul.f32 -0.26, %v3297_v29  ;;  %v3299_v22 = vadd.f32 %v3298_v31, %v3086_v11  ;;  %v3088_v53 = vadd.f32 %v3087_v33, %v7288_v58  ;;  %v5364_v33 = vld [vmem:[%s7234_s0 + $0x50] ss:$8 sps:$4 sm:$0xff]   ;;  %v7294_v58 = vld [vmem:[#allocation26_spill] sm:$0xff] }
 0x214   :  { %v4341_v9 = vsel %vm4125_vm7, %v3293_v43, %v4233_v46  ;;  %v3089_v57 = vpop.f32.mrf.mxu0 }
 0x215   :  { %v3302_v0 = vpop.f32.mrf.mxu1  ;;  %4449 = vst [vmem:[%s7238_s4 + $0x290] sm:$0xff] %v4341_v9  ;;  %v4343_v25 = vsel %vm4127_vm8, %v3297_v29, %v4235_v55  ;;  %vm4128_vm9 = vcmp.gt.f32.partialorder %v3299_v22, 0.0  ;;  %v4236_v5 = vmul.f32 -0.26, %v3299_v22  ;;  %v3301_v60 = vadd.f32 %v3300_v16, %v3088_v53  ;;  %v7293_v29 = vld [vmem:[#allocation25_spill] sm:$0xff] }
 0x216   :  { %4451 = vst [vmem:[%s7238_s4 + $0x2a0] sm:$0xff] %v4343_v25  ;;  %v3090_v48 = vadd.f32 %v3089_v57, %v7289_v50  ;;  %v3093_v6 = vpop.f32.mrf.mxu0  ;;  %3746 = vmatmul.mubr.bf16.gmra.mxu0 %v5360_v18  ;;  %v5365_v16 = vld [vmem:[%s7235_s1 + $0x50] ss:$8 sps:$4 sm:$0xff]   ;;  %v5366_v9 = vld [vmem:[%s7234_s0 + $0x64] ss:$8 sps:$4 sm:$0xff]  }
 0x217   :  { %v3306_v19 = vpop.f32.mrf.mxu1  ;;  %3923 = vmatmul.mubr.bf16.gmra.mxu1 %v5361_v8  ;;  %v4344_v17 = vsel %vm4128_vm9, %v3299_v22, %v4236_v5  ;;  %vm4130_vm10 = vcmp.gt.f32.partialorder %v3301_v60, 0.0  ;;  %v4238_v61 = vmul.f32 -0.26, %v3301_v60  ;;  %v3094_v59 = vadd.f32 %v3093_v6, %v7290_v14  ;;  %3753 = vmatprep.mubr.bf16.mxu0 %v5362_v62  ;;  %v5367_v57 = vld [vmem:[%s7235_s1 + $0x64] ss:$8 sps:$4 sm:$0xff]   ;;  %v7296_v14 = vld [vmem:[#allocation28_spill] sm:$0xff] }
 0x218   :  { %3930 = vmatprep.mubr.bf16.mxu1 %v5363_v24  ;;  %4452 = vst [vmem:[%s7238_s4 + $0x2a8] sm:$0xff] %v4344_v17  ;;  %v3303_v10 = vadd.f32 %v3302_v0, %v3090_v48  ;;  %v3095_v38 = vpop.f32.mrf.mxu0  ;;  %v7295_v48 = vld [vmem:[#allocation27_spill] sm:$0xff] }
 0x219   :  { %v3308_v52 = vpop.f32.mrf.mxu1  ;;  %v4346_v44 = vsel %vm4130_vm10, %v3301_v60, %v4238_v61  ;;  %v3307_v2 = vadd.f32 %v3306_v19, %v3094_v59  ;;  %v3096_v63 = vadd.f32 %v3095_v38, %v7291_v27 }
 0x21a   :  { %4454 = vst [vmem:[%s7238_s4 + $0x2b8] sm:$0xff] %v4346_v44  ;;  %vm4131_vm11 = vcmp.gt.f32.partialorder %v3303_v10, 0.0  ;;  %v4239_v28 = vmul.f32 -0.26, %v3303_v10  ;;  %v3097_v15 = vpop.f32.mrf.mxu0 }
 0x21b   :  { %v3310_v32 = vpop.f32.mrf.mxu1  ;;  %vm4133_vm12 = vcmp.gt.f32.partialorder %v3307_v2, 0.0  ;;  %v4241_v42 = vmul.f32 -0.26, %v3307_v2  ;;  %v3309_v26 = vadd.f32 %v3308_v52, %v3096_v63  ;;  %v3098_v3 = vadd.f32 %v3097_v15, %v7292_v13  ;;  %v5368_v15 = vld [vmem:[%s7234_s0 + $0x60] ss:$8 sps:$4 sm:$0xff]  }
 0x21c   :  { %v4347_v47 = vsel %vm4131_vm11, %v3303_v10, %v4239_v28  ;;  %v3099_v41 = vpop.f32.mrf.mxu0 }
 0x21d   :  { %v3312_v43 = vpop.f32.mrf.mxu1  ;;  %4455 = vst [vmem:[%s7238_s4 + $0x2c0] sm:$0xff] %v4347_v47  ;;  %v4349_v20 = vsel %vm4133_vm12, %v3307_v2, %v4241_v42  ;;  %vm4134_vm13 = vcmp.gt.f32.partialorder %v3309_v26, 0.0  ;;  %v4242_v31 = vmul.f32 -0.26, %v3309_v26  ;;  %v3311_v4 = vadd.f32 %v3310_v32, %v3098_v3  ;;  %v7297_v2 = vld [vmem:[#allocation29_spill] sm:$0xff]  ;;  %v7298_v42 = vld [vmem:[#allocation8_spill] sm:$0xff] }
 0x21e   :  { %4457 = vst [vmem:[%s7238_s4 + $0x2d0] sm:$0xff] %v4349_v20  ;;  %v3100_v54 = vadd.f32 %v3099_v41, %v7293_v29  ;;  %v3103_v11 = vpop.f32.mrf.mxu0  ;;  %3754 = vmatmul.mubr.bf16.gmra.mxu0 %v5364_v33  ;;  %v5369_v32 = vld [vmem:[%s7235_s1 + $0x60] ss:$8 sps:$4 sm:$0xff]   ;;  %v5371_v20 = vld [vmem:[%s7235_s1 + $0x74] ss:$8 sps:$4 sm:$0xff]  }
 0x21f   :  { %v3316_v46 = vpop.f32.mrf.mxu1  ;;  %3931 = vmatmul.mubr.bf16.gmra.mxu1 %v5365_v16  ;;  %v4350_v55 = vsel %vm4134_vm13, %v3309_v26, %v4242_v31  ;;  %vm4136_vm14 = vcmp.gt.f32.partialorder %v3311_v4, 0.0  ;;  %v4244_v22 = vmul.f32 -0.26, %v3311_v4  ;;  %v3104_v53 = vadd.f32 %v3103_v11, %v7294_v58  ;;  %3761 = vmatprep.mubr.bf16.mxu0 %v5366_v9  ;;  %v7299_v47 = vld [vmem:[#allocation30_spill] sm:$0xff] }
 0x220   :  { %3938 = vmatprep.mubr.bf16.mxu1 %v5367_v57  ;;  %4458 = vst [vmem:[%s7238_s4 + $0x2d8] sm:$0xff] %v4350_v55  ;;  %v3313_v0 = vadd.f32 %v3312_v43, %v3100_v54  ;;  %v3105_v25 = vpop.f32.mrf.mxu0  ;;  %v734_v26 = vsub.s32 2, %v7298_v42  ;;  %v5370_v43 = vld [vmem:[%s7234_s0 + $0x74] ss:$8 sps:$4 sm:$0xff]  }
 0x221   :  { %v3318_v5 = vpop.f32.mrf.mxu1  ;;  %v4352_v60 = vsel %vm4136_vm14, %v3311_v4, %v4244_v22  ;;  %v3317_v50 = vadd.f32 %v3316_v46, %v3104_v53  ;;  %v3106_v6 = vadd.f32 %v3105_v25, %v7295_v48  ;;  %v5372_v22 = vld [vmem:[%s7237_s3] sm:$0x7]  ;;  %v7300_v48 = vld [vmem:[#allocation31_spill] sm:$0xff] }
 0x222   :  { %4460 = vst [vmem:[%s7238_s4 + $0x2e8] sm:$0xff] %v4352_v60  ;;  %vm4137_vm15 = vcmp.gt.f32.partialorder %v3313_v0, 0.0  ;;  %v4245_v19 = vmul.f32 -0.26, %v3313_v0  ;;  %v3107_v18 = vpop.f32.mrf.mxu0  ;;  %v6853_v58 = vrot.slane %v5372_v22, %v734_v26 }
 0x223   :  { %v3320_v8 = vpop.f32.mrf.mxu1  ;;  %vm4139_vm0 = vcmp.gt.f32.partialorder %v3317_v50, 0.0  ;;  %v4247_v17 = vmul.f32 -0.26, %v3317_v50  ;;  %v3319_v61 = vadd.f32 %v3318_v5, %v3106_v6  ;;  %v3108_v59 = vadd.f32 %v3107_v18, %v7296_v14 }
 0x224   :  { %v4353_v62 = vsel %vm4137_vm15, %v3313_v0, %v4245_v19  ;;  %v3109_v24 = vpop.f32.mrf.mxu0 }
 0x225   :  { %v3322_v10 = vpop.f32.mrf.mxu1  ;;  %4461 = vst [vmem:[%s7238_s4 + $0x2f0] sm:$0xff] %v4353_v62  ;;  %v4355_v38 = vsel %vm4139_vm0, %v3317_v50, %v4247_v17  ;;  %vm4140_vm1 = vcmp.gt.f32.partialorder %v3319_v61, 0.0  ;;  %v4248_v52 = vmul.f32 -0.26, %v3319_v61  ;;  %v3321_v44 = vadd.f32 %v3320_v8, %v3108_v59  ;;  %v5374_v8 = vld [vmem:[%s7235_s1 + $0x70] ss:$8 sps:$4 sm:$0xff]  }
 0x226   :  { %4463 = vst [vmem:[%s7238_s4 + $0x300] sm:$0xff] %v4355_v38  ;;  %v3110_v27 = vadd.f32 %v3109_v24, %v7297_v2  ;;  %v3113_v63 = vpop.f32.mrf.mxu0  ;;  %3762 = vmatmul.mubr.bf16.gmra.mxu0 %v5368_v15  ;;  %v5375_v59 = vld [vmem:[%s7234_s0 + $0x84] ss:$8 sps:$4 sm:$0xff]  }
 0x227   :  { %v3326_v28 = vpop.f32.mrf.mxu1  ;;  %3939 = vmatmul.mubr.bf16.gmra.mxu1 %v5369_v32  ;;  %v4356_v13 = vsel %vm4140_vm1, %v3319_v61, %v4248_v52  ;;  %vm4142_vm2 = vcmp.gt.f32.partialorder %v3321_v44, 0.0  ;;  %v4250_v3 = vmul.f32 -0.26, %v3321_v44  ;;  %v3114_v41 = vadd.f32 %v3113_v63, %v7299_v47  ;;  %3769 = vmatprep.mubr.bf16.mxu0 %v5370_v43  ;;  %v5376_v62 = vld [vmem:[%s7235_s1 + $0x84] ss:$8 sps:$4 sm:$0xff]  }
 0x228   :  { %3946 = vmatprep.mubr.bf16.mxu1 %v5371_v20  ;;  %4464 = vst [vmem:[%s7238_s4 + $0x308] sm:$0xff] %v4356_v13  ;;  %v3323_v31 = vadd.f32 %v3322_v10, %v3110_v27  ;;  %v3115_v4 = vpop.f32.mrf.mxu0  ;;  %v5377_v47 = vld [vmem:[%s7234_s0 + $0x80] ss:$8 sps:$4 sm:$0xff]   ;;  %v5379_v20 = vld [vmem:[%s7234_s0 + $0x94] ss:$8 sps:$4 sm:$0xff]  }
 0x229   :  { %v3328_v29 = vpop.f32.mrf.mxu1  ;;  %v4358_v54 = vsel %vm4142_vm2, %v3321_v44, %v4250_v3  ;;  %v3327_v11 = vadd.f32 %v3326_v28, %v3114_v41  ;;  %v3116_v46 = vadd.f32 %v3115_v4, %v6304_v30  ;;  %v5378_v41 = vld [vmem:[%s7235_s1 + $0x80] ss:$8 sps:$4 sm:$0xff]  }
 0x22a   :  { %4466 = vst [vmem:[%s7238_s4 + $0x318] sm:$0xff] %v4358_v54  ;;  %vm4143_vm3 = vcmp.gt.f32.partialorder %v3323_v31, 0.0  ;;  %v4251_v33 = vmul.f32 -0.26, %v3323_v31  ;;  %v3117_v16 = vpop.f32.mrf.mxu0 }
 0x22b   :  { %v3330_v55 = vpop.f32.mrf.mxu1  ;;  %vm4145_vm4 = vcmp.gt.f32.partialorder %v3327_v11, 0.0  ;;  %v4253_v53 = vmul.f32 -0.26, %v3327_v11  ;;  %v3329_v9 = vadd.f32 %v3328_v29, %v3116_v46  ;;  %v3118_v57 = vadd.f32 %v3117_v16, %v6307_v35  ;;  %v5373_v35 = vld [vmem:[%s7234_s0 + $0x70] ss:$8 sps:$4 sm:$0xff]  }
 0x22c   :  { %v4359_v30 = vsel %vm4143_vm3, %v3323_v31, %v4251_v33  ;;  %v3119_v0 = vpop.f32.mrf.mxu0  ;;  %v5380_v31 = vld [vmem:[%s7235_s1 + $0x94] ss:$8 sps:$4 sm:$0xff]  }
 0x22d   :  { %v3332_v25 = vpop.f32.mrf.mxu1  ;;  %4467 = vst [vmem:[%s7238_s4 + $0x320] sm:$0xff] %v4359_v30  ;;  %v4361_v5 = vsel %vm4145_vm4, %v3327_v11, %v4253_v53  ;;  %vm4146_vm5 = vcmp.gt.f32.partialorder %v3329_v9, 0.0  ;;  %v4254_v60 = vmul.f32 -0.26, %v3329_v9  ;;  %v3331_v50 = vadd.f32 %v3330_v55, %v3118_v57  ;;  %v5381_v57 = vld [vmem:[%s7234_s0 + $0x90] ss:$8 sps:$4 sm:$0xff]  }
 0x22e   :  { %4469 = vst [vmem:[%s7238_s4 + $0x330] sm:$0xff] %v4361_v5  ;;  %v3120_v6 = vadd.f32 %v3119_v0, %v7300_v48  ;;  %v3369_v19 = vpop.f32.mrf.mxu0  ;;  %3770 = vmatmul.mubr.bf16.gmra.mxu0 %v5373_v35  ;;  %v5382_v30 = vld [vmem:[%s7235_s1 + $0x90] ss:$8 sps:$4 sm:$0xff]   ;;  %v5384_v5 = vld [vmem:[%s7235_s1 + $0xb4] ss:$8 sps:$4 sm:$0xff]  }
 0x22f   :  { %v3546_v18 = vpop.f32.mrf.mxu1  ;;  %3947 = vmatmul.mubr.bf16.gmra.mxu1 %v5374_v8  ;;  %v4362_v17 = vsel %vm4146_vm5, %v3329_v9, %v4254_v60  ;;  %vm4148_vm6 = vcmp.gt.f32.partialorder %v3331_v50, 0.0  ;;  %v4256_v61 = vmul.f32 -0.26, %v3331_v50  ;;  %v3370_v14 = vadd.f32 %v3369_v19, %v6853_v58  ;;  %3777 = vmatprep.mubr.bf16.mxu0 %v5375_v59  ;;  %v5385_v59 = vld [vmem:[%s7234_s0 + $0xb0] ss:$8 sps:$4 sm:$0xff]  }
 0x230   :  { %3954 = vmatprep.mubr.bf16.mxu1 %v5376_v62  ;;  %4470 = vst [vmem:[%s7238_s4 + $0x338] sm:$0xff] %v4362_v17  ;;  %v3333_v24 = vadd.f32 %v3332_v25, %v3120_v6  ;;  %v3371_v10 = vpop.f32.mrf.mxu0  ;;  %v5383_v25 = vld [vmem:[%s7234_s0 + $0xb4] ss:$8 sps:$4 sm:$0xff]   ;;  %v5386_v62 = vld [vmem:[%s7235_s1 + $0xb0] ss:$8 sps:$4 sm:$0xff]  }
 0x231   :  { %v3548_v38 = vpop.f32.mrf.mxu1  ;;  %v4364_v52 = vsel %vm4148_vm6, %v3331_v50, %v4256_v61  ;;  %v6879_v44 = vadd.f32 %v3546_v18, %v3370_v14  ;;  %v5387_v10 = vld [vmem:[%s7234_s0 + $0xc4] ss:$8 sps:$4 sm:$0xff]  }
 0x232   :  { %4472 = vst [vmem:[%s7238_s4 + $0x348] sm:$0xff] %v4364_v52  ;;  %vm4149_vm7 = vcmp.gt.f32.partialorder %v3333_v24, 0.0  ;;  %v4257_v2 = vmul.f32 -0.26, %v3333_v24  ;;  %v3372_v27 = vpop.f32.mrf.mxu0  ;;  %v5388_v38 = vld [vmem:[%s7235_s1 + $0xc4] ss:$8 sps:$4 sm:$0xff]  }
 0x233   :  { %v3549_v63 = vpop.f32.mrf.mxu1  ;;  %v3373_v28 = vadd.f32 %v3372_v27, %v6853_v58 }
 0x234   :  { %v4365_v15 = vsel %vm4149_vm7, %v3333_v24, %v4257_v2  ;;  %v3374_v32 = vpop.f32.mrf.mxu0 }
 0x235   :  { %v3551_v42 = vpop.f32.mrf.mxu1  ;;  %4473 = vst [vmem:[%s7238_s4 + $0x350] sm:$0xff] %v4365_v15  ;;  %v6888_v26 = vadd.f32 %v3549_v63, %v3373_v28 }
 0x236   :  { %v3377_v13 = vpop.f32.mrf.mxu0  ;;  %3778 = vmatmul.mubr.bf16.gmra.mxu0 %v5377_v47 }
 0x237   :  { %v3554_v3 = vpop.f32.mrf.mxu1  ;;  %3955 = vmatmul.mubr.bf16.gmra.mxu1 %v5378_v41  ;;  %v3378_v43 = vadd.f32 %v3377_v13, %v6853_v58  ;;  %3785 = vmatprep.mubr.bf16.mxu0 %v5379_v20  ;;  %v5389_v41 = vld [vmem:[%s7234_s0 + $0xc0] ss:$8 sps:$4 sm:$0xff]  }
 0x238   :  { %3962 = vmatprep.mubr.bf16.mxu1 %v5380_v31  ;;  %v3379_v4 = vpop.f32.mrf.mxu0  ;;  %v5391_v31 = vld [vmem:[%s7234_s0 + $0xd4] ss:$8 sps:$4 sm:$0xff]  }
 0x239   :  { %v3556_v29 = vpop.f32.mrf.mxu1  ;;  %v6903_v54 = vadd.f32 %v3554_v3, %v3378_v43  ;;  %v5390_v43 = vld [vmem:[%s7235_s1 + $0xc0] ss:$8 sps:$4 sm:$0xff]   ;;  %v5392_v4 = vld [vmem:[%s7235_s1 + $0xd4] ss:$8 sps:$4 sm:$0xff]  }
 0x23a   :  { %v3380_v11 = vpop.f32.mrf.mxu0 }
 0x23b   :  { %v3557_v46 = vpop.f32.mrf.mxu1  ;;  %v3381_v33 = vadd.f32 %v3380_v11, %v6853_v58 }
 0x23c   :  { %v3382_v16 = vpop.f32.mrf.mxu0 }
 0x23d   :  { %v3559_v55 = vpop.f32.mrf.mxu1  ;;  %v6906_v22 = vadd.f32 %v3557_v46, %v3381_v33 }
 0x23e   :  { %v3385_v53 = vpop.f32.mrf.mxu0  ;;  %3786 = vmatmul.mubr.bf16.gmra.mxu0 %v5381_v57 }
 0x23f   :  { %v3562_v9 = vpop.f32.mrf.mxu1  ;;  %3963 = vmatmul.mubr.bf16.gmra.mxu1 %v5382_v30  ;;  %v3386_v0 = vadd.f32 %v3385_v53, %v6853_v58  ;;  %3793 = vmatprep.mubr.bf16.mxu0 %v5383_v25  ;;  %v5393_v25 = vld [vmem:[%s7234_s0 + $0xd0] ss:$8 sps:$4 sm:$0xff]  }
 0x240   :  { %3970 = vmatprep.mubr.bf16.mxu1 %v5384_v5  ;;  %v3387_v60 = vpop.f32.mrf.mxu0  ;;  %v5394_v5 = vld [vmem:[%s7235_s1 + $0xd0] ss:$8 sps:$4 sm:$0xff]  }
 0x241   :  { %v3564_v50 = vpop.f32.mrf.mxu1  ;;  %v6921_v48 = vadd.f32 %v3562_v9, %v3386_v0 }
 0x242   :  { %v3388_v6 = vpop.f32.mrf.mxu0  ;;  %v5395_v50 = vld [vmem:[%s7234_s0 + $0xe4] ss:$8 sps:$4 sm:$0xff]  }
 0x243   :  { %v3565_v19 = vpop.f32.mrf.mxu1  ;;  %v3389_v18 = vadd.f32 %v3388_v6, %v6853_v58  ;;  %v5396_v6 = vld [vmem:[%s7235_s1 + $0xe4] ss:$8 sps:$4 sm:$0xff]  }
 0x244   :  { %v3390_v35 = vpop.f32.mrf.mxu0 }
 0x245   :  { %v3567_v8 = vpop.f32.mrf.mxu1  ;;  %v6924_v17 = vadd.f32 %v3565_v19, %v3389_v18 }
 0x246   :  { %v3393_v61 = vpop.f32.mrf.mxu0  ;;  %3794 = vmatmul.mubr.bf16.gmra.mxu0 %v5385_v59 }
 0x247   :  { %v3570_v14 = vpop.f32.mrf.mxu1  ;;  %3971 = vmatmul.mubr.bf16.gmra.mxu1 %v5386_v62  ;;  %v3394_v24 = vadd.f32 %v3393_v61, %v6853_v58  ;;  %3801 = vmatprep.mubr.bf16.mxu0 %v5387_v10 }
 0x248   :  { %3978 = vmatprep.mubr.bf16.mxu1 %v5388_v38  ;;  %v3395_v52 = vpop.f32.mrf.mxu0 }
 0x249   :  { %v3572_v2 = vpop.f32.mrf.mxu1  ;;  %v6939_v27 = vadd.f32 %v3570_v14, %v3394_v24 }
 0x24a   :  { %v3396_v63 = vpop.f32.mrf.mxu0 }
 0x24b   :  { %v3573_v28 = vpop.f32.mrf.mxu1  ;;  %v3397_v15 = vadd.f32 %v3396_v63, %v6853_v58 }
 0x24c   :  { %v3398_v32 = vpop.f32.mrf.mxu0 }
 0x24d   :  { %v3575_v42 = vpop.f32.mrf.mxu1  ;;  %v6942_v13 = vadd.f32 %v3573_v28, %v3397_v15 }
 0x24e   :  { %v3401_v3 = vpop.f32.mrf.mxu0  ;;  %3802 = vmatmul.mubr.bf16.gmra.mxu0 %v5389_v41 }
 0x24f   :  { %v3578_v47 = vpop.f32.mrf.mxu1  ;;  %3979 = vmatmul.mubr.bf16.gmra.mxu1 %v5390_v43  ;;  %v3402_v20 = vadd.f32 %v3401_v3, %v6853_v58  ;;  %3809 = vmatprep.mubr.bf16.mxu0 %v5391_v31 }
 0x250   :  { %3986 = vmatprep.mubr.bf16.mxu1 %v5392_v4  ;;  %v3403_v29 = vpop.f32.mrf.mxu0 }
 0x251   :  { %v3580_v11 = vpop.f32.mrf.mxu1  ;;  %v6957_v46 = vadd.f32 %v3578_v47, %v3402_v20 }
 0x252   :  { %v3404_v33 = vpop.f32.mrf.mxu0 }
 0x253   :  { %v3581_v16 = vpop.f32.mrf.mxu1  ;;  %v3405_v55 = vadd.f32 %v3404_v33, %v6853_v58 }
 0x254   :  { %v3406_v53 = vpop.f32.mrf.mxu0 }
 0x255   :  { %v3583_v9 = vpop.f32.mrf.mxu1  ;;  %v6960_v57 = vadd.f32 %v3581_v16, %v3405_v55 }
 0x256   :  { %v3409_v30 = vpop.f32.mrf.mxu0  ;;  %3810 = vmatmul.mubr.bf16.gmra.mxu0 %v5393_v25 }
 0x257   :  { %v3586_v0 = vpop.f32.mrf.mxu1  ;;  %3987 = vmatmul.mubr.bf16.gmra.mxu1 %v5394_v5  ;;  %v3410_v60 = vadd.f32 %v3409_v30, %v6853_v58  ;;  %3817 = vmatprep.mubr.bf16.mxu0 %v5395_v50  ;;  %v5398_v50 = vld [vmem:[%s7235_s1 + $0x124] ss:$8 sps:$4 sm:$0xff]  }
 0x258   :  { %3994 = vmatprep.mubr.bf16.mxu1 %v5396_v6  ;;  %v3411_v19 = vpop.f32.mrf.mxu0 }
 0x259   :  { %v3588_v18 = vpop.f32.mrf.mxu1  ;;  %v6975_v35 = vadd.f32 %v3586_v0, %v3410_v60 }
 0x25a   :  { %v3412_v8 = vpop.f32.mrf.mxu0 }
 0x25b   :  { %v3589_v61 = vpop.f32.mrf.mxu1  ;;  %v3413_v14 = vadd.f32 %v3412_v8, %v6853_v58 }
 0x25c   :  { %v3414_v59 = vpop.f32.mrf.mxu0 }
 0x25d   :  { %v3591_v62 = vpop.f32.mrf.mxu1  ;;  %v6978_v24 = vadd.f32 %v3589_v61, %v3413_v14 }
 0x25e   :  { %v3417_v10 = vpop.f32.mrf.mxu0  ;;  %3818 = vmatmul.mubr.bf16.gmra.mxu0 %v6510_v7 }
 0x25f   :  { %v3594_v38 = vpop.f32.mrf.mxu1  ;;  %3995 = vmatmul.mubr.bf16.gmra.mxu1 %v6516_v39  ;;  %v3418_v52 = vadd.f32 %v3417_v10, %v6853_v58  ;;  %3825 = vmatprep.mubr.bf16.mxu0 %v6523_v12 }
 0x260   :  { %4002 = vmatprep.mubr.bf16.mxu1 %v6529_v51  ;;  %v3419_v2 = vpop.f32.mrf.mxu0 }
 0x261   :  { %v3596_v63 = vpop.f32.mrf.mxu1  ;;  %v6985_v28 = vadd.f32 %v3594_v38, %v3418_v52  ;;  %v5399_v38 = vld [vmem:[%s7234_s0 + $0x120] ss:$8 sps:$4 sm:$0xff]  }
 0x262   :  { %v3420_v15 = vpop.f32.mrf.mxu0  ;;  %v5400_v52 = vld [vmem:[%s7235_s1 + $0x120] ss:$8 sps:$4 sm:$0xff]   ;;  %v5401_v63 = vld [vmem:[%s7234_s0 + $0x134] ss:$8 sps:$4 sm:$0xff]  }
 0x263   :  { %v3597_v32 = vpop.f32.mrf.mxu1  ;;  %v3421_v42 = vadd.f32 %v3420_v15, %v6853_v58  ;;  %v5402_v15 = vld [vmem:[%s7235_s1 + $0x134] ss:$8 sps:$4 sm:$0xff]  }
 0x264   :  { %v3422_v3 = vpop.f32.mrf.mxu0 }
 0x265   :  { %v3599_v47 = vpop.f32.mrf.mxu1  ;;  %v6988_v41 = vadd.f32 %v3597_v32, %v3421_v42 }
 0x266   :  { %v3425_v7 = vpop.f32.mrf.mxu0  ;;  %3826 = vmatmul.mubr.bf16.gmra.mxu0 %v6550_v21 }
 0x267   :  { %v3602_v39 = vpop.f32.mrf.mxu1  ;;  %4003 = vmatmul.mubr.bf16.gmra.mxu1 %v6556_v40  ;;  %v3426_v12 = vadd.f32 %v3425_v7, %v6853_v58  ;;  %3833 = vmatprep.mubr.bf16.mxu0 %v6563_v37 }
 0x268   :  { %4010 = vmatprep.mubr.bf16.mxu1 %v6569_v23  ;;  %v3427_v51 = vpop.f32.mrf.mxu0 }
 0x269   :  { %v3604_v43 = vpop.f32.mrf.mxu1  ;;  %v6995_v20 = vadd.f32 %v3602_v39, %v3426_v12 }
 0x26a   :  { %v3428_v31 = vpop.f32.mrf.mxu0 }
 0x26b   :  { %v3605_v4 = vpop.f32.mrf.mxu1  ;;  %v3429_v29 = vadd.f32 %v3428_v31, %v6853_v58 }
 0x26c   :  { %v3430_v11 = vpop.f32.mrf.mxu0 }
 0x26d   :  { %v3607_v33 = vpop.f32.mrf.mxu1  ;;  %v6998_v16 = vadd.f32 %v3605_v4, %v3429_v29  ;;  %v5403_v29 = vld [vmem:[%s7234_s0 + $0x130] ss:$8 sps:$4 sm:$0xff]  }
 0x26e   :  { %v3433_v21 = vpop.f32.mrf.mxu0  ;;  %3834 = vmatmul.mubr.bf16.gmra.mxu0 %v6590_v34  ;;  %v5404_v11 = vld [vmem:[%s7235_s1 + $0x130] ss:$8 sps:$4 sm:$0xff]  }
 0x26f   :  { %v3610_v40 = vpop.f32.mrf.mxu1  ;;  %4011 = vmatmul.mubr.bf16.gmra.mxu1 %v6596_v49  ;;  %v3434_v37 = vadd.f32 %v3433_v21, %v6853_v58  ;;  %3841 = vmatprep.mubr.bf16.mxu0 %v6603_v1 }
 0x270   :  { %4018 = vmatprep.mubr.bf16.mxu1 %v6609_v36  ;;  %v3435_v23 = vpop.f32.mrf.mxu0  ;;  %v5397_v36 = vld [vmem:[%s7234_s0 + $0x124] ss:$8 sps:$4 sm:$0xff]  }
 0x271   :  { %v3612_v55 = vpop.f32.mrf.mxu1  ;;  %v7005_v53 = vadd.f32 %v3610_v40, %v3434_v37 }
 0x272   :  { %v3436_v9 = vpop.f32.mrf.mxu0 }
 0x273   :  { %v3613_v30 = vpop.f32.mrf.mxu1  ;;  %v3437_v0 = vadd.f32 %v3436_v9, %v6853_v58 }
 0x274   :  { %v3438_v25 = vpop.f32.mrf.mxu0 }
 0x275   :  { %v3615_v5 = vpop.f32.mrf.mxu1  ;;  %v7008_v60 = vadd.f32 %v3613_v30, %v3437_v0 }
 0x276   :  { %v3441_v34 = vpop.f32.mrf.mxu0  ;;  %3842 = vmatmul.mubr.bf16.gmra.mxu0 %v6630_v45 }
 0x277   :  { %v3618_v49 = vpop.f32.mrf.mxu1  ;;  %4019 = vmatmul.mubr.bf16.gmra.mxu1 %v6636_v56  ;;  %v3442_v1 = vadd.f32 %v3441_v34, %v6853_v58  ;;  %3849 = vmatprep.mubr.bf16.mxu0 %v5397_v36 }
 0x278   :  { %4026 = vmatprep.mubr.bf16.mxu1 %v5398_v50  ;;  %v3443_v6 = vpop.f32.mrf.mxu0 }
 0x279   :  { %v3620_v19 = vpop.f32.mrf.mxu1  ;;  %v7019_v18 = vadd.f32 %v3618_v49, %v3442_v1 }
 0x27a   :  { %v3444_v8 = vpop.f32.mrf.mxu0 }
 0x27b   :  { %v3621_v45 = vpop.f32.mrf.mxu1  ;;  %v3445_v56 = vadd.f32 %v3444_v8, %v6853_v58 }
 0x27c   :  { %v3446_v61 = vpop.f32.mrf.mxu0 }
 0x27d   :  { %v3623_v14 = vpop.f32.mrf.mxu1  ;;  %v7022_v59 = vadd.f32 %v3621_v45, %v3445_v56 }
 0x27e   :  { %v3449_v62 = vpop.f32.mrf.mxu0  ;;  %3850 = vmatmul.mubr.bf16.gmra.mxu0 %v5399_v38 }
 0x27f   :  { %v3626_v10 = vpop.f32.mrf.mxu1  ;;  %4027 = vmatmul.mubr.bf16.gmra.mxu1 %v5400_v52  ;;  %v3450_v2 = vadd.f32 %v3449_v62, %v6853_v58  ;;  %3857 = vmatprep.mubr.bf16.mxu0 %v5401_v63 }
 0x280   :  { %4034 = vmatprep.mubr.bf16.mxu1 %v5402_v15  ;;  %v3451_v32 = vpop.f32.mrf.mxu0 }
 0x281   :  { %v3628_v42 = vpop.f32.mrf.mxu1  ;;  %v7037_v3 = vadd.f32 %v3626_v10, %v3450_v2 }
 0x282   :  { %v3452_v47 = vpop.f32.mrf.mxu0 }
 0x283   :  { %v3629_v7 = vpop.f32.mrf.mxu1  ;;  %v3453_v39 = vadd.f32 %v3452_v47, %v6853_v58 }
 0x284   :  { %v3454_v12 = vpop.f32.mrf.mxu0 }
 0x285   :  { %v3631_v51 = vpop.f32.mrf.mxu1  ;;  %v7040_v43 = vadd.f32 %v3629_v7, %v3453_v39 }
 0x286   :  { %v3457_v31 = vpop.f32.mrf.mxu0  ;;  %3858 = vmatmul.mubr.bf16.gmra.mxu0 %v5403_v29 }
 0x287   :  { %v3634_v4 = vpop.f32.mrf.mxu1  ;;  %4035 = vmatmul.mubr.bf16.gmra.mxu1 %v5404_v11  ;;  %v3458_v33 = vadd.f32 %v3457_v31, %v6853_v58 }
 0x288   :  { %v3459_v21 = vpop.f32.mrf.mxu0 }
 0x289   :  { %v3636_v40 = vpop.f32.mrf.mxu1  ;;  %v7049_v37 = vadd.f32 %v3634_v4, %v3458_v33 }
 0x28a   :  { %v3460_v23 = vpop.f32.mrf.mxu0 }
 0x28b   :  { %v3637_v55 = vpop.f32.mrf.mxu1  ;;  %v3461_v9 = vadd.f32 %v3460_v23, %v6853_v58 }
 0x28c   :  { %v3462_v30 = vpop.f32.mrf.mxu0 }
 0x28d   :  { %v3639_v0 = vpop.f32.mrf.mxu1  ;;  %v7052_v25 = vadd.f32 %v3637_v55, %v3461_v9 }
 0x28e   :  { %v3465_v5 = vpop.f32.mrf.mxu0 }
 0x28f   :  { %v3642_v34 = vpop.f32.mrf.mxu1  ;;  %v3466_v49 = vadd.f32 %v3465_v5, %v6853_v58 }
 0x290   :  { %v3467_v1 = vpop.f32.mrf.mxu0 }
 0x291   :  { %v3644_v36 = vpop.f32.mrf.mxu1  ;;  %v7055_v50 = vadd.f32 %v3642_v34, %v3466_v49 }
 0x292   :  { %v3468_v6 = vpop.f32.mrf.mxu0 }
 0x293   :  { %v3645_v19 = vpop.f32.mrf.mxu1  ;;  %v3469_v8 = vadd.f32 %v3468_v6, %v6853_v58 }
 0x294   :  { %v3470_v45 = vpop.f32.mrf.mxu0 }
 0x295   :  { %v3647_v56 = vpop.f32.mrf.mxu1  ;;  %v7058_v61 = vadd.f32 %v3645_v19, %v3469_v8 }
 0x296   :  { %v3473_v14 = vpop.f32.mrf.mxu0 }
 0x297   :  { %v3650_v62 = vpop.f32.mrf.mxu1  ;;  %v3474_v10 = vadd.f32 %v3473_v14, %v6853_v58 }
 0x298   :  { %v3475_v38 = vpop.f32.mrf.mxu0 }
 0x299   :  { %v3652_v52 = vpop.f32.mrf.mxu1  ;;  %v7061_v2 = vadd.f32 %v3650_v62, %v3474_v10 }
 0x29a   :  { %v3476_v63 = vpop.f32.mrf.mxu0 }
 0x29b   :  { %v3653_v15 = vpop.f32.mrf.mxu1  ;;  %v3477_v32 = vadd.f32 %v3476_v63, %v6853_v58 }
 0x29c   :  { %v3478_v42 = vpop.f32.mrf.mxu0 }
 0x29d   :  { %v3655_v47 = vpop.f32.mrf.mxu1  ;;  %v7064_v7 = vadd.f32 %v3653_v15, %v3477_v32 }
 0x29e   :  { %v3481_v39 = vpop.f32.mrf.mxu0 }
 0x29f   :  { %v3658_v12 = vpop.f32.mrf.mxu1  ;;  %v3482_v51 = vadd.f32 %v3481_v39, %v6853_v58 }
 0x2a0   :  { %v3483_v31 = vpop.f32.mrf.mxu0 }
 0x2a1   :  { %v3660_v4 = vpop.f32.mrf.mxu1  ;;  %v7067_v29 = vadd.f32 %v3658_v12, %v3482_v51 }
 0x2a2   :  { %v3484_v11 = vpop.f32.mrf.mxu0 }
 0x2a3   :  { %v3661_v33 = vpop.f32.mrf.mxu1  ;;  %v3485_v21 = vadd.f32 %v3484_v11, %v6853_v58 }
 0x2a4   :  { %v3486_v40 = vpop.f32.mrf.mxu0 }
 0x2a5   :  { %v3663_v23 = vpop.f32.mrf.mxu1  ;;  %v7070_v55 = vadd.f32 %v3661_v33, %v3485_v21 }
 0x2a6   :  { %v3489_v9 = vpop.f32.mrf.mxu0 }
 0x2a7   :  { %v3666_v30 = vpop.f32.mrf.mxu1  ;;  %v3490_v0 = vadd.f32 %v3489_v9, %v6853_v58 }
 0x2a8   :  { %v3491_v5 = vpop.f32.mrf.mxu0 }
 0x2a9   :  { %v3668_v34 = vpop.f32.mrf.mxu1  ;;  %v7073_v49 = vadd.f32 %v3666_v30, %v3490_v0 }
 0x2aa   :  { %v3492_v1 = vpop.f32.mrf.mxu0 }
 0x2ab   :  { %v3669_v36 = vpop.f32.mrf.mxu1  ;;  %v3493_v6 = vadd.f32 %v3492_v1, %v6853_v58 }
 0x2ac   :  { %v3494_v19 = vpop.f32.mrf.mxu0 }
 0x2ad   :  { %v3671_v8 = vpop.f32.mrf.mxu1  ;;  %v7076_v45 = vadd.f32 %v3669_v36, %v3493_v6 }
 0x2ae   :  { %v3497_v56 = vpop.f32.mrf.mxu0 }
 0x2af   :  { %v3674_v14 = vpop.f32.mrf.mxu1  ;;  %v3498_v62 = vadd.f32 %v3497_v56, %v6853_v58 }
 0x2b0   :  { %v3499_v10 = vpop.f32.mrf.mxu0 }
 0x2b1   :  { %v3676_v38 = vpop.f32.mrf.mxu1  ;;  %v7079_v52 = vadd.f32 %v3674_v14, %v3498_v62 }
 0x2b2   :  { %v3500_v63 = vpop.f32.mrf.mxu0 }
 0x2b3   :  { %v3677_v15 = vpop.f32.mrf.mxu1  ;;  %v3501_v32 = vadd.f32 %v3500_v63, %v6853_v58 }
 0x2b4   :  { %v3502_v42 = vpop.f32.mrf.mxu0 }
 0x2b5   :  { %v3679_v47 = vpop.f32.mrf.mxu1  ;;  %v7082_v39 = vadd.f32 %v3677_v15, %v3501_v32 }
 0x2b6   :  { %v3505_v12 = vpop.f32.mrf.mxu0 }
 0x2b7   :  { %v3682_v51 = vpop.f32.mrf.mxu1  ;;  %v3506_v31 = vadd.f32 %v3505_v12, %v6853_v58 }
 0x2b8   :  { %v3507_v4 = vpop.f32.mrf.mxu0 }
 0x2b9   :  { %v3684_v11 = vpop.f32.mrf.mxu1  ;;  %v7085_v33 = vadd.f32 %v3682_v51, %v3506_v31 }
 0x2ba   :  { %v3508_v21 = vpop.f32.mrf.mxu0 }
 0x2bb   :  { %v3685_v40 = vpop.f32.mrf.mxu1  ;;  %v3509_v23 = vadd.f32 %v3508_v21, %v6853_v58 }
 0x2bc   :  { %v3510_v9 = vpop.f32.mrf.mxu0 }
 0x2bd   :  { %v3687_v30 = vpop.f32.mrf.mxu1  ;;  %v7088_v0 = vadd.f32 %v3685_v40, %v3509_v23 }
 0x2be   :  { %v3723_v5 = vpop.f32.mrf.mxu0 }
 0x2bf   :  { %v3900_v34 = vpop.f32.mrf.mxu1  ;;  %v3724_v1 = vadd.f32 %v3723_v5, %v6879_v44 }
 0x2c0   :  { %v3725_v36 = vpop.f32.mrf.mxu0 }
 0x2c1   :  { %v3902_v6 = vpop.f32.mrf.mxu1  ;;  %v3901_v19 = vadd.f32 %v3900_v34, %v3724_v1 }
 0x2c2   :  { %v3726_v8 = vpop.f32.mrf.mxu0 }
 0x2c3   :  { %v3903_v56 = vpop.f32.mrf.mxu1  ;;  %vm4045_vm8 = vcmp.gt.f32.partialorder %v3901_v19, 0.0  ;;  %v4153_v14 = vmul.f32 -0.26, %v3901_v19  ;;  %v3727_v62 = vadd.f32 %v3726_v8, %v6888_v26 }
 0x2c4   :  { %v3728_v10 = vpop.f32.mrf.mxu0 }
 0x2c5   :  { %v3905_v38 = vpop.f32.mrf.mxu1  ;;  %v4261_v58 = vsel %vm4045_vm8, %v3901_v19, %v4153_v14  ;;  %v3904_v63 = vadd.f32 %v3903_v56, %v3727_v62 }
 0x2c6   :  { %4369 = vst [vmem:[%s7238_s4 + $0x10] sm:$0xff] %v4261_v58  ;;  %v3731_v15 = vpop.f32.mrf.mxu0 }
 0x2c7   :  { %v3908_v32 = vpop.f32.mrf.mxu1  ;;  %vm4048_vm9 = vcmp.gt.f32.partialorder %v3904_v63, 0.0  ;;  %v4156_v44 = vmul.f32 -0.26, %v3904_v63  ;;  %v3732_v42 = vadd.f32 %v3731_v15, %v6903_v54 }
 0x2c8   :  { %v3733_v47 = vpop.f32.mrf.mxu0 }
 0x2c9   :  { %v3910_v12 = vpop.f32.mrf.mxu1  ;;  %v4264_v51 = vsel %vm4048_vm9, %v3904_v63, %v4156_v44  ;;  %v3909_v31 = vadd.f32 %v3908_v32, %v3732_v42 }
 0x2ca   :  { %4372 = vst [vmem:[%s7238_s4 + $0x28] sm:$0xff] %v4264_v51  ;;  %v3734_v26 = vpop.f32.mrf.mxu0 }
 0x2cb   :  { %v3911_v4 = vpop.f32.mrf.mxu1  ;;  %vm4051_vm10 = vcmp.gt.f32.partialorder %v3909_v31, 0.0  ;;  %v4159_v11 = vmul.f32 -0.26, %v3909_v31  ;;  %v3735_v21 = vadd.f32 %v3734_v26, %v6906_v22 }
 0x2cc   :  { %v3736_v40 = vpop.f32.mrf.mxu0 }
 0x2cd   :  { %v3913_v23 = vpop.f32.mrf.mxu1  ;;  %v4267_v9 = vsel %vm4051_vm10, %v3909_v31, %v4159_v11  ;;  %v3912_v30 = vadd.f32 %v3911_v4, %v3735_v21 }
 0x2ce   :  { %4375 = vst [vmem:[%s7238_s4 + $0x40] sm:$0xff] %v4267_v9  ;;  %v3739_v54 = vpop.f32.mrf.mxu0 }
 0x2cf   :  { %v3916_v5 = vpop.f32.mrf.mxu1  ;;  %vm4054_vm11 = vcmp.gt.f32.partialorder %v3912_v30, 0.0  ;;  %v4162_v34 = vmul.f32 -0.26, %v3912_v30  ;;  %v3740_v1 = vadd.f32 %v3739_v54, %v6921_v48 }
 0x2d0   :  { %v3741_v36 = vpop.f32.mrf.mxu0 }
 0x2d1   :  { %v3918_v6 = vpop.f32.mrf.mxu1  ;;  %v4270_v19 = vsel %vm4054_vm11, %v3912_v30, %v4162_v34  ;;  %v3917_v8 = vadd.f32 %v3916_v5, %v3740_v1 }
 0x2d2   :  { %4378 = vst [vmem:[%s7238_s4 + $0x58] sm:$0xff] %v4270_v19  ;;  %v3742_v22 = vpop.f32.mrf.mxu0 }
 0x2d3   :  { %v3919_v56 = vpop.f32.mrf.mxu1  ;;  %vm4057_vm12 = vcmp.gt.f32.partialorder %v3917_v8, 0.0  ;;  %v4165_v14 = vmul.f32 -0.26, %v3917_v8  ;;  %v3743_v62 = vadd.f32 %v3742_v22, %v6924_v17 }
 0x2d4   :  { %v3744_v10 = vpop.f32.mrf.mxu0 }
 0x2d5   :  { %v3921_v38 = vpop.f32.mrf.mxu1  ;;  %v4273_v58 = vsel %vm4057_vm12, %v3917_v8, %v4165_v14  ;;  %v3920_v63 = vadd.f32 %v3919_v56, %v3743_v62 }
 0x2d6   :  { %4381 = vst [vmem:[%s7238_s4 + $0x70] sm:$0xff] %v4273_v58  ;;  %v3747_v48 = vpop.f32.mrf.mxu0 }
 0x2d7   :  { %v3924_v15 = vpop.f32.mrf.mxu1  ;;  %vm4060_vm13 = vcmp.gt.f32.partialorder %v3920_v63, 0.0  ;;  %v4168_v32 = vmul.f32 -0.26, %v3920_v63  ;;  %v3748_v44 = vadd.f32 %v3747_v48, %v6939_v27 }
 0x2d8   :  { %v3749_v42 = vpop.f32.mrf.mxu0 }
 0x2d9   :  { %v3926_v47 = vpop.f32.mrf.mxu1  ;;  %v4276_v12 = vsel %vm4060_vm13, %v3920_v63, %v4168_v32  ;;  %v3925_v51 = vadd.f32 %v3924_v15, %v3748_v44 }
 0x2da   :  { %4384 = vst [vmem:[%s7238_s4 + $0x88] sm:$0xff] %v4276_v12  ;;  %v3750_v17 = vpop.f32.mrf.mxu0 }
 0x2db   :  { %v3927_v31 = vpop.f32.mrf.mxu1  ;;  %vm4063_vm14 = vcmp.gt.f32.partialorder %v3925_v51, 0.0  ;;  %v4171_v26 = vmul.f32 -0.26, %v3925_v51  ;;  %v3751_v4 = vadd.f32 %v3750_v17, %v6942_v13 }
 0x2dc   :  { %v3752_v11 = vpop.f32.mrf.mxu0 }
 0x2dd   :  { %v3929_v21 = vpop.f32.mrf.mxu1  ;;  %v4279_v40 = vsel %vm4063_vm14, %v3925_v51, %v4171_v26  ;;  %v3928_v23 = vadd.f32 %v3927_v31, %v3751_v4 }
 0x2de   :  { %4387 = vst [vmem:[%s7238_s4 + $0xa0] sm:$0xff] %v4279_v40  ;;  %v3755_v27 = vpop.f32.mrf.mxu0 }
 0x2df   :  { %v3932_v9 = vpop.f32.mrf.mxu1  ;;  %vm4066_vm15 = vcmp.gt.f32.partialorder %v3928_v23, 0.0  ;;  %v4174_v30 = vmul.f32 -0.26, %v3928_v23  ;;  %v3756_v54 = vadd.f32 %v3755_v27, %v6957_v46 }
 0x2e0   :  { %v3757_v5 = vpop.f32.mrf.mxu0 }
 0x2e1   :  { %v3934_v34 = vpop.f32.mrf.mxu1  ;;  %v4282_v1 = vsel %vm4066_vm15, %v3928_v23, %v4174_v30  ;;  %v3933_v36 = vadd.f32 %v3932_v9, %v3756_v54 }
 0x2e2   :  { %4390 = vst [vmem:[%s7238_s4 + $0xb8] sm:$0xff] %v4282_v1  ;;  %v3758_v13 = vpop.f32.mrf.mxu0 }
 0x2e3   :  { %v3935_v6 = vpop.f32.mrf.mxu1  ;;  %vm4069_vm0 = vcmp.gt.f32.partialorder %v3933_v36, 0.0  ;;  %v4177_v19 = vmul.f32 -0.26, %v3933_v36  ;;  %v3759_v8 = vadd.f32 %v3758_v13, %v6960_v57 }
 0x2e4   :  { %v3760_v22 = vpop.f32.mrf.mxu0 }
 0x2e5   :  { %v3937_v56 = vpop.f32.mrf.mxu1  ;;  %v4285_v14 = vsel %vm4069_vm0, %v3933_v36, %v4177_v19  ;;  %v3936_v62 = vadd.f32 %v3935_v6, %v3759_v8 }
 0x2e6   :  { %4393 = vst [vmem:[%s7238_s4 + $0xd0] sm:$0xff] %v4285_v14  ;;  %v3763_v46 = vpop.f32.mrf.mxu0 }
 0x2e7   :  { %v3940_v10 = vpop.f32.mrf.mxu1  ;;  %vm4072_vm1 = vcmp.gt.f32.partialorder %v3936_v62, 0.0  ;;  %v4180_v38 = vmul.f32 -0.26, %v3936_v62  ;;  %v3764_v58 = vadd.f32 %v3763_v46, %v6975_v35 }
 0x2e8   :  { %v3765_v63 = vpop.f32.mrf.mxu0 }
 0x2e9   :  { %v3942_v48 = vpop.f32.mrf.mxu1  ;;  %v4288_v15 = vsel %vm4072_vm1, %v3936_v62, %v4180_v38  ;;  %v3941_v32 = vadd.f32 %v3940_v10, %v3764_v58 }
 0x2ea   :  { %4396 = vst [vmem:[%s7238_s4 + $0xe8] sm:$0xff] %v4288_v15  ;;  %v3766_v57 = vpop.f32.mrf.mxu0 }
 0x2eb   :  { %v3943_v44 = vpop.f32.mrf.mxu1  ;;  %vm4075_vm2 = vcmp.gt.f32.partialorder %v3941_v32, 0.0  ;;  %v4183_v42 = vmul.f32 -0.26, %v3941_v32  ;;  %v3767_v47 = vadd.f32 %v3766_v57, %v6978_v24 }
 0x2ec   :  { %v3768_v12 = vpop.f32.mrf.mxu0 }
 0x2ed   :  { %v3945_v51 = vpop.f32.mrf.mxu1  ;;  %v4291_v17 = vsel %vm4075_vm2, %v3941_v32, %v4183_v42  ;;  %v3944_v31 = vadd.f32 %v3943_v44, %v3767_v47 }
 0x2ee   :  { %4399 = vst [vmem:[%s7238_s4 + $0x100] sm:$0xff] %v4291_v17  ;;  %v3771_v35 = vpop.f32.mrf.mxu0 }
 0x2ef   :  { %v3948_v26 = vpop.f32.mrf.mxu1  ;;  %vm4078_vm3 = vcmp.gt.f32.partialorder %v3944_v31, 0.0  ;;  %v4186_v4 = vmul.f32 -0.26, %v3944_v31  ;;  %v3772_v11 = vadd.f32 %v3771_v35, %v6985_v28 }
 0x2f0   :  { %v3773_v21 = vpop.f32.mrf.mxu0 }
 0x2f1   :  { %v3950_v40 = vpop.f32.mrf.mxu1  ;;  %v4294_v23 = vsel %vm4078_vm3, %v3944_v31, %v4186_v4  ;;  %v3949_v27 = vadd.f32 %v3948_v26, %v3772_v11 }
 0x2f2   :  { %4402 = vst [vmem:[%s7238_s4 + $0x118] sm:$0xff] %v4294_v23  ;;  %v3774_v24 = vpop.f32.mrf.mxu0 }
 0x2f3   :  { %v3951_v9 = vpop.f32.mrf.mxu1  ;;  %vm4081_vm4 = vcmp.gt.f32.partialorder %v3949_v27, 0.0  ;;  %v4189_v30 = vmul.f32 -0.26, %v3949_v27  ;;  %v3775_v54 = vadd.f32 %v3774_v24, %v6988_v41 }
 0x2f4   :  { %v3776_v5 = vpop.f32.mrf.mxu0 }
 0x2f5   :  { %v3953_v34 = vpop.f32.mrf.mxu1  ;;  %v4297_v1 = vsel %vm4081_vm4, %v3949_v27, %v4189_v30  ;;  %v3952_v36 = vadd.f32 %v3951_v9, %v3775_v54 }
 0x2f6   :  { %4405 = vst [vmem:[%s7238_s4 + $0x130] sm:$0xff] %v4297_v1  ;;  %v3779_v28 = vpop.f32.mrf.mxu0 }
 0x2f7   :  { %v3956_v13 = vpop.f32.mrf.mxu1  ;;  %vm4084_vm5 = vcmp.gt.f32.partialorder %v3952_v36, 0.0  ;;  %v4192_v6 = vmul.f32 -0.26, %v3952_v36  ;;  %v3780_v19 = vadd.f32 %v3779_v28, %v6995_v20 }
 0x2f8   :  { %v3781_v8 = vpop.f32.mrf.mxu0 }
 0x2f9   :  { %v3958_v22 = vpop.f32.mrf.mxu1  ;;  %v4300_v56 = vsel %vm4084_vm5, %v3952_v36, %v4192_v6  ;;  %v3957_v14 = vadd.f32 %v3956_v13, %v3780_v19 }
 0x2fa   :  { %4408 = vst [vmem:[%s7238_s4 + $0x148] sm:$0xff] %v4300_v56  ;;  %v3782_v41 = vpop.f32.mrf.mxu0 }
 0x2fb   :  { %v3959_v62 = vpop.f32.mrf.mxu1  ;;  %vm4087_vm6 = vcmp.gt.f32.partialorder %v3957_v14, 0.0  ;;  %v4195_v46 = vmul.f32 -0.26, %v3957_v14  ;;  %v3783_v10 = vadd.f32 %v3782_v41, %v6998_v16 }
 0x2fc   :  { %v3784_v38 = vpop.f32.mrf.mxu0 }
 0x2fd   :  { %v3961_v58 = vpop.f32.mrf.mxu1  ;;  %v4303_v63 = vsel %vm4087_vm6, %v3957_v14, %v4195_v46  ;;  %v3960_v48 = vadd.f32 %v3959_v62, %v3783_v10 }
 0x2fe   :  { %4411 = vst [vmem:[%s7238_s4 + $0x160] sm:$0xff] %v4303_v63  ;;  %v3787_v20 = vpop.f32.mrf.mxu0 }
 0x2ff   :  { %v3964_v15 = vpop.f32.mrf.mxu1  ;;  %vm4090_vm7 = vcmp.gt.f32.partialorder %v3960_v48, 0.0  ;;  %v4198_v32 = vmul.f32 -0.26, %v3960_v48  ;;  %v3788_v57 = vadd.f32 %v3787_v20, %v7005_v53 }
 0x300   :  { %v3789_v44 = vpop.f32.mrf.mxu0 }
 0x301   :  { %v3966_v42 = vpop.f32.mrf.mxu1  ;;  %v4306_v47 = vsel %vm4090_vm7, %v3960_v48, %v4198_v32  ;;  %v3965_v12 = vadd.f32 %v3964_v15, %v3788_v57 }
 0x302   :  { %4414 = vst [vmem:[%s7238_s4 + $0x178] sm:$0xff] %v4306_v47  ;;  %v3790_v16 = vpop.f32.mrf.mxu0 }
 0x303   :  { %v3967_v51 = vpop.f32.mrf.mxu1  ;;  %vm4093_vm8 = vcmp.gt.f32.partialorder %v3965_v12, 0.0  ;;  %v4201_v17 = vmul.f32 -0.26, %v3965_v12  ;;  %v3791_v31 = vadd.f32 %v3790_v16, %v7008_v60 }
 0x304   :  { %v3792_v35 = vpop.f32.mrf.mxu0 }
 0x305   :  { %v3969_v26 = vpop.f32.mrf.mxu1  ;;  %v4309_v4 = vsel %vm4093_vm8, %v3965_v12, %v4201_v17  ;;  %v3968_v11 = vadd.f32 %v3967_v51, %v3791_v31 }
 0x306   :  { %4417 = vst [vmem:[%s7238_s4 + $0x190] sm:$0xff] %v4309_v4  ;;  %v3795_v53 = vpop.f32.mrf.mxu0 }
 0x307   :  { %v3972_v21 = vpop.f32.mrf.mxu1  ;;  %vm4096_vm9 = vcmp.gt.f32.partialorder %v3968_v11, 0.0  ;;  %v4204_v40 = vmul.f32 -0.26, %v3968_v11  ;;  %v3796_v23 = vadd.f32 %v3795_v53, %v7019_v18 }
 0x308   :  { %v3797_v27 = vpop.f32.mrf.mxu0 }
 0x309   :  { %v3974_v24 = vpop.f32.mrf.mxu1  ;;  %v4312_v9 = vsel %vm4096_vm9, %v3968_v11, %v4204_v40  ;;  %v3973_v30 = vadd.f32 %v3972_v21, %v3796_v23 }
 0x30a   :  { %4420 = vst [vmem:[%s7238_s4 + $0x1a8] sm:$0xff] %v4312_v9  ;;  %v3798_v60 = vpop.f32.mrf.mxu0 }
 0x30b   :  { %v3975_v54 = vpop.f32.mrf.mxu1  ;;  %vm4099_vm10 = vcmp.gt.f32.partialorder %v3973_v30, 0.0  ;;  %v4207_v5 = vmul.f32 -0.26, %v3973_v30  ;;  %v3799_v34 = vadd.f32 %v3798_v60, %v7022_v59 }
 0x30c   :  { %v3800_v1 = vpop.f32.mrf.mxu0 }
 0x30d   :  { %v3977_v36 = vpop.f32.mrf.mxu1  ;;  %v4315_v28 = vsel %vm4099_vm10, %v3973_v30, %v4207_v5  ;;  %v3976_v13 = vadd.f32 %v3975_v54, %v3799_v34 }
 0x30e   :  { %4423 = vst [vmem:[%s7238_s4 + $0x1c0] sm:$0xff] %v4315_v28  ;;  %v3803_v18 = vpop.f32.mrf.mxu0 }
 0x30f   :  { %v3980_v6 = vpop.f32.mrf.mxu1  ;;  %vm4102_vm11 = vcmp.gt.f32.partialorder %v3976_v13, 0.0  ;;  %v4210_v19 = vmul.f32 -0.26, %v3976_v13  ;;  %v3804_v8 = vadd.f32 %v3803_v18, %v7037_v3 }
 0x310   :  { %v3805_v22 = vpop.f32.mrf.mxu0 }
 0x311   :  { %v3982_v56 = vpop.f32.mrf.mxu1  ;;  %v4318_v14 = vsel %vm4102_vm11, %v3976_v13, %v4210_v19  ;;  %v3981_v41 = vadd.f32 %v3980_v6, %v3804_v8 }
 0x312   :  { %4426 = vst [vmem:[%s7238_s4 + $0x1d8] sm:$0xff] %v4318_v14  ;;  %v3806_v59 = vpop.f32.mrf.mxu0 }
 0x313   :  { %v3983_v62 = vpop.f32.mrf.mxu1  ;;  %vm4105_vm12 = vcmp.gt.f32.partialorder %v3981_v41, 0.0  ;;  %v4213_v46 = vmul.f32 -0.26, %v3981_v41  ;;  %v3807_v10 = vadd.f32 %v3806_v59, %v7040_v43 }
 0x314   :  { %v3808_v38 = vpop.f32.mrf.mxu0 }
 0x315   :  { %v3985_v58 = vpop.f32.mrf.mxu1  ;;  %v4321_v63 = vsel %vm4105_vm12, %v3981_v41, %v4213_v46  ;;  %v3984_v48 = vadd.f32 %v3983_v62, %v3807_v10 }
 0x316   :  { %4429 = vst [vmem:[%s7238_s4 + $0x1f0] sm:$0xff] %v4321_v63  ;;  %v3811_v3 = vpop.f32.mrf.mxu0 }
 0x317   :  { %v3988_v20 = vpop.f32.mrf.mxu1  ;;  %vm4108_vm13 = vcmp.gt.f32.partialorder %v3984_v48, 0.0  ;;  %v4216_v15 = vmul.f32 -0.26, %v3984_v48  ;;  %v3812_v32 = vadd.f32 %v3811_v3, %v7049_v37 }
 0x318   :  { %v3813_v57 = vpop.f32.mrf.mxu0 }
 0x319   :  { %v3990_v44 = vpop.f32.mrf.mxu1  ;;  %v4324_v42 = vsel %vm4108_vm13, %v3984_v48, %v4216_v15  ;;  %v3989_v47 = vadd.f32 %v3988_v20, %v3812_v32 }
 0x31a   :  { %4432 = vst [vmem:[%s7238_s4 + $0x208] sm:$0xff] %v4324_v42  ;;  %v3814_v43 = vpop.f32.mrf.mxu0 }
 0x31b   :  { %v3991_v12 = vpop.f32.mrf.mxu1  ;;  %vm4111_vm14 = vcmp.gt.f32.partialorder %v3989_v47, 0.0  ;;  %v4219_v16 = vmul.f32 -0.26, %v3989_v47  ;;  %v3815_v51 = vadd.f32 %v3814_v43, %v7052_v25 }
 0x31c   :  { %v3816_v17 = vpop.f32.mrf.mxu0 }
 0x31d   :  { %v3993_v31 = vpop.f32.mrf.mxu1  ;;  %v4327_v35 = vsel %vm4111_vm14, %v3989_v47, %v4219_v16  ;;  %v3992_v26 = vadd.f32 %v3991_v12, %v3815_v51 }
 0x31e   :  { %4435 = vst [vmem:[%s7238_s4 + $0x220] sm:$0xff] %v4327_v35  ;;  %v3819_v37 = vpop.f32.mrf.mxu0 }
 0x31f   :  { %v3996_v4 = vpop.f32.mrf.mxu1  ;;  %vm4114_vm15 = vcmp.gt.f32.partialorder %v3992_v26, 0.0  ;;  %v4222_v11 = vmul.f32 -0.26, %v3992_v26  ;;  %v3820_v53 = vadd.f32 %v3819_v37, %v7055_v50 }
 0x320   :  { %v3821_v21 = vpop.f32.mrf.mxu0 }
 0x321   :  { %v3998_v40 = vpop.f32.mrf.mxu1  ;;  %v4330_v23 = vsel %vm4114_vm15, %v3992_v26, %v4222_v11  ;;  %v3997_v27 = vadd.f32 %v3996_v4, %v3820_v53 }
 0x322   :  { %4438 = vst [vmem:[%s7238_s4 + $0x238] sm:$0xff] %v4330_v23  ;;  %v3822_v25 = vpop.f32.mrf.mxu0 }
 0x323   :  { %v3999_v24 = vpop.f32.mrf.mxu1  ;;  %vm4117_vm0 = vcmp.gt.f32.partialorder %v3997_v27, 0.0  ;;  %v4225_v9 = vmul.f32 -0.26, %v3997_v27  ;;  %v3823_v30 = vadd.f32 %v3822_v25, %v7058_v61 }
 0x324   :  { %v3824_v60 = vpop.f32.mrf.mxu0 }
 0x325   :  { %v4001_v54 = vpop.f32.mrf.mxu1  ;;  %v4333_v5 = vsel %vm4117_vm0, %v3997_v27, %v4225_v9  ;;  %v4000_v34 = vadd.f32 %v3999_v24, %v3823_v30 }
 0x326   :  { %4441 = vst [vmem:[%s7238_s4 + $0x250] sm:$0xff] %v4333_v5  ;;  %v3827_v50 = vpop.f32.mrf.mxu0 }
 0x327   :  { %v4004_v1 = vpop.f32.mrf.mxu1  ;;  %vm4120_vm1 = vcmp.gt.f32.partialorder %v4000_v34, 0.0  ;;  %v4228_v36 = vmul.f32 -0.26, %v4000_v34  ;;  %v3828_v28 = vadd.f32 %v3827_v50, %v7061_v2 }
 0x328   :  { %v3829_v13 = vpop.f32.mrf.mxu0 }
 0x329   :  { %v4006_v18 = vpop.f32.mrf.mxu1  ;;  %v4336_v6 = vsel %vm4120_vm1, %v4000_v34, %v4228_v36  ;;  %v4005_v19 = vadd.f32 %v4004_v1, %v3828_v28 }
 0x32a   :  { %4444 = vst [vmem:[%s7238_s4 + $0x268] sm:$0xff] %v4336_v6  ;;  %v3830_v61 = vpop.f32.mrf.mxu0 }
 0x32b   :  { %v4007_v8 = vpop.f32.mrf.mxu1  ;;  %vm4123_vm2 = vcmp.gt.f32.partialorder %v4005_v19, 0.0  ;;  %v4231_v22 = vmul.f32 -0.26, %v4005_v19  ;;  %v3831_v56 = vadd.f32 %v3830_v61, %v7064_v7 }
 0x32c   :  { %v3832_v14 = vpop.f32.mrf.mxu0 }
 0x32d   :  { %v4009_v41 = vpop.f32.mrf.mxu1  ;;  %v4339_v59 = vsel %vm4123_vm2, %v4005_v19, %v4231_v22  ;;  %v4008_v62 = vadd.f32 %v4007_v8, %v3831_v56 }
 0x32e   :  { %4447 = vst [vmem:[%s7238_s4 + $0x280] sm:$0xff] %v4339_v59  ;;  %v3835_v2 = vpop.f32.mrf.mxu0 }
 0x32f   :  { %v4012_v46 = vpop.f32.mrf.mxu1  ;;  %vm4126_vm3 = vcmp.gt.f32.partialorder %v4008_v62, 0.0  ;;  %v4234_v10 = vmul.f32 -0.26, %v4008_v62  ;;  %v3836_v38 = vadd.f32 %v3835_v2, %v7067_v29 }
 0x330   :  { %v3837_v58 = vpop.f32.mrf.mxu0 }
 0x331   :  { %v4014_v63 = vpop.f32.mrf.mxu1  ;;  %v4342_v48 = vsel %vm4126_vm3, %v4008_v62, %v4234_v10  ;;  %v4013_v3 = vadd.f32 %v4012_v46, %v3836_v38 }
 0x332   :  { %4450 = vst [vmem:[%s7238_s4 + $0x298] sm:$0xff] %v4342_v48  ;;  %v3838_v7 = vpop.f32.mrf.mxu0 }
 0x333   :  { %v4015_v20 = vpop.f32.mrf.mxu1  ;;  %vm4129_vm4 = vcmp.gt.f32.partialorder %v4013_v3, 0.0  ;;  %v4237_v15 = vmul.f32 -0.26, %v4013_v3  ;;  %v3839_v32 = vadd.f32 %v3838_v7, %v7070_v55 }
 0x334   :  { %v3840_v57 = vpop.f32.mrf.mxu0 }
 0x335   :  { %v4017_v44 = vpop.f32.mrf.mxu1  ;;  %v4345_v42 = vsel %vm4129_vm4, %v4013_v3, %v4237_v15  ;;  %v4016_v47 = vadd.f32 %v4015_v20, %v3839_v32 }
 0x336   :  { %4453 = vst [vmem:[%s7238_s4 + $0x2b0] sm:$0xff] %v4345_v42  ;;  %v3843_v29 = vpop.f32.mrf.mxu0 }
 0x337   :  { %v4020_v43 = vpop.f32.mrf.mxu1  ;;  %vm4132_vm5 = vcmp.gt.f32.partialorder %v4016_v47, 0.0  ;;  %v4240_v12 = vmul.f32 -0.26, %v4016_v47  ;;  %v3844_v16 = vadd.f32 %v3843_v29, %v7073_v49 }
 0x338   :  { %v3845_v51 = vpop.f32.mrf.mxu0 }
 0x339   :  { %v4022_v17 = vpop.f32.mrf.mxu1  ;;  %v4348_v31 = vsel %vm4132_vm5, %v4016_v47, %v4240_v12  ;;  %v4021_v35 = vadd.f32 %v4020_v43, %v3844_v16 }
 0x33a   :  { %4456 = vst [vmem:[%s7238_s4 + $0x2c8] sm:$0xff] %v4348_v31  ;;  %v3846_v55 = vpop.f32.mrf.mxu0 }
 0x33b   :  { %v4023_v26 = vpop.f32.mrf.mxu1  ;;  %vm4135_vm6 = vcmp.gt.f32.partialorder %v4021_v35, 0.0  ;;  %v4243_v37 = vmul.f32 -0.26, %v4021_v35  ;;  %v3847_v4 = vadd.f32 %v3846_v55, %v7076_v45 }
 0x33c   :  { %v3848_v11 = vpop.f32.mrf.mxu0 }
 0x33d   :  { %v4025_v53 = vpop.f32.mrf.mxu1  ;;  %v4351_v21 = vsel %vm4135_vm6, %v4021_v35, %v4243_v37  ;;  %v4024_v40 = vadd.f32 %v4023_v26, %v3847_v4 }
 0x33e   :  { %4459 = vst [vmem:[%s7238_s4 + $0x2e0] sm:$0xff] %v4351_v21  ;;  %v3851_v49 = vpop.f32.mrf.mxu0 }
 0x33f   :  { %v4028_v23 = vpop.f32.mrf.mxu1  ;;  %vm4138_vm7 = vcmp.gt.f32.partialorder %v4024_v40, 0.0  ;;  %v4246_v27 = vmul.f32 -0.26, %v4024_v40  ;;  %v3852_v25 = vadd.f32 %v3851_v49, %v7079_v52 }
 0x340   :  { %v3853_v24 = vpop.f32.mrf.mxu0 }
 0x341   :  { %v4030_v9 = vpop.f32.mrf.mxu1  ;;  %v4354_v30 = vsel %vm4138_vm7, %v4024_v40, %v4246_v27  ;;  %v4029_v60 = vadd.f32 %v4028_v23, %v3852_v25 }
 0x342   :  { %4462 = vst [vmem:[%s7238_s4 + $0x2f8] sm:$0xff] %v4354_v30  ;;  %v3854_v45 = vpop.f32.mrf.mxu0 }
 0x343   :  { %v4031_v54 = vpop.f32.mrf.mxu1  ;;  %vm4141_vm8 = vcmp.gt.f32.partialorder %v4029_v60, 0.0  ;;  %v4249_v5 = vmul.f32 -0.26, %v4029_v60  ;;  %v3855_v34 = vadd.f32 %v3854_v45, %v7082_v39 }
 0x344   :  { %v3856_v50 = vpop.f32.mrf.mxu0 }
 0x345   :  { %v4033_v1 = vpop.f32.mrf.mxu1  ;;  %v4357_v36 = vsel %vm4141_vm8, %v4029_v60, %v4249_v5  ;;  %v4032_v28 = vadd.f32 %v4031_v54, %v3855_v34 }
 0x346   :  { %4465 = vst [vmem:[%s7238_s4 + $0x310] sm:$0xff] %v4357_v36  ;;  %v3859_v52 = vpop.f32.mrf.mxu0 }
 0x347   :  { %v4036_v13 = vpop.f32.mrf.mxu1  ;;  %vm4144_vm9 = vcmp.gt.f32.partialorder %v4032_v28, 0.0  ;;  %v4252_v18 = vmul.f32 -0.26, %v4032_v28  ;;  %v3860_v6 = vadd.f32 %v3859_v52, %v7085_v33 }
 0x348   :  { %v3861_v19 = vpop.f32.mrf.mxu0 }
 0x349   :  { %v4038_v61 = vpop.f32.mrf.mxu1  ;;  %v4360_v8 = vsel %vm4144_vm9, %v4032_v28, %v4252_v18  ;;  %v4037_v22 = vadd.f32 %v4036_v13, %v3860_v6 }
 0x34a   :  { %4468 = vst [vmem:[%s7238_s4 + $0x328] sm:$0xff] %v4360_v8  ;;  %v3862_v39 = vpop.f32.mrf.mxu0 }
 0x34b   :  { %v4039_v56 = vpop.f32.mrf.mxu1  ;;  %vm4147_vm10 = vcmp.gt.f32.partialorder %v4037_v22, 0.0  ;;  %v4255_v14 = vmul.f32 -0.26, %v4037_v22  ;;  %v3863_v41 = vadd.f32 %v3862_v39, %v7088_v0 }
 0x34c   :  { %v3864_v59 = vpop.f32.mrf.mxu0 }
 0x34d   :  { %v4041_v62 = vpop.f32.mrf.mxu1  ;;  %v4363_v2 = vsel %vm4147_vm10, %v4037_v22, %v4255_v14  ;;  %v4040_v46 = vadd.f32 %v4039_v56, %v3863_v41 }
 0x34e   :  { %4471 = vst [vmem:[%s7238_s4 + $0x340] sm:$0xff] %v4363_v2 }
 0x34f   :  { %vm4150_vm11 = vcmp.gt.f32.partialorder %v4040_v46, 0.0  ;;  %v4258_v33 = vmul.f32 -0.26, %v4040_v46 }
 0x351   :  { %v4366_v10 = vsel %vm4150_vm11, %v4040_v46, %v4258_v33 }
 0x352   :  { %4474 = vst [vmem:[%s7238_s4 + $0x358] sm:$0xff] %v4366_v10 }
 0x353   :  { %4479 = vsyncpa [#allocation4], 1 }

</bundles_post_ra>
